<compile_context>
chip_gen: v7x
topology: tpu7x:2x2x1
jax: 0.10.0
libtpu: 0.0.40
codegen_flags: <defaults>
</compile_context>

<pallas_src>
import functools
import math

import jax
import jax.numpy as jnp
from jax.experimental import pallas as pl
from jax.experimental.pallas import tpu as pltpu


class Config:
    vocab_size = 50
    hidden_size = 32
    num_attention_heads = 4
    intermediate_size = 64
    num_hidden_layers = 2
    max_position_embeddings = 16
    layer_norm_eps = 1e-12


# ----------------------------------------------------------------------------
# In-kernel helpers (traced inside the fused kernels)
# ----------------------------------------------------------------------------

def _layernorm(x, g, b, eps):
    mu = jnp.mean(x, axis=-1, keepdims=True)
    var = jnp.mean(jnp.square(x - mu), axis=-1, keepdims=True)
    return (x - mu) * jax.lax.rsqrt(var + eps) * g + b


def _mha(q, k, v, num_heads, head_dim, causal):
    """q: (Sq, H), k/v: (Sk, H); heads packed along the lane (last) axis."""
    Sq, Sk = q.shape[0], k.shape[0]
    scale = 1.0 / math.sqrt(head_dim)
    if causal:
        row = jax.lax.broadcasted_iota(jnp.int32, (Sq, Sk), 0)
        col = jax.lax.broadcasted_iota(jnp.int32, (Sq, Sk), 1)
        neg = jnp.where(row >= col, 0.0, -1e9).astype(jnp.float32)
    outs = []
    for h in range(num_heads):                      # static loop over lane slices
        sl = slice(h * head_dim, (h + 1) * head_dim)
        s = jnp.dot(q[:, sl], k[:, sl].T, preferred_element_type=jnp.float32)
        s = s * scale
        if causal:
            s = s + neg
        s = s - jnp.max(s, axis=-1, keepdims=True)
        p = jnp.exp(s)
        p = p * pl.reciprocal(jnp.sum(p, axis=-1, keepdims=True), approx=True)
        outs.append(jnp.dot(p, v[:, sl], preferred_element_type=jnp.float32))
    return jnp.concatenate(outs, axis=-1)


# ----------------------------------------------------------------------------
# Pallas kernels
# ----------------------------------------------------------------------------

def _embed_ln_kernel(x_ref, g_ref, b_ref, o_ref, *, eps):
    x = x_ref[...].astype(jnp.float32)
    o_ref[...] = _layernorm(x, g_ref[...], b_ref[...], eps).astype(o_ref.dtype)


def _decoder_layer_kernel(
        dec_ref, enc_ref,
        wqkv_ref, bqkv_ref, wso_ref, bso_ref, ln1g_ref, ln1b_ref,
        cwq_ref, cbq_ref, cwkv_ref, cbkv_ref, cwo_ref, cbo_ref, ln2g_ref, ln2b_ref,
        w1_ref, b1_ref, w2_ref, b2_ref, ln3g_ref, ln3b_ref,
        out_ref,
        *, num_heads, head_dim, eps, use_cross):
    H = num_heads * head_dim
    x = dec_ref[...].astype(jnp.float32)            # (S, H)

    # --- self attention (fused QKV matmul) + residual + LN1 ---
    qkv = jnp.dot(x, wqkv_ref[...], preferred_element_type=jnp.float32) + bqkv_ref[...]
    a = _mha(qkv[:, :H], qkv[:, H:2 * H], qkv[:, 2 * H:],
             num_heads, head_dim, causal=True)
    a = jnp.dot(a, wso_ref[...], preferred_element_type=jnp.float32) + bso_ref[...]
    x = _layernorm(a + x, ln1g_ref[...], ln1b_ref[...], eps)

    # --- cross attention (fused KV matmul) + residual + LN2 ---
    if use_cross:
        enc = enc_ref[...].astype(jnp.float32)      # (Se, H)
        q = jnp.dot(x, cwq_ref[...], preferred_element_type=jnp.float32) + cbq_ref[...]
        kv = jnp.dot(enc, cwkv_ref[...], preferred_element_type=jnp.float32) + cbkv_ref[...]
        c = _mha(q, kv[:, :H], kv[:, H:], num_heads, head_dim, causal=False)
        c = jnp.dot(c, cwo_ref[...], preferred_element_type=jnp.float32) + cbo_ref[...]
        x = _layernorm(c + x, ln2g_ref[...], ln2b_ref[...], eps)

    # --- FFN (GELU) + residual + LN3 ---
    h = jnp.dot(x, w1_ref[...], preferred_element_type=jnp.float32) + b1_ref[...]
    h = jax.nn.gelu(h)
    f = jnp.dot(h, w2_ref[...], preferred_element_type=jnp.float32) + b2_ref[...]
    x = _layernorm(f + x, ln3g_ref[...], ln3b_ref[...], eps)

    out_ref[...] = x.astype(out_ref.dtype)


def _logits_kernel(x_ref, w_ref, b_ref, o_ref):
    o = jnp.dot(x_ref[...].astype(jnp.float32), w_ref[...],
                preferred_element_type=jnp.float32) + b_ref[...]
    o_ref[...] = o.astype(o_ref.dtype)


# ----------------------------------------------------------------------------
# Wrappers (one pallas_call each; grid over batch, "parallel")
# ----------------------------------------------------------------------------

def positional_embeddings(params, ids, cfg):
    """Token emb + positional emb (plain-JAX gather) + Pallas LayerNorm."""
    B, S = ids.shape
    H = cfg.hidden_size
    h = jnp.take(params["word_emb"], ids, axis=0) + params["pos_emb"][None, :S, :]
    kern = functools.partial(_embed_ln_kernel, eps=cfg.layer_norm_eps)
    return pl.pallas_call(
        kern,
        out_shape=jax.ShapeDtypeStruct((B, S, H), h.dtype),
        grid=(B,),
        in_specs=[
            pl.BlockSpec((None, S, H), lambda b: (b, 0, 0)),
            pl.BlockSpec((1, H), lambda b: (0, 0)),
            pl.BlockSpec((1, H), lambda b: (0, 0)),
        ],
        out_specs=pl.BlockSpec((None, S, H), lambda b: (b, 0, 0)),
        compiler_params=pltpu.CompilerParams(dimension_semantics=("parallel",)),
    )(h, params["emb_ln_g"], params["emb_ln_b"])


def decoder_layer(p, dec, enc, cfg):
    B, S, H = dec.shape
    F = cfg.intermediate_size
    NH = cfg.num_attention_heads
    HD = H // NH
    use_cross = enc is not None
    if enc is None:
        enc = dec                                   # dummy, never read
    Se = enc.shape[1]

    kern = functools.partial(_decoder_layer_kernel, num_heads=NH, head_dim=HD,
                             eps=cfg.layer_norm_eps, use_cross=use_cross)

    def full(shape):
        return pl.BlockSpec(shape, lambda b: (0,) * len(shape))

    in_specs = [
        pl.BlockSpec((None, S, H), lambda b: (b, 0, 0)),     # dec (one batch row)
        pl.BlockSpec((None, Se, H), lambda b: (b, 0, 0)),    # enc (one batch row)
        full((H, 3 * H)), full((1, 3 * H)),                  # fused self-attn QKV
        full((H, H)), full((1, H)),                          # self-attn out proj
        full((1, H)), full((1, H)),                          # LN1
        full((H, H)), full((1, H)),                          # cross Q
        full((H, 2 * H)), full((1, 2 * H)),                  # fused cross KV
        full((H, H)), full((1, H)),                          # cross out proj
        full((1, H)), full((1, H)),                          # LN2
        full((H, F)), full((1, F)),                          # FFN W1
        full((F, H)), full((1, H)),                          # FFN W2
        full((1, H)), full((1, H)),                          # LN3
    ]
    return pl.pallas_call(
        kern,
        out_shape=jax.ShapeDtypeStruct((B, S, H), dec.dtype),
        grid=(B,),
        in_specs=in_specs,
        out_specs=pl.BlockSpec((None, S, H), lambda b: (b, 0, 0)),
        compiler_params=pltpu.CompilerParams(dimension_semantics=("parallel",)),
    )(dec, enc,
      p["wqkv"], p["bqkv"], p["wso"], p["bso"], p["ln1_g"], p["ln1_b"],
      p["cwq"], p["cbq"], p["cwkv"], p["cbkv"], p["cwo"], p["cbo"],
      p["ln2_g"], p["ln2_b"],
      p["w1"], p["b1"], p["w2"], p["b2"], p["ln3_g"], p["ln3_b"])


def output_logits(params, x, cfg):
    B, S, H = x.shape
    Vp = params["out_w_pad"].shape[1]               # 128 (lane-dense)
    logits = pl.pallas_call(
        _logits_kernel,
        out_shape=jax.ShapeDtypeStruct((B, S, Vp), x.dtype),
        grid=(B,),
        in_specs=[
            pl.BlockSpec((None, S, H), lambda b: (b, 0, 0)),
            pl.BlockSpec((H, Vp), lambda b: (0, 0)),
            pl.BlockSpec((1, Vp), lambda b: (0, 0)),
        ],
        out_specs=pl.BlockSpec((None, S, Vp), lambda b: (b, 0, 0)),
        compiler_params=pltpu.CompilerParams(dimension_semantics=("parallel",)),
    )(x, params["out_w_pad"], params["out_b_pad"])
    return logits[:, :, :cfg.vocab_size]            # drop lane padding in JAX


def transformer_decoder(params, ids, enc_src, cfg):
    # Masks are generated inside the fused layer kernel: causal (== trg_mask of
    # the reference driver) for self-attn, no mask (all-ones src_mask) for
    # cross-attn.
    x = positional_embeddings(params, ids, cfg)
    for lp in params["layers"]:
        x = decoder_layer(lp, x, enc_src, cfg)
    return output_logits(params, x, cfg)


# ----------------------------------------------------------------------------
# Parameter init (fused QKV / KV weights, padded vocab projection)
# ----------------------------------------------------------------------------

def init_params(cfg, key):
    keys = iter(jax.random.split(key, 128))
    H, F, V = cfg.hidden_size, cfg.intermediate_size, cfg.vocab_size

    def dense(fan_in, fan_out):
        w = 0.02 * jax.random.normal(next(keys), (fan_in, fan_out), jnp.float32)
        b = jnp.zeros((1, fan_out), jnp.float32)
        return w, b

    def ln():
        return jnp.ones((1, H), jnp.float32), jnp.zeros((1, H), jnp.float32)

    params = {
        "word_emb": 0.02 * jax.random.normal(next(keys), (V, H), jnp.float32),
        "pos_emb": 0.02 * jax.random.normal(
            next(keys), (cfg.max_position_embeddings, H), jnp.float32),
        "emb_ln_g": jnp.ones((1, H), jnp.float32),
        "emb_ln_b": jnp.zeros((1, H), jnp.float32),
        "layers": [],
    }
    for _ in range(cfg.num_hidden_layers):
        layer = {}
        layer["wqkv"], layer["bqkv"] = dense(H, 3 * H)       # fused self-attn QKV
        layer["wso"], layer["bso"] = dense(H, H)
        layer["cwq"], layer["cbq"] = dense(H, H)
        layer["cwkv"], layer["cbkv"] = dense(H, 2 * H)       # fused cross-attn KV
        layer["cwo"], layer["cbo"] = dense(H, H)
        layer["ln1_g"], layer["ln1_b"] = ln()
        layer["ln2_g"], layer["ln2_b"] = ln()
        layer["ln3_g"], layer["ln3_b"] = ln()
        layer["w1"], layer["b1"] = dense(H, F)
        layer["w2"], layer["b2"] = dense(F, H)
        params["layers"].append(layer)

    # Output projection padded to a lane-dense width (50 -> 128).
    Vp = ((V + 127) // 128) * 128
    w, b = dense(H, V)
    params["out_w_pad"] = jnp.zeros((H, Vp), jnp.float32).at[:, :V].set(w)
    params["out_b_pad"] = jnp.zeros((1, Vp), jnp.float32).at[:, :V].set(b)
    return params


# ----------------------------------------------------------------------------
# Driver
# ----------------------------------------------------------------------------

if __name__ == "__main__":
    cfg = Config()
    B, S_dec, S_enc = 2, 8, 8

    key = jax.random.PRNGKey(0)
    k_params, k_ids, k_enc = jax.random.split(key, 3)

    params = init_params(cfg, k_params)

    # decoder input: token ids
    ids = jax.random.randint(k_ids, (B, S_dec), 0, cfg.vocab_size, dtype=jnp.int32)
    # encoder output: (B, S_enc, H)
    enc_src = 0.5 * jax.random.normal(k_enc, (B, S_enc, cfg.hidden_size), jnp.float32)

    fwd = jax.jit(functools.partial(transformer_decoder, cfg=cfg))
    out = fwd(params, ids, enc_src)
    out = jax.block_until_ready(out)

    assert out.shape == (B, S_dec, cfg.vocab_size), out.shape
    assert bool(jnp.all(jnp.isfinite(out)))
    print("KERNEL_OK")
</pallas_src>

<mosaic_0001>
module attributes {stable_mosaic.version = 11 : i64} {
  func.func @_embed_ln_kernel(%arg0: i32, %arg1: memref<1x8x32xf32, #tpu.memory_space<vmem>>, %arg2: memref<1x32xf32, #tpu.memory_space<vmem>>, %arg3: memref<1x32xf32, #tpu.memory_space<vmem>>, %arg4: memref<1x8x32xf32, #tpu.memory_space<vmem>>) attributes {dimension_semantics = [#tpu.dimension_semantics<parallel>], iteration_bounds = array<i64: 2>, scalar_prefetch = 0 : i64, scratch_operands = 0 : i64, tpu.core_type = #tpu.core_type<tc>, window_params = [{transform_indices = @transform_0, window_bounds = array<i64: 1, 8, 32>}, {pipeline_mode = #tpu.pipeline_mode<synchronous>, transform_indices = @transform_1, window_bounds = array<i64: 1, 32>}, {pipeline_mode = #tpu.pipeline_mode<synchronous>, transform_indices = @transform_2, window_bounds = array<i64: 1, 32>}, {transform_indices = @transform_3, window_bounds = array<i64: 1, 8, 32>}]} {
    %c0 = arith.constant 0 : index
    %c0_0 = arith.constant 0 : index
    %c0_1 = arith.constant 0 : index
    %0 = vector.load %arg1[%c0, %c0_0, %c0_1] : memref<1x8x32xf32, #tpu.memory_space<vmem>>, vector<1x8x32xf32>
    %1 = vector.shape_cast %0 : vector<1x8x32xf32> to vector<8x32xf32>
    %c0_2 = arith.constant 0 : index
    %c0_3 = arith.constant 0 : index
    %2 = vector.load %arg2[%c0_2, %c0_3] : memref<1x32xf32, #tpu.memory_space<vmem>>, vector<1x32xf32>
    %c0_4 = arith.constant 0 : index
    %c0_5 = arith.constant 0 : index
    %3 = vector.load %arg3[%c0_4, %c0_5] : memref<1x32xf32, #tpu.memory_space<vmem>>, vector<1x32xf32>
    %cst = arith.constant dense<0.000000e+00> : vector<8xf32>
    %4 = vector.multi_reduction <add>, %1, %cst [1] : vector<8x32xf32> to vector<8xf32>
    %5 = vector.shape_cast %4 : vector<8xf32> to vector<8x1xf32>
    %cst_6 = arith.constant 3.200000e+01 : f32
    %6 = vector.broadcast %cst_6 : f32 to vector<8x1xf32>
    %7 = arith.divf %5, %6 : vector<8x1xf32>
    %8 = vector.broadcast %7 : vector<8x1xf32> to vector<8x32xf32>
    %9 = arith.subf %1, %8 : vector<8x32xf32>
    %10 = arith.mulf %9, %9 : vector<8x32xf32>
    %cst_7 = arith.constant dense<0.000000e+00> : vector<8xf32>
    %11 = vector.multi_reduction <add>, %10, %cst_7 [1] : vector<8x32xf32> to vector<8xf32>
    %12 = vector.shape_cast %11 : vector<8xf32> to vector<8x1xf32>
    %cst_8 = arith.constant 3.200000e+01 : f32
    %13 = vector.broadcast %cst_8 : f32 to vector<8x1xf32>
    %14 = arith.divf %12, %13 : vector<8x1xf32>
    %15 = vector.broadcast %7 : vector<8x1xf32> to vector<8x32xf32>
    %16 = arith.subf %1, %15 : vector<8x32xf32>
    %cst_9 = arith.constant 9.99999996E-13 : f32
    %17 = vector.broadcast %cst_9 : f32 to vector<8x1xf32>
    %18 = arith.addf %14, %17 : vector<8x1xf32>
    %19 = math.rsqrt %18 : vector<8x1xf32>
    %20 = vector.broadcast %19 : vector<8x1xf32> to vector<8x32xf32>
    %21 = arith.mulf %16, %20 : vector<8x32xf32>
    %22 = vector.broadcast %2 : vector<1x32xf32> to vector<8x32xf32>
    %23 = arith.mulf %21, %22 : vector<8x32xf32>
    %24 = vector.broadcast %3 : vector<1x32xf32> to vector<8x32xf32>
    %25 = arith.addf %23, %24 : vector<8x32xf32>
    %c0_10 = arith.constant 0 : index
    %c0_11 = arith.constant 0 : index
    %c0_12 = arith.constant 0 : index
    %26 = vector.load %arg4[%c0_10, %c0_11, %c0_12] : memref<1x8x32xf32, #tpu.memory_space<vmem>>, vector<1x8x32xf32>
    %27 = vector.shape_cast %26 : vector<1x8x32xf32> to vector<8x32xf32>
    %28 = vector.shape_cast %25 : vector<8x32xf32> to vector<1x8x32xf32>
    tpu.vector_store %arg4[%c0_10, %c0_11, %c0_12], %28 {strides = array<i32>} : memref<1x8x32xf32, #tpu.memory_space<vmem>>, vector<1x8x32xf32>,
    return
  }
  func.func @transform_0(%arg0: i32) -> (i32, i32, i32) {
    %c0_i32 = arith.constant 0 : i32
    %c0_i32_0 = arith.constant 0 : i32
    %c0_i32_1 = arith.constant 0 : i32
    return %arg0, %c0_i32, %c0_i32_0 : i32, i32, i32
  }
  func.func @transform_1(%arg0: i32) -> (i32, i32) {
    %c0_i32 = arith.constant 0 : i32
    %c0_i32_0 = arith.constant 0 : i32
    %c0_i32_1 = arith.constant 0 : i32
    return %c0_i32, %c0_i32_0 : i32, i32
  }
  func.func @transform_2(%arg0: i32) -> (i32, i32) {
    %c0_i32 = arith.constant 0 : i32
    %c0_i32_0 = arith.constant 0 : i32
    %c0_i32_1 = arith.constant 0 : i32
    return %c0_i32, %c0_i32_0 : i32, i32
  }
  func.func @transform_3(%arg0: i32) -> (i32, i32, i32) {
    %c0_i32 = arith.constant 0 : i32
    %c0_i32_0 = arith.constant 0 : i32
    %c0_i32_1 = arith.constant 0 : i32
    return %arg0, %c0_i32, %c0_i32_0 : i32, i32, i32
  }
}

module attributes {stable_mosaic.version = 11 : i64} {
  func.func @_logits_kernel(%arg0: i32, %arg1: memref<1x8x32xf32, #tpu.memory_space<vmem>>, %arg2: memref<32x128xf32, #tpu.memory_space<vmem>>, %arg3: memref<1x128xf32, #tpu.memory_space<vmem>>, %arg4: memref<1x8x128xf32, #tpu.memory_space<vmem>>) attributes {dimension_semantics = [#tpu.dimension_semantics<parallel>], iteration_bounds = array<i64: 2>, scalar_prefetch = 0 : i64, scratch_operands = 0 : i64, tpu.core_type = #tpu.core_type<tc>, window_params = [{transform_indices = @transform_0, window_bounds = array<i64: 1, 8, 32>}, {pipeline_mode = #tpu.pipeline_mode<synchronous>, transform_indices = @transform_1, window_bounds = array<i64: 32, 128>}, {pipeline_mode = #tpu.pipeline_mode<synchronous>, transform_indices = @transform_2, window_bounds = array<i64: 1, 128>}, {transform_indices = @transform_3, window_bounds = array<i64: 1, 8, 128>}]} {
    %c0 = arith.constant 0 : index
    %c0_0 = arith.constant 0 : index
    %c0_1 = arith.constant 0 : index
    %0 = vector.load %arg1[%c0, %c0_0, %c0_1] : memref<1x8x32xf32, #tpu.memory_space<vmem>>, vector<1x8x32xf32>
    %1 = vector.shape_cast %0 : vector<1x8x32xf32> to vector<8x32xf32>
    %c0_2 = arith.constant 0 : index
    %c0_3 = arith.constant 0 : index
    %2 = vector.load %arg2[%c0_2, %c0_3] : memref<32x128xf32, #tpu.memory_space<vmem>>, vector<32x128xf32>
    %cst = arith.constant dense<0.000000e+00> : vector<8x128xf32>
    %3 = tpu.matmul %1, %2, %cst {dimension_numbers = #tpu.dot_dimension_numbers<[1], [0], [0], [1], [0, 0, 1, 1], [], []>} : vector<8x32xf32>, vector<32x128xf32>, vector<8x128xf32> -> vector<8x128xf32>
    %c0_4 = arith.constant 0 : index
    %c0_5 = arith.constant 0 : index
    %4 = vector.load %arg3[%c0_4, %c0_5] : memref<1x128xf32, #tpu.memory_space<vmem>>, vector<1x128xf32>
    %5 = vector.broadcast %4 : vector<1x128xf32> to vector<8x128xf32>
    %6 = arith.addf %3, %5 : vector<8x128xf32>
    %c0_6 = arith.constant 0 : index
    %c0_7 = arith.constant 0 : index
    %c0_8 = arith.constant 0 : index
    %7 = vector.load %arg4[%c0_6, %c0_7, %c0_8] : memref<1x8x128xf32, #tpu.memory_space<vmem>>, vector<1x8x128xf32>
    %8 = vector.shape_cast %7 : vector<1x8x128xf32> to vector<8x128xf32>
    %9 = vector.shape_cast %6 : vector<8x128xf32> to vector<1x8x128xf32>
    tpu.vector_store %arg4[%c0_6, %c0_7, %c0_8], %9 {strides = array<i32>} : memref<1x8x128xf32, #tpu.memory_space<vmem>>, vector<1x8x128xf32>,
    return
  }
  func.func @transform_0(%arg0: i32) -> (i32, i32, i32) {
    %c0_i32 = arith.constant 0 : i32
    %c0_i32_0 = arith.constant 0 : i32
    %c0_i32_1 = arith.constant 0 : i32
    return %arg0, %c0_i32, %c0_i32_0 : i32, i32, i32
  }
  func.func @transform_1(%arg0: i32) -> (i32, i32) {
    %c0_i32 = arith.constant 0 : i32
    %c0_i32_0 = arith.constant 0 : i32
    %c0_i32_1 = arith.constant 0 : i32
    return %c0_i32, %c0_i32_0 : i32, i32
  }
  func.func @transform_2(%arg0: i32) -> (i32, i32) {
    %c0_i32 = arith.constant 0 : i32
    %c0_i32_0 = arith.constant 0 : i32
    %c0_i32_1 = arith.constant 0 : i32
    return %c0_i32, %c0_i32_0 : i32, i32
  }
  func.func @transform_3(%arg0: i32) -> (i32, i32, i32) {
    %c0_i32 = arith.constant 0 : i32
    %c0_i32_0 = arith.constant 0 : i32
    %c0_i32_1 = arith.constant 0 : i32
    return %arg0, %c0_i32, %c0_i32_0 : i32, i32, i32
  }
}

module attributes {stable_mosaic.version = 11 : i64} {
  func.func @_decoder_layer_kernel(%arg0: i32, %arg1: memref<1x8x32xf32, #tpu.memory_space<vmem>>, %arg2: memref<1x8x32xf32, #tpu.memory_space<vmem>>, %arg3: memref<32x96xf32, #tpu.memory_space<vmem>>, %arg4: memref<1x96xf32, #tpu.memory_space<vmem>>, %arg5: memref<32x32xf32, #tpu.memory_space<vmem>>, %arg6: memref<1x32xf32, #tpu.memory_space<vmem>>, %arg7: memref<1x32xf32, #tpu.memory_space<vmem>>, %arg8: memref<1x32xf32, #tpu.memory_space<vmem>>, %arg9: memref<32x32xf32, #tpu.memory_space<vmem>>, %arg10: memref<1x32xf32, #tpu.memory_space<vmem>>, %arg11: memref<32x64xf32, #tpu.memory_space<vmem>>, %arg12: memref<1x64xf32, #tpu.memory_space<vmem>>, %arg13: memref<32x32xf32, #tpu.memory_space<vmem>>, %arg14: memref<1x32xf32, #tpu.memory_space<vmem>>, %arg15: memref<1x32xf32, #tpu.memory_space<vmem>>, %arg16: memref<1x32xf32, #tpu.memory_space<vmem>>, %arg17: memref<32x64xf32, #tpu.memory_space<vmem>>, %arg18: memref<1x64xf32, #tpu.memory_space<vmem>>, %arg19: memref<64x32xf32, #tpu.memory_space<vmem>>, %arg20: memref<1x32xf32, #tpu.memory_space<vmem>>, %arg21: memref<1x32xf32, #tpu.memory_space<vmem>>, %arg22: memref<1x32xf32, #tpu.memory_space<vmem>>, %arg23: memref<1x8x32xf32, #tpu.memory_space<vmem>>) attributes {dimension_semantics = [#tpu.dimension_semantics<parallel>], iteration_bounds = array<i64: 2>, scalar_prefetch = 0 : i64, scratch_operands = 0 : i64, tpu.core_type = #tpu.core_type<tc>, window_params = [{transform_indices = @transform_0, window_bounds = array<i64: 1, 8, 32>}, {transform_indices = @transform_1, window_bounds = array<i64: 1, 8, 32>}, {pipeline_mode = #tpu.pipeline_mode<synchronous>, transform_indices = @transform_2, window_bounds = array<i64: 32, 96>}, {pipeline_mode = #tpu.pipeline_mode<synchronous>, transform_indices = @transform_3, window_bounds = array<i64: 1, 96>}, {pipeline_mode = #tpu.pipeline_mode<synchronous>, transform_indices = @transform_4, window_bounds = array<i64: 32, 32>}, {pipeline_mode = #tpu.pipeline_mode<synchronous>, transform_indices = @transform_5, window_bounds = array<i64: 1, 32>}, {pipeline_mode = #tpu.pipeline_mode<synchronous>, transform_indices = @transform_6, window_bounds = array<i64: 1, 32>}, {pipeline_mode = #tpu.pipeline_mode<synchronous>, transform_indices = @transform_7, window_bounds = array<i64: 1, 32>}, {pipeline_mode = #tpu.pipeline_mode<synchronous>, transform_indices = @transform_8, window_bounds = array<i64: 32, 32>}, {pipeline_mode = #tpu.pipeline_mode<synchronous>, transform_indices = @transform_9, window_bounds = array<i64: 1, 32>}, {pipeline_mode = #tpu.pipeline_mode<synchronous>, transform_indices = @transform_10, window_bounds = array<i64: 32, 64>}, {pipeline_mode = #tpu.pipeline_mode<synchronous>, transform_indices = @transform_11, window_bounds = array<i64: 1, 64>}, {pipeline_mode = #tpu.pipeline_mode<synchronous>, transform_indices = @transform_12, window_bounds = array<i64: 32, 32>}, {pipeline_mode = #tpu.pipeline_mode<synchronous>, transform_indices = @transform_13, window_bounds = array<i64: 1, 32>}, {pipeline_mode = #tpu.pipeline_mode<synchronous>, transform_indices = @transform_14, window_bounds = array<i64: 1, 32>}, {pipeline_mode = #tpu.pipeline_mode<synchronous>, transform_indices = @transform_15, window_bounds = array<i64: 1, 32>}, {pipeline_mode = #tpu.pipeline_mode<synchronous>, transform_indices = @transform_16, window_bounds = array<i64: 32, 64>}, {pipeline_mode = #tpu.pipeline_mode<synchronous>, transform_indices = @transform_17, window_bounds = array<i64: 1, 64>}, {pipeline_mode = #tpu.pipeline_mode<synchronous>, transform_indices = @transform_18, window_bounds = array<i64: 64, 32>}, {pipeline_mode = #tpu.pipeline_mode<synchronous>, transform_indices = @transform_19, window_bounds = array<i64: 1, 32>}, {pipeline_mode = #tpu.pipeline_mode<synchronous>, transform_indices = @transform_20, window_bounds = array<i64: 1, 32>}, {pipeline_mode = #tpu.pipeline_mode<synchronous>, transform_indices = @transform_21, window_bounds = array<i64: 1, 32>}, {transform_indices = @transform_22, window_bounds = array<i64: 1, 8, 32>}]} {
    %c0 = arith.constant 0 : index
    %c0_0 = arith.constant 0 : index
    %c0_1 = arith.constant 0 : index
    %0 = vector.load %arg1[%c0, %c0_0, %c0_1] : memref<1x8x32xf32, #tpu.memory_space<vmem>>, vector<1x8x32xf32>
    %1 = vector.shape_cast %0 : vector<1x8x32xf32> to vector<8x32xf32>
    %c0_2 = arith.constant 0 : index
    %c0_3 = arith.constant 0 : index
    %2 = vector.load %arg3[%c0_2, %c0_3] : memref<32x96xf32, #tpu.memory_space<vmem>>, vector<32x96xf32>
    %cst = arith.constant dense<0.000000e+00> : vector<8x96xf32>
    %3 = tpu.matmul %1, %2, %cst {dimension_numbers = #tpu.dot_dimension_numbers<[1], [0], [0], [1], [0, 0, 1, 1], [], []>} : vector<8x32xf32>, vector<32x96xf32>, vector<8x96xf32> -> vector<8x96xf32>
    %c0_4 = arith.constant 0 : index
    %c0_5 = arith.constant 0 : index
    %4 = vector.load %arg4[%c0_4, %c0_5] : memref<1x96xf32, #tpu.memory_space<vmem>>, vector<1x96xf32>
    %5 = vector.broadcast %4 : vector<1x96xf32> to vector<8x96xf32>
    %6 = arith.addf %3, %5 : vector<8x96xf32>
    %7 = vector.extract_strided_slice %6 {offsets = [0, 0], sizes = [8, 32], strides = [1, 1]} : vector<8x96xf32> to vector<8x32xf32>
    %8 = vector.extract_strided_slice %6 {offsets = [0, 32], sizes = [8, 32], strides = [1, 1]} : vector<8x96xf32> to vector<8x32xf32>
    %9 = vector.extract_strided_slice %6 {offsets = [0, 64], sizes = [8, 32], strides = [1, 1]} : vector<8x96xf32> to vector<8x32xf32>
    %10 = tpu.iota {dimensions = array<i32: 0>} : vector<8x8xi32>
    %11 = tpu.iota {dimensions = array<i32: 1>} : vector<8x8xi32>
    %12 = arith.cmpi sge, %10, %11 : vector<8x8xi32>
    %cst_6 = arith.constant 0.000000e+00 : f32
    %cst_7 = arith.constant -1.000000e+09 : f32
    %13 = vector.broadcast %cst_6 : f32 to vector<8x8xf32>
    %14 = vector.broadcast %cst_7 : f32 to vector<8x8xf32>
    %15 = arith.select %12, %13, %14 : vector<8x8xi1>, vector<8x8xf32>
    %16 = vector.extract_strided_slice %7 {offsets = [0, 0], sizes = [8, 8], strides = [1, 1]} : vector<8x32xf32> to vector<8x8xf32>
    %17 = vector.extract_strided_slice %8 {offsets = [0, 0], sizes = [8, 8], strides = [1, 1]} : vector<8x32xf32> to vector<8x8xf32>
    %18 = tpu.transpose %17, [1, 0] : vector<8x8xf32> -> vector<8x8xf32>
    %cst_8 = arith.constant dense<0.000000e+00> : vector<8x8xf32>
    %19 = tpu.matmul %16, %18, %cst_8 {dimension_numbers = #tpu.dot_dimension_numbers<[1], [0], [0], [1], [0, 0, 1, 1], [], []>} : vector<8x8xf32>, vector<8x8xf32>, vector<8x8xf32> -> vector<8x8xf32>
    %cst_9 = arith.constant 0.353553385 : f32
    %20 = vector.broadcast %cst_9 : f32 to vector<8x8xf32>
    %21 = arith.mulf %19, %20 : vector<8x8xf32>
    %22 = arith.addf %21, %15 : vector<8x8xf32>
    %cst_10 = arith.constant dense<0xFF800000> : vector<8xf32>
    %23 = vector.multi_reduction <maximumf>, %22, %cst_10 [1] : vector<8x8xf32> to vector<8xf32>
    %24 = vector.shape_cast %23 : vector<8xf32> to vector<8x1xf32>
    %25 = vector.broadcast %24 : vector<8x1xf32> to vector<8x8xf32>
    %26 = arith.subf %22, %25 : vector<8x8xf32>
    %27 = math.exp %26 : vector<8x8xf32>
    %cst_11 = arith.constant dense<0.000000e+00> : vector<8xf32>
    %28 = vector.multi_reduction <add>, %27, %cst_11 [1] : vector<8x8xf32> to vector<8xf32>
    %29 = vector.shape_cast %28 : vector<8xf32> to vector<8x1xf32>
    %30 = tpu.reciprocal %29 {approx = true} : vector<8x1xf32> -> vector<8x1xf32>
    %31 = vector.broadcast %30 : vector<8x1xf32> to vector<8x8xf32>
    %32 = arith.mulf %27, %31 : vector<8x8xf32>
    %33 = vector.extract_strided_slice %9 {offsets = [0, 0], sizes = [8, 8], strides = [1, 1]} : vector<8x32xf32> to vector<8x8xf32>
    %cst_12 = arith.constant dense<0.000000e+00> : vector<8x8xf32>
    %34 = tpu.matmul %32, %33, %cst_12 {dimension_numbers = #tpu.dot_dimension_numbers<[1], [0], [0], [1], [0, 0, 1, 1], [], []>} : vector<8x8xf32>, vector<8x8xf32>, vector<8x8xf32> -> vector<8x8xf32>
    %35 = vector.extract_strided_slice %7 {offsets = [0, 8], sizes = [8, 8], strides = [1, 1]} : vector<8x32xf32> to vector<8x8xf32>
    %36 = vector.extract_strided_slice %8 {offsets = [0, 8], sizes = [8, 8], strides = [1, 1]} : vector<8x32xf32> to vector<8x8xf32>
    %37 = tpu.transpose %36, [1, 0] : vector<8x8xf32> -> vector<8x8xf32>
    %cst_13 = arith.constant dense<0.000000e+00> : vector<8x8xf32>
    %38 = tpu.matmul %35, %37, %cst_13 {dimension_numbers = #tpu.dot_dimension_numbers<[1], [0], [0], [1], [0, 0, 1, 1], [], []>} : vector<8x8xf32>, vector<8x8xf32>, vector<8x8xf32> -> vector<8x8xf32>
    %cst_14 = arith.constant 0.353553385 : f32
    %39 = vector.broadcast %cst_14 : f32 to vector<8x8xf32>
    %40 = arith.mulf %38, %39 : vector<8x8xf32>
    %41 = arith.addf %40, %15 : vector<8x8xf32>
    %cst_15 = arith.constant dense<0xFF800000> : vector<8xf32>
    %42 = vector.multi_reduction <maximumf>, %41, %cst_15 [1] : vector<8x8xf32> to vector<8xf32>
    %43 = vector.shape_cast %42 : vector<8xf32> to vector<8x1xf32>
    %44 = vector.broadcast %43 : vector<8x1xf32> to vector<8x8xf32>
    %45 = arith.subf %41, %44 : vector<8x8xf32>
    %46 = math.exp %45 : vector<8x8xf32>
    %cst_16 = arith.constant dense<0.000000e+00> : vector<8xf32>
    %47 = vector.multi_reduction <add>, %46, %cst_16 [1] : vector<8x8xf32> to vector<8xf32>
    %48 = vector.shape_cast %47 : vector<8xf32> to vector<8x1xf32>
    %49 = tpu.reciprocal %48 {approx = true} : vector<8x1xf32> -> vector<8x1xf32>
    %50 = vector.broadcast %49 : vector<8x1xf32> to vector<8x8xf32>
    %51 = arith.mulf %46, %50 : vector<8x8xf32>
    %52 = vector.extract_strided_slice %9 {offsets = [0, 8], sizes = [8, 8], strides = [1, 1]} : vector<8x32xf32> to vector<8x8xf32>
    %cst_17 = arith.constant dense<0.000000e+00> : vector<8x8xf32>
    %53 = tpu.matmul %51, %52, %cst_17 {dimension_numbers = #tpu.dot_dimension_numbers<[1], [0], [0], [1], [0, 0, 1, 1], [], []>} : vector<8x8xf32>, vector<8x8xf32>, vector<8x8xf32> -> vector<8x8xf32>
    %54 = vector.extract_strided_slice %7 {offsets = [0, 16], sizes = [8, 8], strides = [1, 1]} : vector<8x32xf32> to vector<8x8xf32>
    %55 = vector.extract_strided_slice %8 {offsets = [0, 16], sizes = [8, 8], strides = [1, 1]} : vector<8x32xf32> to vector<8x8xf32>
    %56 = tpu.transpose %55, [1, 0] : vector<8x8xf32> -> vector<8x8xf32>
    %cst_18 = arith.constant dense<0.000000e+00> : vector<8x8xf32>
    %57 = tpu.matmul %54, %56, %cst_18 {dimension_numbers = #tpu.dot_dimension_numbers<[1], [0], [0], [1], [0, 0, 1, 1], [], []>} : vector<8x8xf32>, vector<8x8xf32>, vector<8x8xf32> -> vector<8x8xf32>
    %cst_19 = arith.constant 0.353553385 : f32
    %58 = vector.broadcast %cst_19 : f32 to vector<8x8xf32>
    %59 = arith.mulf %57, %58 : vector<8x8xf32>
    %60 = arith.addf %59, %15 : vector<8x8xf32>
    %cst_20 = arith.constant dense<0xFF800000> : vector<8xf32>
    %61 = vector.multi_reduction <maximumf>, %60, %cst_20 [1] : vector<8x8xf32> to vector<8xf32>
    %62 = vector.shape_cast %61 : vector<8xf32> to vector<8x1xf32>
    %63 = vector.broadcast %62 : vector<8x1xf32> to vector<8x8xf32>
    %64 = arith.subf %60, %63 : vector<8x8xf32>
    %65 = math.exp %64 : vector<8x8xf32>
    %cst_21 = arith.constant dense<0.000000e+00> : vector<8xf32>
    %66 = vector.multi_reduction <add>, %65, %cst_21 [1] : vector<8x8xf32> to vector<8xf32>
    %67 = vector.shape_cast %66 : vector<8xf32> to vector<8x1xf32>
    %68 = tpu.reciprocal %67 {approx = true} : vector<8x1xf32> -> vector<8x1xf32>
    %69 = vector.broadcast %68 : vector<8x1xf32> to vector<8x8xf32>
    %70 = arith.mulf %65, %69 : vector<8x8xf32>
    %71 = vector.extract_strided_slice %9 {offsets = [0, 16], sizes = [8, 8], strides = [1, 1]} : vector<8x32xf32> to vector<8x8xf32>
    %cst_22 = arith.constant dense<0.000000e+00> : vector<8x8xf32>
    %72 = tpu.matmul %70, %71, %cst_22 {dimension_numbers = #tpu.dot_dimension_numbers<[1], [0], [0], [1], [0, 0, 1, 1], [], []>} : vector<8x8xf32>, vector<8x8xf32>, vector<8x8xf32> -> vector<8x8xf32>
    %73 = vector.extract_strided_slice %7 {offsets = [0, 24], sizes = [8, 8], strides = [1, 1]} : vector<8x32xf32> to vector<8x8xf32>
    %74 = vector.extract_strided_slice %8 {offsets = [0, 24], sizes = [8, 8], strides = [1, 1]} : vector<8x32xf32> to vector<8x8xf32>
    %75 = tpu.transpose %74, [1, 0] : vector<8x8xf32> -> vector<8x8xf32>
    %cst_23 = arith.constant dense<0.000000e+00> : vector<8x8xf32>
    %76 = tpu.matmul %73, %75, %cst_23 {dimension_numbers = #tpu.dot_dimension_numbers<[1], [0], [0], [1], [0, 0, 1, 1], [], []>} : vector<8x8xf32>, vector<8x8xf32>, vector<8x8xf32> -> vector<8x8xf32>
    %cst_24 = arith.constant 0.353553385 : f32
    %77 = vector.broadcast %cst_24 : f32 to vector<8x8xf32>
    %78 = arith.mulf %76, %77 : vector<8x8xf32>
    %79 = arith.addf %78, %15 : vector<8x8xf32>
    %cst_25 = arith.constant dense<0xFF800000> : vector<8xf32>
    %80 = vector.multi_reduction <maximumf>, %79, %cst_25 [1] : vector<8x8xf32> to vector<8xf32>
    %81 = vector.shape_cast %80 : vector<8xf32> to vector<8x1xf32>
    %82 = vector.broadcast %81 : vector<8x1xf32> to vector<8x8xf32>
    %83 = arith.subf %79, %82 : vector<8x8xf32>
    %84 = math.exp %83 : vector<8x8xf32>
    %cst_26 = arith.constant dense<0.000000e+00> : vector<8xf32>
    %85 = vector.multi_reduction <add>, %84, %cst_26 [1] : vector<8x8xf32> to vector<8xf32>
    %86 = vector.shape_cast %85 : vector<8xf32> to vector<8x1xf32>
    %87 = tpu.reciprocal %86 {approx = true} : vector<8x1xf32> -> vector<8x1xf32>
    %88 = vector.broadcast %87 : vector<8x1xf32> to vector<8x8xf32>
    %89 = arith.mulf %84, %88 : vector<8x8xf32>
    %90 = vector.extract_strided_slice %9 {offsets = [0, 24], sizes = [8, 8], strides = [1, 1]} : vector<8x32xf32> to vector<8x8xf32>
    %cst_27 = arith.constant dense<0.000000e+00> : vector<8x8xf32>
    %91 = tpu.matmul %89, %90, %cst_27 {dimension_numbers = #tpu.dot_dimension_numbers<[1], [0], [0], [1], [0, 0, 1, 1], [], []>} : vector<8x8xf32>, vector<8x8xf32>, vector<8x8xf32> -> vector<8x8xf32>
    %92 = tpu.concatenate %34, %53, %72, %91 in 1 : vector<8x8xf32>, vector<8x8xf32>, vector<8x8xf32>, vector<8x8xf32> -> vector<8x32xf32>
    %c0_28 = arith.constant 0 : index
    %c0_29 = arith.constant 0 : index
    %93 = vector.load %arg5[%c0_28, %c0_29] : memref<32x32xf32, #tpu.memory_space<vmem>>, vector<32x32xf32>
    %cst_30 = arith.constant dense<0.000000e+00> : vector<8x32xf32>
    %94 = tpu.matmul %92, %93, %cst_30 {dimension_numbers = #tpu.dot_dimension_numbers<[1], [0], [0], [1], [0, 0, 1, 1], [], []>} : vector<8x32xf32>, vector<32x32xf32>, vector<8x32xf32> -> vector<8x32xf32>
    %c0_31 = arith.constant 0 : index
    %c0_32 = arith.constant 0 : index
    %95 = vector.load %arg6[%c0_31, %c0_32] : memref<1x32xf32, #tpu.memory_space<vmem>>, vector<1x32xf32>
    %96 = vector.broadcast %95 : vector<1x32xf32> to vector<8x32xf32>
    %97 = arith.addf %94, %96 : vector<8x32xf32>
    %98 = arith.addf %97, %1 : vector<8x32xf32>
    %c0_33 = arith.constant 0 : index
    %c0_34 = arith.constant 0 : index
    %99 = vector.load %arg7[%c0_33, %c0_34] : memref<1x32xf32, #tpu.memory_space<vmem>>, vector<1x32xf32>
    %c0_35 = arith.constant 0 : index
    %c0_36 = arith.constant 0 : index
    %100 = vector.load %arg8[%c0_35, %c0_36] : memref<1x32xf32, #tpu.memory_space<vmem>>, vector<1x32xf32>
    %cst_37 = arith.constant dense<0.000000e+00> : vector<8xf32>
    %101 = vector.multi_reduction <add>, %98, %cst_37 [1] : vector<8x32xf32> to vector<8xf32>
    %102 = vector.shape_cast %101 : vector<8xf32> to vector<8x1xf32>
    %cst_38 = arith.constant 3.200000e+01 : f32
    %103 = vector.broadcast %cst_38 : f32 to vector<8x1xf32>
    %104 = arith.divf %102, %103 : vector<8x1xf32>
    %105 = vector.broadcast %104 : vector<8x1xf32> to vector<8x32xf32>
    %106 = arith.subf %98, %105 : vector<8x32xf32>
    %107 = arith.mulf %106, %106 : vector<8x32xf32>
    %cst_39 = arith.constant dense<0.000000e+00> : vector<8xf32>
    %108 = vector.multi_reduction <add>, %107, %cst_39 [1] : vector<8x32xf32> to vector<8xf32>
    %109 = vector.shape_cast %108 : vector<8xf32> to vector<8x1xf32>
    %cst_40 = arith.constant 3.200000e+01 : f32
    %110 = vector.broadcast %cst_40 : f32 to vector<8x1xf32>
    %111 = arith.divf %109, %110 : vector<8x1xf32>
    %112 = vector.broadcast %104 : vector<8x1xf32> to vector<8x32xf32>
    %113 = arith.subf %98, %112 : vector<8x32xf32>
    %cst_41 = arith.constant 9.99999996E-13 : f32
    %114 = vector.broadcast %cst_41 : f32 to vector<8x1xf32>
    %115 = arith.addf %111, %114 : vector<8x1xf32>
    %116 = math.rsqrt %115 : vector<8x1xf32>
    %117 = vector.broadcast %116 : vector<8x1xf32> to vector<8x32xf32>
    %118 = arith.mulf %113, %117 : vector<8x32xf32>
    %119 = vector.broadcast %99 : vector<1x32xf32> to vector<8x32xf32>
    %120 = arith.mulf %118, %119 : vector<8x32xf32>
    %121 = vector.broadcast %100 : vector<1x32xf32> to vector<8x32xf32>
    %122 = arith.addf %120, %121 : vector<8x32xf32>
    %c0_42 = arith.constant 0 : index
    %c0_43 = arith.constant 0 : index
    %c0_44 = arith.constant 0 : index
    %123 = vector.load %arg2[%c0_42, %c0_43, %c0_44] : memref<1x8x32xf32, #tpu.memory_space<vmem>>, vector<1x8x32xf32>
    %124 = vector.shape_cast %123 : vector<1x8x32xf32> to vector<8x32xf32>
    %c0_45 = arith.constant 0 : index
    %c0_46 = arith.constant 0 : index
    %125 = vector.load %arg9[%c0_45, %c0_46] : memref<32x32xf32, #tpu.memory_space<vmem>>, vector<32x32xf32>
    %cst_47 = arith.constant dense<0.000000e+00> : vector<8x32xf32>
    %126 = tpu.matmul %122, %125, %cst_47 {dimension_numbers = #tpu.dot_dimension_numbers<[1], [0], [0], [1], [0, 0, 1, 1], [], []>} : vector<8x32xf32>, vector<32x32xf32>, vector<8x32xf32> -> vector<8x32xf32>
    %c0_48 = arith.constant 0 : index
    %c0_49 = arith.constant 0 : index
    %127 = vector.load %arg10[%c0_48, %c0_49] : memref<1x32xf32, #tpu.memory_space<vmem>>, vector<1x32xf32>
    %128 = vector.broadcast %127 : vector<1x32xf32> to vector<8x32xf32>
    %129 = arith.addf %126, %128 : vector<8x32xf32>
    %c0_50 = arith.constant 0 : index
    %c0_51 = arith.constant 0 : index
    %130 = vector.load %arg11[%c0_50, %c0_51] : memref<32x64xf32, #tpu.memory_space<vmem>>, vector<32x64xf32>
    %cst_52 = arith.constant dense<0.000000e+00> : vector<8x64xf32>
    %131 = tpu.matmul %124, %130, %cst_52 {dimension_numbers = #tpu.dot_dimension_numbers<[1], [0], [0], [1], [0, 0, 1, 1], [], []>} : vector<8x32xf32>, vector<32x64xf32>, vector<8x64xf32> -> vector<8x64xf32>
    %c0_53 = arith.constant 0 : index
    %c0_54 = arith.constant 0 : index
    %132 = vector.load %arg12[%c0_53, %c0_54] : memref<1x64xf32, #tpu.memory_space<vmem>>, vector<1x64xf32>
    %133 = vector.broadcast %132 : vector<1x64xf32> to vector<8x64xf32>
    %134 = arith.addf %131, %133 : vector<8x64xf32>
    %135 = vector.extract_strided_slice %134 {offsets = [0, 0], sizes = [8, 32], strides = [1, 1]} : vector<8x64xf32> to vector<8x32xf32>
    %136 = vector.extract_strided_slice %134 {offsets = [0, 32], sizes = [8, 32], strides = [1, 1]} : vector<8x64xf32> to vector<8x32xf32>
    %137 = vector.extract_strided_slice %129 {offsets = [0, 0], sizes = [8, 8], strides = [1, 1]} : vector<8x32xf32> to vector<8x8xf32>
    %138 = vector.extract_strided_slice %135 {offsets = [0, 0], sizes = [8, 8], strides = [1, 1]} : vector<8x32xf32> to vector<8x8xf32>
    %139 = tpu.transpose %138, [1, 0] : vector<8x8xf32> -> vector<8x8xf32>
    %cst_55 = arith.constant dense<0.000000e+00> : vector<8x8xf32>
    %140 = tpu.matmul %137, %139, %cst_55 {dimension_numbers = #tpu.dot_dimension_numbers<[1], [0], [0], [1], [0, 0, 1, 1], [], []>} : vector<8x8xf32>, vector<8x8xf32>, vector<8x8xf32> -> vector<8x8xf32>
    %cst_56 = arith.constant 0.353553385 : f32
    %141 = vector.broadcast %cst_56 : f32 to vector<8x8xf32>
    %142 = arith.mulf %140, %141 : vector<8x8xf32>
    %cst_57 = arith.constant dense<0xFF800000> : vector<8xf32>
    %143 = vector.multi_reduction <maximumf>, %142, %cst_57 [1] : vector<8x8xf32> to vector<8xf32>
    %144 = vector.shape_cast %143 : vector<8xf32> to vector<8x1xf32>
    %145 = vector.broadcast %144 : vector<8x1xf32> to vector<8x8xf32>
    %146 = arith.subf %142, %145 : vector<8x8xf32>
    %147 = math.exp %146 : vector<8x8xf32>
    %cst_58 = arith.constant dense<0.000000e+00> : vector<8xf32>
    %148 = vector.multi_reduction <add>, %147, %cst_58 [1] : vector<8x8xf32> to vector<8xf32>
    %149 = vector.shape_cast %148 : vector<8xf32> to vector<8x1xf32>
    %150 = tpu.reciprocal %149 {approx = true} : vector<8x1xf32> -> vector<8x1xf32>
    %151 = vector.broadcast %150 : vector<8x1xf32> to vector<8x8xf32>
    %152 = arith.mulf %147, %151 : vector<8x8xf32>
    %153 = vector.extract_strided_slice %136 {offsets = [0, 0], sizes = [8, 8], strides = [1, 1]} : vector<8x32xf32> to vector<8x8xf32>
    %cst_59 = arith.constant dense<0.000000e+00> : vector<8x8xf32>
    %154 = tpu.matmul %152, %153, %cst_59 {dimension_numbers = #tpu.dot_dimension_numbers<[1], [0], [0], [1], [0, 0, 1, 1], [], []>} : vector<8x8xf32>, vector<8x8xf32>, vector<8x8xf32> -> vector<8x8xf32>
    %155 = vector.extract_strided_slice %129 {offsets = [0, 8], sizes = [8, 8], strides = [1, 1]} : vector<8x32xf32> to vector<8x8xf32>
    %156 = vector.extract_strided_slice %135 {offsets = [0, 8], sizes = [8, 8], strides = [1, 1]} : vector<8x32xf32> to vector<8x8xf32>
    %157 = tpu.transpose %156, [1, 0] : vector<8x8xf32> -> vector<8x8xf32>
    %cst_60 = arith.constant dense<0.000000e+00> : vector<8x8xf32>
    %158 = tpu.matmul %155, %157, %cst_60 {dimension_numbers = #tpu.dot_dimension_numbers<[1], [0], [0], [1], [0, 0, 1, 1], [], []>} : vector<8x8xf32>, vector<8x8xf32>, vector<8x8xf32> -> vector<8x8xf32>
    %cst_61 = arith.constant 0.353553385 : f32
    %159 = vector.broadcast %cst_61 : f32 to vector<8x8xf32>
    %160 = arith.mulf %158, %159 : vector<8x8xf32>
    %cst_62 = arith.constant dense<0xFF800000> : vector<8xf32>
    %161 = vector.multi_reduction <maximumf>, %160, %cst_62 [1] : vector<8x8xf32> to vector<8xf32>
    %162 = vector.shape_cast %161 : vector<8xf32> to vector<8x1xf32>
    %163 = vector.broadcast %162 : vector<8x1xf32> to vector<8x8xf32>
    %164 = arith.subf %160, %163 : vector<8x8xf32>
    %165 = math.exp %164 : vector<8x8xf32>
    %cst_63 = arith.constant dense<0.000000e+00> : vector<8xf32>
    %166 = vector.multi_reduction <add>, %165, %cst_63 [1] : vector<8x8xf32> to vector<8xf32>
    %167 = vector.shape_cast %166 : vector<8xf32> to vector<8x1xf32>
    %168 = tpu.reciprocal %167 {approx = true} : vector<8x1xf32> -> vector<8x1xf32>
    %169 = vector.broadcast %168 : vector<8x1xf32> to vector<8x8xf32>
    %170 = arith.mulf %165, %169 : vector<8x8xf32>
    %171 = vector.extract_strided_slice %136 {offsets = [0, 8], sizes = [8, 8], strides = [1, 1]} : vector<8x32xf32> to vector<8x8xf32>
    %cst_64 = arith.constant dense<0.000000e+00> : vector<8x8xf32>
    %172 = tpu.matmul %170, %171, %cst_64 {dimension_numbers = #tpu.dot_dimension_numbers<[1], [0], [0], [1], [0, 0, 1, 1], [], []>} : vector<8x8xf32>, vector<8x8xf32>, vector<8x8xf32> -> vector<8x8xf32>
    %173 = vector.extract_strided_slice %129 {offsets = [0, 16], sizes = [8, 8], strides = [1, 1]} : vector<8x32xf32> to vector<8x8xf32>
    %174 = vector.extract_strided_slice %135 {offsets = [0, 16], sizes = [8, 8], strides = [1, 1]} : vector<8x32xf32> to vector<8x8xf32>
    %175 = tpu.transpose %174, [1, 0] : vector<8x8xf32> -> vector<8x8xf32>
    %cst_65 = arith.constant dense<0.000000e+00> : vector<8x8xf32>
    %176 = tpu.matmul %173, %175, %cst_65 {dimension_numbers = #tpu.dot_dimension_numbers<[1], [0], [0], [1], [0, 0, 1, 1], [], []>} : vector<8x8xf32>, vector<8x8xf32>, vector<8x8xf32> -> vector<8x8xf32>
    %cst_66 = arith.constant 0.353553385 : f32
    %177 = vector.broadcast %cst_66 : f32 to vector<8x8xf32>
    %178 = arith.mulf %176, %177 : vector<8x8xf32>
    %cst_67 = arith.constant dense<0xFF800000> : vector<8xf32>
    %179 = vector.multi_reduction <maximumf>, %178, %cst_67 [1] : vector<8x8xf32> to vector<8xf32>
    %180 = vector.shape_cast %179 : vector<8xf32> to vector<8x1xf32>
    %181 = vector.broadcast %180 : vector<8x1xf32> to vector<8x8xf32>
    %182 = arith.subf %178, %181 : vector<8x8xf32>
    %183 = math.exp %182 : vector<8x8xf32>
    %cst_68 = arith.constant dense<0.000000e+00> : vector<8xf32>
    %184 = vector.multi_reduction <add>, %183, %cst_68 [1] : vector<8x8xf32> to vector<8xf32>
    %185 = vector.shape_cast %184 : vector<8xf32> to vector<8x1xf32>
    %186 = tpu.reciprocal %185 {approx = true} : vector<8x1xf32> -> vector<8x1xf32>
    %187 = vector.broadcast %186 : vector<8x1xf32> to vector<8x8xf32>
    %188 = arith.mulf %183, %187 : vector<8x8xf32>
    %189 = vector.extract_strided_slice %136 {offsets = [0, 16], sizes = [8, 8], strides = [1, 1]} : vector<8x32xf32> to vector<8x8xf32>
    %cst_69 = arith.constant dense<0.000000e+00> : vector<8x8xf32>
    %190 = tpu.matmul %188, %189, %cst_69 {dimension_numbers = #tpu.dot_dimension_numbers<[1], [0], [0], [1], [0, 0, 1, 1], [], []>} : vector<8x8xf32>, vector<8x8xf32>, vector<8x8xf32> -> vector<8x8xf32>
    %191 = vector.extract_strided_slice %129 {offsets = [0, 24], sizes = [8, 8], strides = [1, 1]} : vector<8x32xf32> to vector<8x8xf32>
    %192 = vector.extract_strided_slice %135 {offsets = [0, 24], sizes = [8, 8], strides = [1, 1]} : vector<8x32xf32> to vector<8x8xf32>
    %193 = tpu.transpose %192, [1, 0] : vector<8x8xf32> -> vector<8x8xf32>
    %cst_70 = arith.constant dense<0.000000e+00> : vector<8x8xf32>
    %194 = tpu.matmul %191, %193, %cst_70 {dimension_numbers = #tpu.dot_dimension_numbers<[1], [0], [0], [1], [0, 0, 1, 1], [], []>} : vector<8x8xf32>, vector<8x8xf32>, vector<8x8xf32> -> vector<8x8xf32>
    %cst_71 = arith.constant 0.353553385 : f32
    %195 = vector.broadcast %cst_71 : f32 to vector<8x8xf32>
    %196 = arith.mulf %194, %195 : vector<8x8xf32>
    %cst_72 = arith.constant dense<0xFF800000> : vector<8xf32>
    %197 = vector.multi_reduction <maximumf>, %196, %cst_72 [1] : vector<8x8xf32> to vector<8xf32>
    %198 = vector.shape_cast %197 : vector<8xf32> to vector<8x1xf32>
    %199 = vector.broadcast %198 : vector<8x1xf32> to vector<8x8xf32>
    %200 = arith.subf %196, %199 : vector<8x8xf32>
    %201 = math.exp %200 : vector<8x8xf32>
    %cst_73 = arith.constant dense<0.000000e+00> : vector<8xf32>
    %202 = vector.multi_reduction <add>, %201, %cst_73 [1] : vector<8x8xf32> to vector<8xf32>
    %203 = vector.shape_cast %202 : vector<8xf32> to vector<8x1xf32>
    %204 = tpu.reciprocal %203 {approx = true} : vector<8x1xf32> -> vector<8x1xf32>
    %205 = vector.broadcast %204 : vector<8x1xf32> to vector<8x8xf32>
    %206 = arith.mulf %201, %205 : vector<8x8xf32>
    %207 = vector.extract_strided_slice %136 {offsets = [0, 24], sizes = [8, 8], strides = [1, 1]} : vector<8x32xf32> to vector<8x8xf32>
    %cst_74 = arith.constant dense<0.000000e+00> : vector<8x8xf32>
    %208 = tpu.matmul %206, %207, %cst_74 {dimension_numbers = #tpu.dot_dimension_numbers<[1], [0], [0], [1], [0, 0, 1, 1], [], []>} : vector<8x8xf32>, vector<8x8xf32>, vector<8x8xf32> -> vector<8x8xf32>
    %209 = tpu.concatenate %154, %172, %190, %208 in 1 : vector<8x8xf32>, vector<8x8xf32>, vector<8x8xf32>, vector<8x8xf32> -> vector<8x32xf32>
    %c0_75 = arith.constant 0 : index
    %c0_76 = arith.constant 0 : index
    %210 = vector.load %arg13[%c0_75, %c0_76] : memref<32x32xf32, #tpu.memory_space<vmem>>, vector<32x32xf32>
    %cst_77 = arith.constant dense<0.000000e+00> : vector<8x32xf32>
    %211 = tpu.matmul %209, %210, %cst_77 {dimension_numbers = #tpu.dot_dimension_numbers<[1], [0], [0], [1], [0, 0, 1, 1], [], []>} : vector<8x32xf32>, vector<32x32xf32>, vector<8x32xf32> -> vector<8x32xf32>
    %c0_78 = arith.constant 0 : index
    %c0_79 = arith.constant 0 : index
    %212 = vector.load %arg14[%c0_78, %c0_79] : memref<1x32xf32, #tpu.memory_space<vmem>>, vector<1x32xf32>
    %213 = vector.broadcast %212 : vector<1x32xf32> to vector<8x32xf32>
    %214 = arith.addf %211, %213 : vector<8x32xf32>
    %215 = arith.addf %214, %122 : vector<8x32xf32>
    %c0_80 = arith.constant 0 : index
    %c0_81 = arith.constant 0 : index
    %216 = vector.load %arg15[%c0_80, %c0_81] : memref<1x32xf32, #tpu.memory_space<vmem>>, vector<1x32xf32>
    %c0_82 = arith.constant 0 : index
    %c0_83 = arith.constant 0 : index
    %217 = vector.load %arg16[%c0_82, %c0_83] : memref<1x32xf32, #tpu.memory_space<vmem>>, vector<1x32xf32>
    %cst_84 = arith.constant dense<0.000000e+00> : vector<8xf32>
    %218 = vector.multi_reduction <add>, %215, %cst_84 [1] : vector<8x32xf32> to vector<8xf32>
    %219 = vector.shape_cast %218 : vector<8xf32> to vector<8x1xf32>
    %cst_85 = arith.constant 3.200000e+01 : f32
    %220 = vector.broadcast %cst_85 : f32 to vector<8x1xf32>
    %221 = arith.divf %219, %220 : vector<8x1xf32>
    %222 = vector.broadcast %221 : vector<8x1xf32> to vector<8x32xf32>
    %223 = arith.subf %215, %222 : vector<8x32xf32>
    %224 = arith.mulf %223, %223 : vector<8x32xf32>
    %cst_86 = arith.constant dense<0.000000e+00> : vector<8xf32>
    %225 = vector.multi_reduction <add>, %224, %cst_86 [1] : vector<8x32xf32> to vector<8xf32>
    %226 = vector.shape_cast %225 : vector<8xf32> to vector<8x1xf32>
    %cst_87 = arith.constant 3.200000e+01 : f32
    %227 = vector.broadcast %cst_87 : f32 to vector<8x1xf32>
    %228 = arith.divf %226, %227 : vector<8x1xf32>
    %229 = vector.broadcast %221 : vector<8x1xf32> to vector<8x32xf32>
    %230 = arith.subf %215, %229 : vector<8x32xf32>
    %cst_88 = arith.constant 9.99999996E-13 : f32
    %231 = vector.broadcast %cst_88 : f32 to vector<8x1xf32>
    %232 = arith.addf %228, %231 : vector<8x1xf32>
    %233 = math.rsqrt %232 : vector<8x1xf32>
    %234 = vector.broadcast %233 : vector<8x1xf32> to vector<8x32xf32>
    %235 = arith.mulf %230, %234 : vector<8x32xf32>
    %236 = vector.broadcast %216 : vector<1x32xf32> to vector<8x32xf32>
    %237 = arith.mulf %235, %236 : vector<8x32xf32>
    %238 = vector.broadcast %217 : vector<1x32xf32> to vector<8x32xf32>
    %239 = arith.addf %237, %238 : vector<8x32xf32>
    %c0_89 = arith.constant 0 : index
    %c0_90 = arith.constant 0 : index
    %240 = vector.load %arg17[%c0_89, %c0_90] : memref<32x64xf32, #tpu.memory_space<vmem>>, vector<32x64xf32>
    %cst_91 = arith.constant dense<0.000000e+00> : vector<8x64xf32>
    %241 = tpu.matmul %239, %240, %cst_91 {dimension_numbers = #tpu.dot_dimension_numbers<[1], [0], [0], [1], [0, 0, 1, 1], [], []>} : vector<8x32xf32>, vector<32x64xf32>, vector<8x64xf32> -> vector<8x64xf32>
    %c0_92 = arith.constant 0 : index
    %c0_93 = arith.constant 0 : index
    %242 = vector.load %arg18[%c0_92, %c0_93] : memref<1x64xf32, #tpu.memory_space<vmem>>, vector<1x64xf32>
    %243 = vector.broadcast %242 : vector<1x64xf32> to vector<8x64xf32>
    %244 = arith.addf %241, %243 : vector<8x64xf32>
    %245 = arith.mulf %244, %244 : vector<8x64xf32>
    %246 = arith.mulf %244, %245 : vector<8x64xf32>
    %cst_94 = arith.constant 4.471500e-02 : f32
    %247 = vector.broadcast %cst_94 : f32 to vector<8x64xf32>
    %248 = arith.mulf %247, %246 : vector<8x64xf32>
    %249 = arith.addf %244, %248 : vector<8x64xf32>
    %cst_95 = arith.constant 0.797884583 : f32
    %250 = vector.broadcast %cst_95 : f32 to vector<8x64xf32>
    %251 = arith.mulf %250, %249 : vector<8x64xf32>
    %252 = math.tanh %251 : vector<8x64xf32>
    %cst_96 = arith.constant 1.000000e+00 : f32
    %253 = vector.broadcast %cst_96 : f32 to vector<8x64xf32>
    %254 = arith.addf %253, %252 : vector<8x64xf32>
    %cst_97 = arith.constant 5.000000e-01 : f32
    %255 = vector.broadcast %cst_97 : f32 to vector<8x64xf32>
    %256 = arith.mulf %255, %254 : vector<8x64xf32>
    %257 = arith.mulf %244, %256 : vector<8x64xf32>
    %c0_98 = arith.constant 0 : index
    %c0_99 = arith.constant 0 : index
    %258 = vector.load %arg19[%c0_98, %c0_99] : memref<64x32xf32, #tpu.memory_space<vmem>>, vector<64x32xf32>
    %cst_100 = arith.constant dense<0.000000e+00> : vector<8x32xf32>
    %259 = tpu.matmul %257, %258, %cst_100 {dimension_numbers = #tpu.dot_dimension_numbers<[1], [0], [0], [1], [0, 0, 1, 1], [], []>} : vector<8x64xf32>, vector<64x32xf32>, vector<8x32xf32> -> vector<8x32xf32>
    %c0_101 = arith.constant 0 : index
    %c0_102 = arith.constant 0 : index
    %260 = vector.load %arg20[%c0_101, %c0_102] : memref<1x32xf32, #tpu.memory_space<vmem>>, vector<1x32xf32>
    %261 = vector.broadcast %260 : vector<1x32xf32> to vector<8x32xf32>
    %262 = arith.addf %259, %261 : vector<8x32xf32>
    %263 = arith.addf %262, %239 : vector<8x32xf32>
    %c0_103 = arith.constant 0 : index
    %c0_104 = arith.constant 0 : index
    %264 = vector.load %arg21[%c0_103, %c0_104] : memref<1x32xf32, #tpu.memory_space<vmem>>, vector<1x32xf32>
    %c0_105 = arith.constant 0 : index
    %c0_106 = arith.constant 0 : index
    %265 = vector.load %arg22[%c0_105, %c0_106] : memref<1x32xf32, #tpu.memory_space<vmem>>, vector<1x32xf32>
    %cst_107 = arith.constant dense<0.000000e+00> : vector<8xf32>
    %266 = vector.multi_reduction <add>, %263, %cst_107 [1] : vector<8x32xf32> to vector<8xf32>
    %267 = vector.shape_cast %266 : vector<8xf32> to vector<8x1xf32>
    %cst_108 = arith.constant 3.200000e+01 : f32
    %268 = vector.broadcast %cst_108 : f32 to vector<8x1xf32>
    %269 = arith.divf %267, %268 : vector<8x1xf32>
    %270 = vector.broadcast %269 : vector<8x1xf32> to vector<8x32xf32>
    %271 = arith.subf %263, %270 : vector<8x32xf32>
    %272 = arith.mulf %271, %271 : vector<8x32xf32>
    %cst_109 = arith.constant dense<0.000000e+00> : vector<8xf32>
    %273 = vector.multi_reduction <add>, %272, %cst_109 [1] : vector<8x32xf32> to vector<8xf32>
    %274 = vector.shape_cast %273 : vector<8xf32> to vector<8x1xf32>
    %cst_110 = arith.constant 3.200000e+01 : f32
    %275 = vector.broadcast %cst_110 : f32 to vector<8x1xf32>
    %276 = arith.divf %274, %275 : vector<8x1xf32>
    %277 = vector.broadcast %269 : vector<8x1xf32> to vector<8x32xf32>
    %278 = arith.subf %263, %277 : vector<8x32xf32>
    %cst_111 = arith.constant 9.99999996E-13 : f32
    %279 = vector.broadcast %cst_111 : f32 to vector<8x1xf32>
    %280 = arith.addf %276, %279 : vector<8x1xf32>
    %281 = math.rsqrt %280 : vector<8x1xf32>
    %282 = vector.broadcast %281 : vector<8x1xf32> to vector<8x32xf32>
    %283 = arith.mulf %278, %282 : vector<8x32xf32>
    %284 = vector.broadcast %264 : vector<1x32xf32> to vector<8x32xf32>
    %285 = arith.mulf %283, %284 : vector<8x32xf32>
    %286 = vector.broadcast %265 : vector<1x32xf32> to vector<8x32xf32>
    %287 = arith.addf %285, %286 : vector<8x32xf32>
    %c0_112 = arith.constant 0 : index
    %c0_113 = arith.constant 0 : index
    %c0_114 = arith.constant 0 : index
    %288 = vector.load %arg23[%c0_112, %c0_113, %c0_114] : memref<1x8x32xf32, #tpu.memory_space<vmem>>, vector<1x8x32xf32>
    %289 = vector.shape_cast %288 : vector<1x8x32xf32> to vector<8x32xf32>
    %290 = vector.shape_cast %287 : vector<8x32xf32> to vector<1x8x32xf32>
    tpu.vector_store %arg23[%c0_112, %c0_113, %c0_114], %290 {strides = array<i32>} : memref<1x8x32xf32, #tpu.memory_space<vmem>>, vector<1x8x32xf32>,
    return
  }
  func.func @transform_0(%arg0: i32) -> (i32, i32, i32) {
    %c0_i32 = arith.constant 0 : i32
    %c0_i32_0 = arith.constant 0 : i32
    %c0_i32_1 = arith.constant 0 : i32
    return %arg0, %c0_i32, %c0_i32_0 : i32, i32, i32
  }
  func.func @transform_1(%arg0: i32) -> (i32, i32, i32) {
    %c0_i32 = arith.constant 0 : i32
    %c0_i32_0 = arith.constant 0 : i32
    %c0_i32_1 = arith.constant 0 : i32
    return %arg0, %c0_i32, %c0_i32_0 : i32, i32, i32
  }
  func.func @transform_2(%arg0: i32) -> (i32, i32) {
    %c0_i32 = arith.constant 0 : i32
    %c0_i32_0 = arith.constant 0 : i32
    %c0_i32_1 = arith.constant 0 : i32
    return %c0_i32, %c0_i32_0 : i32, i32
  }
  func.func @transform_3(%arg0: i32) -> (i32, i32) {
    %c0_i32 = arith.constant 0 : i32
    %c0_i32_0 = arith.constant 0 : i32
    %c0_i32_1 = arith.constant 0 : i32
    return %c0_i32, %c0_i32_0 : i32, i32
  }
  func.func @transform_4(%arg0: i32) -> (i32, i32) {
    %c0_i32 = arith.constant 0 : i32
    %c0_i32_0 = arith.constant 0 : i32
    %c0_i32_1 = arith.constant 0 : i32
    return %c0_i32, %c0_i32_0 : i32, i32
  }
  func.func @transform_5(%arg0: i32) -> (i32, i32) {
    %c0_i32 = arith.constant 0 : i32
    %c0_i32_0 = arith.constant 0 : i32
    %c0_i32_1 = arith.constant 0 : i32
    return %c0_i32, %c0_i32_0 : i32, i32
  }
  func.func @transform_6(%arg0: i32) -> (i32, i32) {
    %c0_i32 = arith.constant 0 : i32
    %c0_i32_0 = arith.constant 0 : i32
    %c0_i32_1 = arith.constant 0 : i32
    return %c0_i32, %c0_i32_0 : i32, i32
  }
  func.func @transform_7(%arg0: i32) -> (i32, i32) {
    %c0_i32 = arith.constant 0 : i32
    %c0_i32_0 = arith.constant 0 : i32
    %c0_i32_1 = arith.constant 0 : i32
    return %c0_i32, %c0_i32_0 : i32, i32
  }
  func.func @transform_8(%arg0: i32) -> (i32, i32) {
    %c0_i32 = arith.constant 0 : i32
    %c0_i32_0 = arith.constant 0 : i32
    %c0_i32_1 = arith.constant 0 : i32
    return %c0_i32, %c0_i32_0 : i32, i32
  }
  func.func @transform_9(%arg0: i32) -> (i32, i32) {
    %c0_i32 = arith.constant 0 : i32
    %c0_i32_0 = arith.constant 0 : i32
    %c0_i32_1 = arith.constant 0 : i32
    return %c0_i32, %c0_i32_0 : i32, i32
  }
  func.func @transform_10(%arg0: i32) -> (i32, i32) {
    %c0_i32 = arith.constant 0 : i32
    %c0_i32_0 = arith.constant 0 : i32
    %c0_i32_1 = arith.constant 0 : i32
    return %c0_i32, %c0_i32_0 : i32, i32
  }
  func.func @transform_11(%arg0: i32) -> (i32, i32) {
    %c0_i32 = arith.constant 0 : i32
    %c0_i32_0 = arith.constant 0 : i32
    %c0_i32_1 = arith.constant 0 : i32
    return %c0_i32, %c0_i32_0 : i32, i32
  }
  func.func @transform_12(%arg0: i32) -> (i32, i32) {
    %c0_i32 = arith.constant 0 : i32
    %c0_i32_0 = arith.constant 0 : i32
    %c0_i32_1 = arith.constant 0 : i32
    return %c0_i32, %c0_i32_0 : i32, i32
  }
  func.func @transform_13(%arg0: i32) -> (i32, i32) {
    %c0_i32 = arith.constant 0 : i32
    %c0_i32_0 = arith.constant 0 : i32
    %c0_i32_1 = arith.constant 0 : i32
    return %c0_i32, %c0_i32_0 : i32, i32
  }
  func.func @transform_14(%arg0: i32) -> (i32, i32) {
    %c0_i32 = arith.constant 0 : i32
    %c0_i32_0 = arith.constant 0 : i32
    %c0_i32_1 = arith.constant 0 : i32
    return %c0_i32, %c0_i32_0 : i32, i32
  }
  func.func @transform_15(%arg0: i32) -> (i32, i32) {
    %c0_i32 = arith.constant 0 : i32
    %c0_i32_0 = arith.constant 0 : i32
    %c0_i32_1 = arith.constant 0 : i32
    return %c0_i32, %c0_i32_0 : i32, i32
  }
  func.func @transform_16(%arg0: i32) -> (i32, i32) {
    %c0_i32 = arith.constant 0 : i32
    %c0_i32_0 = arith.constant 0 : i32
    %c0_i32_1 = arith.constant 0 : i32
    return %c0_i32, %c0_i32_0 : i32, i32
  }
  func.func @transform_17(%arg0: i32) -> (i32, i32) {
    %c0_i32 = arith.constant 0 : i32
    %c0_i32_0 = arith.constant 0 : i32
    %c0_i32_1 = arith.constant 0 : i32
    return %c0_i32, %c0_i32_0 : i32, i32
  }
  func.func @transform_18(%arg0: i32) -> (i32, i32) {
    %c0_i32 = arith.constant 0 : i32
    %c0_i32_0 = arith.constant 0 : i32
    %c0_i32_1 = arith.constant 0 : i32
    return %c0_i32, %c0_i32_0 : i32, i32
  }
  func.func @transform_19(%arg0: i32) -> (i32, i32) {
    %c0_i32 = arith.constant 0 : i32
    %c0_i32_0 = arith.constant 0 : i32
    %c0_i32_1 = arith.constant 0 : i32
    return %c0_i32, %c0_i32_0 : i32, i32
  }
  func.func @transform_20(%arg0: i32) -> (i32, i32) {
    %c0_i32 = arith.constant 0 : i32
    %c0_i32_0 = arith.constant 0 : i32
    %c0_i32_1 = arith.constant 0 : i32
    return %c0_i32, %c0_i32_0 : i32, i32
  }
  func.func @transform_21(%arg0: i32) -> (i32, i32) {
    %c0_i32 = arith.constant 0 : i32
    %c0_i32_0 = arith.constant 0 : i32
    %c0_i32_1 = arith.constant 0 : i32
    return %c0_i32, %c0_i32_0 : i32, i32
  }
  func.func @transform_22(%arg0: i32) -> (i32, i32, i32) {
    %c0_i32 = arith.constant 0 : i32
    %c0_i32_0 = arith.constant 0 : i32
    %c0_i32_1 = arith.constant 0 : i32
    return %arg0, %c0_i32, %c0_i32_0 : i32, i32, i32
  }
}

module attributes {stable_mosaic.version = 11 : i64} {
  func.func @_decoder_layer_kernel(%arg0: i32, %arg1: memref<1x8x32xf32, #tpu.memory_space<vmem>>, %arg2: memref<1x8x32xf32, #tpu.memory_space<vmem>>, %arg3: memref<32x96xf32, #tpu.memory_space<vmem>>, %arg4: memref<1x96xf32, #tpu.memory_space<vmem>>, %arg5: memref<32x32xf32, #tpu.memory_space<vmem>>, %arg6: memref<1x32xf32, #tpu.memory_space<vmem>>, %arg7: memref<1x32xf32, #tpu.memory_space<vmem>>, %arg8: memref<1x32xf32, #tpu.memory_space<vmem>>, %arg9: memref<32x32xf32, #tpu.memory_space<vmem>>, %arg10: memref<1x32xf32, #tpu.memory_space<vmem>>, %arg11: memref<32x64xf32, #tpu.memory_space<vmem>>, %arg12: memref<1x64xf32, #tpu.memory_space<vmem>>, %arg13: memref<32x32xf32, #tpu.memory_space<vmem>>, %arg14: memref<1x32xf32, #tpu.memory_space<vmem>>, %arg15: memref<1x32xf32, #tpu.memory_space<vmem>>, %arg16: memref<1x32xf32, #tpu.memory_space<vmem>>, %arg17: memref<32x64xf32, #tpu.memory_space<vmem>>, %arg18: memref<1x64xf32, #tpu.memory_space<vmem>>, %arg19: memref<64x32xf32, #tpu.memory_space<vmem>>, %arg20: memref<1x32xf32, #tpu.memory_space<vmem>>, %arg21: memref<1x32xf32, #tpu.memory_space<vmem>>, %arg22: memref<1x32xf32, #tpu.memory_space<vmem>>, %arg23: memref<1x8x32xf32, #tpu.memory_space<vmem>>) attributes {dimension_semantics = [#tpu.dimension_semantics<parallel>], iteration_bounds = array<i64: 2>, scalar_prefetch = 0 : i64, scratch_operands = 0 : i64, tpu.core_type = #tpu.core_type<tc>, window_params = [{transform_indices = @transform_0, window_bounds = array<i64: 1, 8, 32>}, {transform_indices = @transform_1, window_bounds = array<i64: 1, 8, 32>}, {pipeline_mode = #tpu.pipeline_mode<synchronous>, transform_indices = @transform_2, window_bounds = array<i64: 32, 96>}, {pipeline_mode = #tpu.pipeline_mode<synchronous>, transform_indices = @transform_3, window_bounds = array<i64: 1, 96>}, {pipeline_mode = #tpu.pipeline_mode<synchronous>, transform_indices = @transform_4, window_bounds = array<i64: 32, 32>}, {pipeline_mode = #tpu.pipeline_mode<synchronous>, transform_indices = @transform_5, window_bounds = array<i64: 1, 32>}, {pipeline_mode = #tpu.pipeline_mode<synchronous>, transform_indices = @transform_6, window_bounds = array<i64: 1, 32>}, {pipeline_mode = #tpu.pipeline_mode<synchronous>, transform_indices = @transform_7, window_bounds = array<i64: 1, 32>}, {pipeline_mode = #tpu.pipeline_mode<synchronous>, transform_indices = @transform_8, window_bounds = array<i64: 32, 32>}, {pipeline_mode = #tpu.pipeline_mode<synchronous>, transform_indices = @transform_9, window_bounds = array<i64: 1, 32>}, {pipeline_mode = #tpu.pipeline_mode<synchronous>, transform_indices = @transform_10, window_bounds = array<i64: 32, 64>}, {pipeline_mode = #tpu.pipeline_mode<synchronous>, transform_indices = @transform_11, window_bounds = array<i64: 1, 64>}, {pipeline_mode = #tpu.pipeline_mode<synchronous>, transform_indices = @transform_12, window_bounds = array<i64: 32, 32>}, {pipeline_mode = #tpu.pipeline_mode<synchronous>, transform_indices = @transform_13, window_bounds = array<i64: 1, 32>}, {pipeline_mode = #tpu.pipeline_mode<synchronous>, transform_indices = @transform_14, window_bounds = array<i64: 1, 32>}, {pipeline_mode = #tpu.pipeline_mode<synchronous>, transform_indices = @transform_15, window_bounds = array<i64: 1, 32>}, {pipeline_mode = #tpu.pipeline_mode<synchronous>, transform_indices = @transform_16, window_bounds = array<i64: 32, 64>}, {pipeline_mode = #tpu.pipeline_mode<synchronous>, transform_indices = @transform_17, window_bounds = array<i64: 1, 64>}, {pipeline_mode = #tpu.pipeline_mode<synchronous>, transform_indices = @transform_18, window_bounds = array<i64: 64, 32>}, {pipeline_mode = #tpu.pipeline_mode<synchronous>, transform_indices = @transform_19, window_bounds = array<i64: 1, 32>}, {pipeline_mode = #tpu.pipeline_mode<synchronous>, transform_indices = @transform_20, window_bounds = array<i64: 1, 32>}, {pipeline_mode = #tpu.pipeline_mode<synchronous>, transform_indices = @transform_21, window_bounds = array<i64: 1, 32>}, {transform_indices = @transform_22, window_bounds = array<i64: 1, 8, 32>}]} {
    %c0 = arith.constant 0 : index
    %c0_0 = arith.constant 0 : index
    %c0_1 = arith.constant 0 : index
    %0 = vector.load %arg1[%c0, %c0_0, %c0_1] : memref<1x8x32xf32, #tpu.memory_space<vmem>>, vector<1x8x32xf32>
    %1 = vector.shape_cast %0 : vector<1x8x32xf32> to vector<8x32xf32>
    %c0_2 = arith.constant 0 : index
    %c0_3 = arith.constant 0 : index
    %2 = vector.load %arg3[%c0_2, %c0_3] : memref<32x96xf32, #tpu.memory_space<vmem>>, vector<32x96xf32>
    %cst = arith.constant dense<0.000000e+00> : vector<8x96xf32>
    %3 = tpu.matmul %1, %2, %cst {dimension_numbers = #tpu.dot_dimension_numbers<[1], [0], [0], [1], [0, 0, 1, 1], [], []>} : vector<8x32xf32>, vector<32x96xf32>, vector<8x96xf32> -> vector<8x96xf32>
    %c0_4 = arith.constant 0 : index
    %c0_5 = arith.constant 0 : index
    %4 = vector.load %arg4[%c0_4, %c0_5] : memref<1x96xf32, #tpu.memory_space<vmem>>, vector<1x96xf32>
    %5 = vector.broadcast %4 : vector<1x96xf32> to vector<8x96xf32>
    %6 = arith.addf %3, %5 : vector<8x96xf32>
    %7 = vector.extract_strided_slice %6 {offsets = [0, 0], sizes = [8, 32], strides = [1, 1]} : vector<8x96xf32> to vector<8x32xf32>
    %8 = vector.extract_strided_slice %6 {offsets = [0, 32], sizes = [8, 32], strides = [1, 1]} : vector<8x96xf32> to vector<8x32xf32>
    %9 = vector.extract_strided_slice %6 {offsets = [0, 64], sizes = [8, 32], strides = [1, 1]} : vector<8x96xf32> to vector<8x32xf32>
    %10 = tpu.iota {dimensions = array<i32: 0>} : vector<8x8xi32>
    %11 = tpu.iota {dimensions = array<i32: 1>} : vector<8x8xi32>
    %12 = arith.cmpi sge, %10, %11 : vector<8x8xi32>
    %cst_6 = arith.constant 0.000000e+00 : f32
    %cst_7 = arith.constant -1.000000e+09 : f32
    %13 = vector.broadcast %cst_6 : f32 to vector<8x8xf32>
    %14 = vector.broadcast %cst_7 : f32 to vector<8x8xf32>
    %15 = arith.select %12, %13, %14 : vector<8x8xi1>, vector<8x8xf32>
    %16 = vector.extract_strided_slice %7 {offsets = [0, 0], sizes = [8, 8], strides = [1, 1]} : vector<8x32xf32> to vector<8x8xf32>
    %17 = vector.extract_strided_slice %8 {offsets = [0, 0], sizes = [8, 8], strides = [1, 1]} : vector<8x32xf32> to vector<8x8xf32>
    %18 = tpu.transpose %17, [1, 0] : vector<8x8xf32> -> vector<8x8xf32>
    %cst_8 = arith.constant dense<0.000000e+00> : vector<8x8xf32>
    %19 = tpu.matmul %16, %18, %cst_8 {dimension_numbers = #tpu.dot_dimension_numbers<[1], [0], [0], [1], [0, 0, 1, 1], [], []>} : vector<8x8xf32>, vector<8x8xf32>, vector<8x8xf32> -> vector<8x8xf32>
    %cst_9 = arith.constant 0.353553385 : f32
    %20 = vector.broadcast %cst_9 : f32 to vector<8x8xf32>
    %21 = arith.mulf %19, %20 : vector<8x8xf32>
    %22 = arith.addf %21, %15 : vector<8x8xf32>
    %cst_10 = arith.constant dense<0xFF800000> : vector<8xf32>
    %23 = vector.multi_reduction <maximumf>, %22, %cst_10 [1] : vector<8x8xf32> to vector<8xf32>
    %24 = vector.shape_cast %23 : vector<8xf32> to vector<8x1xf32>
    %25 = vector.broadcast %24 : vector<8x1xf32> to vector<8x8xf32>
    %26 = arith.subf %22, %25 : vector<8x8xf32>
    %27 = math.exp %26 : vector<8x8xf32>
    %cst_11 = arith.constant dense<0.000000e+00> : vector<8xf32>
    %28 = vector.multi_reduction <add>, %27, %cst_11 [1] : vector<8x8xf32> to vector<8xf32>
    %29 = vector.shape_cast %28 : vector<8xf32> to vector<8x1xf32>
    %30 = tpu.reciprocal %29 {approx = true} : vector<8x1xf32> -> vector<8x1xf32>
    %31 = vector.broadcast %30 : vector<8x1xf32> to vector<8x8xf32>
    %32 = arith.mulf %27, %31 : vector<8x8xf32>
    %33 = vector.extract_strided_slice %9 {offsets = [0, 0], sizes = [8, 8], strides = [1, 1]} : vector<8x32xf32> to vector<8x8xf32>
    %cst_12 = arith.constant dense<0.000000e+00> : vector<8x8xf32>
    %34 = tpu.matmul %32, %33, %cst_12 {dimension_numbers = #tpu.dot_dimension_numbers<[1], [0], [0], [1], [0, 0, 1, 1], [], []>} : vector<8x8xf32>, vector<8x8xf32>, vector<8x8xf32> -> vector<8x8xf32>
    %35 = vector.extract_strided_slice %7 {offsets = [0, 8], sizes = [8, 8], strides = [1, 1]} : vector<8x32xf32> to vector<8x8xf32>
    %36 = vector.extract_strided_slice %8 {offsets = [0, 8], sizes = [8, 8], strides = [1, 1]} : vector<8x32xf32> to vector<8x8xf32>
    %37 = tpu.transpose %36, [1, 0] : vector<8x8xf32> -> vector<8x8xf32>
    %cst_13 = arith.constant dense<0.000000e+00> : vector<8x8xf32>
    %38 = tpu.matmul %35, %37, %cst_13 {dimension_numbers = #tpu.dot_dimension_numbers<[1], [0], [0], [1], [0, 0, 1, 1], [], []>} : vector<8x8xf32>, vector<8x8xf32>, vector<8x8xf32> -> vector<8x8xf32>
    %cst_14 = arith.constant 0.353553385 : f32
    %39 = vector.broadcast %cst_14 : f32 to vector<8x8xf32>
    %40 = arith.mulf %38, %39 : vector<8x8xf32>
    %41 = arith.addf %40, %15 : vector<8x8xf32>
    %cst_15 = arith.constant dense<0xFF800000> : vector<8xf32>
    %42 = vector.multi_reduction <maximumf>, %41, %cst_15 [1] : vector<8x8xf32> to vector<8xf32>
    %43 = vector.shape_cast %42 : vector<8xf32> to vector<8x1xf32>
    %44 = vector.broadcast %43 : vector<8x1xf32> to vector<8x8xf32>
    %45 = arith.subf %41, %44 : vector<8x8xf32>
    %46 = math.exp %45 : vector<8x8xf32>
    %cst_16 = arith.constant dense<0.000000e+00> : vector<8xf32>
    %47 = vector.multi_reduction <add>, %46, %cst_16 [1] : vector<8x8xf32> to vector<8xf32>
    %48 = vector.shape_cast %47 : vector<8xf32> to vector<8x1xf32>
    %49 = tpu.reciprocal %48 {approx = true} : vector<8x1xf32> -> vector<8x1xf32>
    %50 = vector.broadcast %49 : vector<8x1xf32> to vector<8x8xf32>
    %51 = arith.mulf %46, %50 : vector<8x8xf32>
    %52 = vector.extract_strided_slice %9 {offsets = [0, 8], sizes = [8, 8], strides = [1, 1]} : vector<8x32xf32> to vector<8x8xf32>
    %cst_17 = arith.constant dense<0.000000e+00> : vector<8x8xf32>
    %53 = tpu.matmul %51, %52, %cst_17 {dimension_numbers = #tpu.dot_dimension_numbers<[1], [0], [0], [1], [0, 0, 1, 1], [], []>} : vector<8x8xf32>, vector<8x8xf32>, vector<8x8xf32> -> vector<8x8xf32>
    %54 = vector.extract_strided_slice %7 {offsets = [0, 16], sizes = [8, 8], strides = [1, 1]} : vector<8x32xf32> to vector<8x8xf32>
    %55 = vector.extract_strided_slice %8 {offsets = [0, 16], sizes = [8, 8], strides = [1, 1]} : vector<8x32xf32> to vector<8x8xf32>
    %56 = tpu.transpose %55, [1, 0] : vector<8x8xf32> -> vector<8x8xf32>
    %cst_18 = arith.constant dense<0.000000e+00> : vector<8x8xf32>
    %57 = tpu.matmul %54, %56, %cst_18 {dimension_numbers = #tpu.dot_dimension_numbers<[1], [0], [0], [1], [0, 0, 1, 1], [], []>} : vector<8x8xf32>, vector<8x8xf32>, vector<8x8xf32> -> vector<8x8xf32>
    %cst_19 = arith.constant 0.353553385 : f32
    %58 = vector.broadcast %cst_19 : f32 to vector<8x8xf32>
    %59 = arith.mulf %57, %58 : vector<8x8xf32>
    %60 = arith.addf %59, %15 : vector<8x8xf32>
    %cst_20 = arith.constant dense<0xFF800000> : vector<8xf32>
    %61 = vector.multi_reduction <maximumf>, %60, %cst_20 [1] : vector<8x8xf32> to vector<8xf32>
    %62 = vector.shape_cast %61 : vector<8xf32> to vector<8x1xf32>
    %63 = vector.broadcast %62 : vector<8x1xf32> to vector<8x8xf32>
    %64 = arith.subf %60, %63 : vector<8x8xf32>
    %65 = math.exp %64 : vector<8x8xf32>
    %cst_21 = arith.constant dense<0.000000e+00> : vector<8xf32>
    %66 = vector.multi_reduction <add>, %65, %cst_21 [1] : vector<8x8xf32> to vector<8xf32>
    %67 = vector.shape_cast %66 : vector<8xf32> to vector<8x1xf32>
    %68 = tpu.reciprocal %67 {approx = true} : vector<8x1xf32> -> vector<8x1xf32>
    %69 = vector.broadcast %68 : vector<8x1xf32> to vector<8x8xf32>
    %70 = arith.mulf %65, %69 : vector<8x8xf32>
    %71 = vector.extract_strided_slice %9 {offsets = [0, 16], sizes = [8, 8], strides = [1, 1]} : vector<8x32xf32> to vector<8x8xf32>
    %cst_22 = arith.constant dense<0.000000e+00> : vector<8x8xf32>
    %72 = tpu.matmul %70, %71, %cst_22 {dimension_numbers = #tpu.dot_dimension_numbers<[1], [0], [0], [1], [0, 0, 1, 1], [], []>} : vector<8x8xf32>, vector<8x8xf32>, vector<8x8xf32> -> vector<8x8xf32>
    %73 = vector.extract_strided_slice %7 {offsets = [0, 24], sizes = [8, 8], strides = [1, 1]} : vector<8x32xf32> to vector<8x8xf32>
    %74 = vector.extract_strided_slice %8 {offsets = [0, 24], sizes = [8, 8], strides = [1, 1]} : vector<8x32xf32> to vector<8x8xf32>
    %75 = tpu.transpose %74, [1, 0] : vector<8x8xf32> -> vector<8x8xf32>
    %cst_23 = arith.constant dense<0.000000e+00> : vector<8x8xf32>
    %76 = tpu.matmul %73, %75, %cst_23 {dimension_numbers = #tpu.dot_dimension_numbers<[1], [0], [0], [1], [0, 0, 1, 1], [], []>} : vector<8x8xf32>, vector<8x8xf32>, vector<8x8xf32> -> vector<8x8xf32>
    %cst_24 = arith.constant 0.353553385 : f32
    %77 = vector.broadcast %cst_24 : f32 to vector<8x8xf32>
    %78 = arith.mulf %76, %77 : vector<8x8xf32>
    %79 = arith.addf %78, %15 : vector<8x8xf32>
    %cst_25 = arith.constant dense<0xFF800000> : vector<8xf32>
    %80 = vector.multi_reduction <maximumf>, %79, %cst_25 [1] : vector<8x8xf32> to vector<8xf32>
    %81 = vector.shape_cast %80 : vector<8xf32> to vector<8x1xf32>
    %82 = vector.broadcast %81 : vector<8x1xf32> to vector<8x8xf32>
    %83 = arith.subf %79, %82 : vector<8x8xf32>
    %84 = math.exp %83 : vector<8x8xf32>
    %cst_26 = arith.constant dense<0.000000e+00> : vector<8xf32>
    %85 = vector.multi_reduction <add>, %84, %cst_26 [1] : vector<8x8xf32> to vector<8xf32>
    %86 = vector.shape_cast %85 : vector<8xf32> to vector<8x1xf32>
    %87 = tpu.reciprocal %86 {approx = true} : vector<8x1xf32> -> vector<8x1xf32>
    %88 = vector.broadcast %87 : vector<8x1xf32> to vector<8x8xf32>
    %89 = arith.mulf %84, %88 : vector<8x8xf32>
    %90 = vector.extract_strided_slice %9 {offsets = [0, 24], sizes = [8, 8], strides = [1, 1]} : vector<8x32xf32> to vector<8x8xf32>
    %cst_27 = arith.constant dense<0.000000e+00> : vector<8x8xf32>
    %91 = tpu.matmul %89, %90, %cst_27 {dimension_numbers = #tpu.dot_dimension_numbers<[1], [0], [0], [1], [0, 0, 1, 1], [], []>} : vector<8x8xf32>, vector<8x8xf32>, vector<8x8xf32> -> vector<8x8xf32>
    %92 = tpu.concatenate %34, %53, %72, %91 in 1 : vector<8x8xf32>, vector<8x8xf32>, vector<8x8xf32>, vector<8x8xf32> -> vector<8x32xf32>
    %c0_28 = arith.constant 0 : index
    %c0_29 = arith.constant 0 : index
    %93 = vector.load %arg5[%c0_28, %c0_29] : memref<32x32xf32, #tpu.memory_space<vmem>>, vector<32x32xf32>
    %cst_30 = arith.constant dense<0.000000e+00> : vector<8x32xf32>
    %94 = tpu.matmul %92, %93, %cst_30 {dimension_numbers = #tpu.dot_dimension_numbers<[1], [0], [0], [1], [0, 0, 1, 1], [], []>} : vector<8x32xf32>, vector<32x32xf32>, vector<8x32xf32> -> vector<8x32xf32>
    %c0_31 = arith.constant 0 : index
    %c0_32 = arith.constant 0 : index
    %95 = vector.load %arg6[%c0_31, %c0_32] : memref<1x32xf32, #tpu.memory_space<vmem>>, vector<1x32xf32>
    %96 = vector.broadcast %95 : vector<1x32xf32> to vector<8x32xf32>
    %97 = arith.addf %94, %96 : vector<8x32xf32>
    %98 = arith.addf %97, %1 : vector<8x32xf32>
    %c0_33 = arith.constant 0 : index
    %c0_34 = arith.constant 0 : index
    %99 = vector.load %arg7[%c0_33, %c0_34] : memref<1x32xf32, #tpu.memory_space<vmem>>, vector<1x32xf32>
    %c0_35 = arith.constant 0 : index
    %c0_36 = arith.constant 0 : index
    %100 = vector.load %arg8[%c0_35, %c0_36] : memref<1x32xf32, #tpu.memory_space<vmem>>, vector<1x32xf32>
    %cst_37 = arith.constant dense<0.000000e+00> : vector<8xf32>
    %101 = vector.multi_reduction <add>, %98, %cst_37 [1] : vector<8x32xf32> to vector<8xf32>
    %102 = vector.shape_cast %101 : vector<8xf32> to vector<8x1xf32>
    %cst_38 = arith.constant 3.200000e+01 : f32
    %103 = vector.broadcast %cst_38 : f32 to vector<8x1xf32>
    %104 = arith.divf %102, %103 : vector<8x1xf32>
    %105 = vector.broadcast %104 : vector<8x1xf32> to vector<8x32xf32>
    %106 = arith.subf %98, %105 : vector<8x32xf32>
    %107 = arith.mulf %106, %106 : vector<8x32xf32>
    %cst_39 = arith.constant dense<0.000000e+00> : vector<8xf32>
    %108 = vector.multi_reduction <add>, %107, %cst_39 [1] : vector<8x32xf32> to vector<8xf32>
    %109 = vector.shape_cast %108 : vector<8xf32> to vector<8x1xf32>
    %cst_40 = arith.constant 3.200000e+01 : f32
    %110 = vector.broadcast %cst_40 : f32 to vector<8x1xf32>
    %111 = arith.divf %109, %110 : vector<8x1xf32>
    %112 = vector.broadcast %104 : vector<8x1xf32> to vector<8x32xf32>
    %113 = arith.subf %98, %112 : vector<8x32xf32>
    %cst_41 = arith.constant 9.99999996E-13 : f32
    %114 = vector.broadcast %cst_41 : f32 to vector<8x1xf32>
    %115 = arith.addf %111, %114 : vector<8x1xf32>
    %116 = math.rsqrt %115 : vector<8x1xf32>
    %117 = vector.broadcast %116 : vector<8x1xf32> to vector<8x32xf32>
    %118 = arith.mulf %113, %117 : vector<8x32xf32>
    %119 = vector.broadcast %99 : vector<1x32xf32> to vector<8x32xf32>
    %120 = arith.mulf %118, %119 : vector<8x32xf32>
    %121 = vector.broadcast %100 : vector<1x32xf32> to vector<8x32xf32>
    %122 = arith.addf %120, %121 : vector<8x32xf32>
    %c0_42 = arith.constant 0 : index
    %c0_43 = arith.constant 0 : index
    %c0_44 = arith.constant 0 : index
    %123 = vector.load %arg2[%c0_42, %c0_43, %c0_44] : memref<1x8x32xf32, #tpu.memory_space<vmem>>, vector<1x8x32xf32>
    %124 = vector.shape_cast %123 : vector<1x8x32xf32> to vector<8x32xf32>
    %c0_45 = arith.constant 0 : index
    %c0_46 = arith.constant 0 : index
    %125 = vector.load %arg9[%c0_45, %c0_46] : memref<32x32xf32, #tpu.memory_space<vmem>>, vector<32x32xf32>
    %cst_47 = arith.constant dense<0.000000e+00> : vector<8x32xf32>
    %126 = tpu.matmul %122, %125, %cst_47 {dimension_numbers = #tpu.dot_dimension_numbers<[1], [0], [0], [1], [0, 0, 1, 1], [], []>} : vector<8x32xf32>, vector<32x32xf32>, vector<8x32xf32> -> vector<8x32xf32>
    %c0_48 = arith.constant 0 : index
    %c0_49 = arith.constant 0 : index
    %127 = vector.load %arg10[%c0_48, %c0_49] : memref<1x32xf32, #tpu.memory_space<vmem>>, vector<1x32xf32>
    %128 = vector.broadcast %127 : vector<1x32xf32> to vector<8x32xf32>
    %129 = arith.addf %126, %128 : vector<8x32xf32>
    %c0_50 = arith.constant 0 : index
    %c0_51 = arith.constant 0 : index
    %130 = vector.load %arg11[%c0_50, %c0_51] : memref<32x64xf32, #tpu.memory_space<vmem>>, vector<32x64xf32>
    %cst_52 = arith.constant dense<0.000000e+00> : vector<8x64xf32>
    %131 = tpu.matmul %124, %130, %cst_52 {dimension_numbers = #tpu.dot_dimension_numbers<[1], [0], [0], [1], [0, 0, 1, 1], [], []>} : vector<8x32xf32>, vector<32x64xf32>, vector<8x64xf32> -> vector<8x64xf32>
    %c0_53 = arith.constant 0 : index
    %c0_54 = arith.constant 0 : index
    %132 = vector.load %arg12[%c0_53, %c0_54] : memref<1x64xf32, #tpu.memory_space<vmem>>, vector<1x64xf32>
    %133 = vector.broadcast %132 : vector<1x64xf32> to vector<8x64xf32>
    %134 = arith.addf %131, %133 : vector<8x64xf32>
    %135 = vector.extract_strided_slice %134 {offsets = [0, 0], sizes = [8, 32], strides = [1, 1]} : vector<8x64xf32> to vector<8x32xf32>
    %136 = vector.extract_strided_slice %134 {offsets = [0, 32], sizes = [8, 32], strides = [1, 1]} : vector<8x64xf32> to vector<8x32xf32>
    %137 = vector.extract_strided_slice %129 {offsets = [0, 0], sizes = [8, 8], strides = [1, 1]} : vector<8x32xf32> to vector<8x8xf32>
    %138 = vector.extract_strided_slice %135 {offsets = [0, 0], sizes = [8, 8], strides = [1, 1]} : vector<8x32xf32> to vector<8x8xf32>
    %139 = tpu.transpose %138, [1, 0] : vector<8x8xf32> -> vector<8x8xf32>
    %cst_55 = arith.constant dense<0.000000e+00> : vector<8x8xf32>
    %140 = tpu.matmul %137, %139, %cst_55 {dimension_numbers = #tpu.dot_dimension_numbers<[1], [0], [0], [1], [0, 0, 1, 1], [], []>} : vector<8x8xf32>, vector<8x8xf32>, vector<8x8xf32> -> vector<8x8xf32>
    %cst_56 = arith.constant 0.353553385 : f32
    %141 = vector.broadcast %cst_56 : f32 to vector<8x8xf32>
    %142 = arith.mulf %140, %141 : vector<8x8xf32>
    %cst_57 = arith.constant dense<0xFF800000> : vector<8xf32>
    %143 = vector.multi_reduction <maximumf>, %142, %cst_57 [1] : vector<8x8xf32> to vector<8xf32>
    %144 = vector.shape_cast %143 : vector<8xf32> to vector<8x1xf32>
    %145 = vector.broadcast %144 : vector<8x1xf32> to vector<8x8xf32>
    %146 = arith.subf %142, %145 : vector<8x8xf32>
    %147 = math.exp %146 : vector<8x8xf32>
    %cst_58 = arith.constant dense<0.000000e+00> : vector<8xf32>
    %148 = vector.multi_reduction <add>, %147, %cst_58 [1] : vector<8x8xf32> to vector<8xf32>
    %149 = vector.shape_cast %148 : vector<8xf32> to vector<8x1xf32>
    %150 = tpu.reciprocal %149 {approx = true} : vector<8x1xf32> -> vector<8x1xf32>
    %151 = vector.broadcast %150 : vector<8x1xf32> to vector<8x8xf32>
    %152 = arith.mulf %147, %151 : vector<8x8xf32>
    %153 = vector.extract_strided_slice %136 {offsets = [0, 0], sizes = [8, 8], strides = [1, 1]} : vector<8x32xf32> to vector<8x8xf32>
    %cst_59 = arith.constant dense<0.000000e+00> : vector<8x8xf32>
    %154 = tpu.matmul %152, %153, %cst_59 {dimension_numbers = #tpu.dot_dimension_numbers<[1], [0], [0], [1], [0, 0, 1, 1], [], []>} : vector<8x8xf32>, vector<8x8xf32>, vector<8x8xf32> -> vector<8x8xf32>
    %155 = vector.extract_strided_slice %129 {offsets = [0, 8], sizes = [8, 8], strides = [1, 1]} : vector<8x32xf32> to vector<8x8xf32>
    %156 = vector.extract_strided_slice %135 {offsets = [0, 8], sizes = [8, 8], strides = [1, 1]} : vector<8x32xf32> to vector<8x8xf32>
    %157 = tpu.transpose %156, [1, 0] : vector<8x8xf32> -> vector<8x8xf32>
    %cst_60 = arith.constant dense<0.000000e+00> : vector<8x8xf32>
    %158 = tpu.matmul %155, %157, %cst_60 {dimension_numbers = #tpu.dot_dimension_numbers<[1], [0], [0], [1], [0, 0, 1, 1], [], []>} : vector<8x8xf32>, vector<8x8xf32>, vector<8x8xf32> -> vector<8x8xf32>
    %cst_61 = arith.constant 0.353553385 : f32
    %159 = vector.broadcast %cst_61 : f32 to vector<8x8xf32>
    %160 = arith.mulf %158, %159 : vector<8x8xf32>
    %cst_62 = arith.constant dense<0xFF800000> : vector<8xf32>
    %161 = vector.multi_reduction <maximumf>, %160, %cst_62 [1] : vector<8x8xf32> to vector<8xf32>
    %162 = vector.shape_cast %161 : vector<8xf32> to vector<8x1xf32>
    %163 = vector.broadcast %162 : vector<8x1xf32> to vector<8x8xf32>
    %164 = arith.subf %160, %163 : vector<8x8xf32>
    %165 = math.exp %164 : vector<8x8xf32>
    %cst_63 = arith.constant dense<0.000000e+00> : vector<8xf32>
    %166 = vector.multi_reduction <add>, %165, %cst_63 [1] : vector<8x8xf32> to vector<8xf32>
    %167 = vector.shape_cast %166 : vector<8xf32> to vector<8x1xf32>
    %168 = tpu.reciprocal %167 {approx = true} : vector<8x1xf32> -> vector<8x1xf32>
    %169 = vector.broadcast %168 : vector<8x1xf32> to vector<8x8xf32>
    %170 = arith.mulf %165, %169 : vector<8x8xf32>
    %171 = vector.extract_strided_slice %136 {offsets = [0, 8], sizes = [8, 8], strides = [1, 1]} : vector<8x32xf32> to vector<8x8xf32>
    %cst_64 = arith.constant dense<0.000000e+00> : vector<8x8xf32>
    %172 = tpu.matmul %170, %171, %cst_64 {dimension_numbers = #tpu.dot_dimension_numbers<[1], [0], [0], [1], [0, 0, 1, 1], [], []>} : vector<8x8xf32>, vector<8x8xf32>, vector<8x8xf32> -> vector<8x8xf32>
    %173 = vector.extract_strided_slice %129 {offsets = [0, 16], sizes = [8, 8], strides = [1, 1]} : vector<8x32xf32> to vector<8x8xf32>
    %174 = vector.extract_strided_slice %135 {offsets = [0, 16], sizes = [8, 8], strides = [1, 1]} : vector<8x32xf32> to vector<8x8xf32>
    %175 = tpu.transpose %174, [1, 0] : vector<8x8xf32> -> vector<8x8xf32>
    %cst_65 = arith.constant dense<0.000000e+00> : vector<8x8xf32>
    %176 = tpu.matmul %173, %175, %cst_65 {dimension_numbers = #tpu.dot_dimension_numbers<[1], [0], [0], [1], [0, 0, 1, 1], [], []>} : vector<8x8xf32>, vector<8x8xf32>, vector<8x8xf32> -> vector<8x8xf32>
    %cst_66 = arith.constant 0.353553385 : f32
    %177 = vector.broadcast %cst_66 : f32 to vector<8x8xf32>
    %178 = arith.mulf %176, %177 : vector<8x8xf32>
    %cst_67 = arith.constant dense<0xFF800000> : vector<8xf32>
    %179 = vector.multi_reduction <maximumf>, %178, %cst_67 [1] : vector<8x8xf32> to vector<8xf32>
    %180 = vector.shape_cast %179 : vector<8xf32> to vector<8x1xf32>
    %181 = vector.broadcast %180 : vector<8x1xf32> to vector<8x8xf32>
    %182 = arith.subf %178, %181 : vector<8x8xf32>
    %183 = math.exp %182 : vector<8x8xf32>
    %cst_68 = arith.constant dense<0.000000e+00> : vector<8xf32>
    %184 = vector.multi_reduction <add>, %183, %cst_68 [1] : vector<8x8xf32> to vector<8xf32>
    %185 = vector.shape_cast %184 : vector<8xf32> to vector<8x1xf32>
    %186 = tpu.reciprocal %185 {approx = true} : vector<8x1xf32> -> vector<8x1xf32>
    %187 = vector.broadcast %186 : vector<8x1xf32> to vector<8x8xf32>
    %188 = arith.mulf %183, %187 : vector<8x8xf32>
    %189 = vector.extract_strided_slice %136 {offsets = [0, 16], sizes = [8, 8], strides = [1, 1]} : vector<8x32xf32> to vector<8x8xf32>
    %cst_69 = arith.constant dense<0.000000e+00> : vector<8x8xf32>
    %190 = tpu.matmul %188, %189, %cst_69 {dimension_numbers = #tpu.dot_dimension_numbers<[1], [0], [0], [1], [0, 0, 1, 1], [], []>} : vector<8x8xf32>, vector<8x8xf32>, vector<8x8xf32> -> vector<8x8xf32>
    %191 = vector.extract_strided_slice %129 {offsets = [0, 24], sizes = [8, 8], strides = [1, 1]} : vector<8x32xf32> to vector<8x8xf32>
    %192 = vector.extract_strided_slice %135 {offsets = [0, 24], sizes = [8, 8], strides = [1, 1]} : vector<8x32xf32> to vector<8x8xf32>
    %193 = tpu.transpose %192, [1, 0] : vector<8x8xf32> -> vector<8x8xf32>
    %cst_70 = arith.constant dense<0.000000e+00> : vector<8x8xf32>
    %194 = tpu.matmul %191, %193, %cst_70 {dimension_numbers = #tpu.dot_dimension_numbers<[1], [0], [0], [1], [0, 0, 1, 1], [], []>} : vector<8x8xf32>, vector<8x8xf32>, vector<8x8xf32> -> vector<8x8xf32>
    %cst_71 = arith.constant 0.353553385 : f32
    %195 = vector.broadcast %cst_71 : f32 to vector<8x8xf32>
    %196 = arith.mulf %194, %195 : vector<8x8xf32>
    %cst_72 = arith.constant dense<0xFF800000> : vector<8xf32>
    %197 = vector.multi_reduction <maximumf>, %196, %cst_72 [1] : vector<8x8xf32> to vector<8xf32>
    %198 = vector.shape_cast %197 : vector<8xf32> to vector<8x1xf32>
    %199 = vector.broadcast %198 : vector<8x1xf32> to vector<8x8xf32>
    %200 = arith.subf %196, %199 : vector<8x8xf32>
    %201 = math.exp %200 : vector<8x8xf32>
    %cst_73 = arith.constant dense<0.000000e+00> : vector<8xf32>
    %202 = vector.multi_reduction <add>, %201, %cst_73 [1] : vector<8x8xf32> to vector<8xf32>
    %203 = vector.shape_cast %202 : vector<8xf32> to vector<8x1xf32>
    %204 = tpu.reciprocal %203 {approx = true} : vector<8x1xf32> -> vector<8x1xf32>
    %205 = vector.broadcast %204 : vector<8x1xf32> to vector<8x8xf32>
    %206 = arith.mulf %201, %205 : vector<8x8xf32>
    %207 = vector.extract_strided_slice %136 {offsets = [0, 24], sizes = [8, 8], strides = [1, 1]} : vector<8x32xf32> to vector<8x8xf32>
    %cst_74 = arith.constant dense<0.000000e+00> : vector<8x8xf32>
    %208 = tpu.matmul %206, %207, %cst_74 {dimension_numbers = #tpu.dot_dimension_numbers<[1], [0], [0], [1], [0, 0, 1, 1], [], []>} : vector<8x8xf32>, vector<8x8xf32>, vector<8x8xf32> -> vector<8x8xf32>
    %209 = tpu.concatenate %154, %172, %190, %208 in 1 : vector<8x8xf32>, vector<8x8xf32>, vector<8x8xf32>, vector<8x8xf32> -> vector<8x32xf32>
    %c0_75 = arith.constant 0 : index
    %c0_76 = arith.constant 0 : index
    %210 = vector.load %arg13[%c0_75, %c0_76] : memref<32x32xf32, #tpu.memory_space<vmem>>, vector<32x32xf32>
    %cst_77 = arith.constant dense<0.000000e+00> : vector<8x32xf32>
    %211 = tpu.matmul %209, %210, %cst_77 {dimension_numbers = #tpu.dot_dimension_numbers<[1], [0], [0], [1], [0, 0, 1, 1], [], []>} : vector<8x32xf32>, vector<32x32xf32>, vector<8x32xf32> -> vector<8x32xf32>
    %c0_78 = arith.constant 0 : index
    %c0_79 = arith.constant 0 : index
    %212 = vector.load %arg14[%c0_78, %c0_79] : memref<1x32xf32, #tpu.memory_space<vmem>>, vector<1x32xf32>
    %213 = vector.broadcast %212 : vector<1x32xf32> to vector<8x32xf32>
    %214 = arith.addf %211, %213 : vector<8x32xf32>
    %215 = arith.addf %214, %122 : vector<8x32xf32>
    %c0_80 = arith.constant 0 : index
    %c0_81 = arith.constant 0 : index
    %216 = vector.load %arg15[%c0_80, %c0_81] : memref<1x32xf32, #tpu.memory_space<vmem>>, vector<1x32xf32>
    %c0_82 = arith.constant 0 : index
    %c0_83 = arith.constant 0 : index
    %217 = vector.load %arg16[%c0_82, %c0_83] : memref<1x32xf32, #tpu.memory_space<vmem>>, vector<1x32xf32>
    %cst_84 = arith.constant dense<0.000000e+00> : vector<8xf32>
    %218 = vector.multi_reduction <add>, %215, %cst_84 [1] : vector<8x32xf32> to vector<8xf32>
    %219 = vector.shape_cast %218 : vector<8xf32> to vector<8x1xf32>
    %cst_85 = arith.constant 3.200000e+01 : f32
    %220 = vector.broadcast %cst_85 : f32 to vector<8x1xf32>
    %221 = arith.divf %219, %220 : vector<8x1xf32>
    %222 = vector.broadcast %221 : vector<8x1xf32> to vector<8x32xf32>
    %223 = arith.subf %215, %222 : vector<8x32xf32>
    %224 = arith.mulf %223, %223 : vector<8x32xf32>
    %cst_86 = arith.constant dense<0.000000e+00> : vector<8xf32>
    %225 = vector.multi_reduction <add>, %224, %cst_86 [1] : vector<8x32xf32> to vector<8xf32>
    %226 = vector.shape_cast %225 : vector<8xf32> to vector<8x1xf32>
    %cst_87 = arith.constant 3.200000e+01 : f32
    %227 = vector.broadcast %cst_87 : f32 to vector<8x1xf32>
    %228 = arith.divf %226, %227 : vector<8x1xf32>
    %229 = vector.broadcast %221 : vector<8x1xf32> to vector<8x32xf32>
    %230 = arith.subf %215, %229 : vector<8x32xf32>
    %cst_88 = arith.constant 9.99999996E-13 : f32
    %231 = vector.broadcast %cst_88 : f32 to vector<8x1xf32>
    %232 = arith.addf %228, %231 : vector<8x1xf32>
    %233 = math.rsqrt %232 : vector<8x1xf32>
    %234 = vector.broadcast %233 : vector<8x1xf32> to vector<8x32xf32>
    %235 = arith.mulf %230, %234 : vector<8x32xf32>
    %236 = vector.broadcast %216 : vector<1x32xf32> to vector<8x32xf32>
    %237 = arith.mulf %235, %236 : vector<8x32xf32>
    %238 = vector.broadcast %217 : vector<1x32xf32> to vector<8x32xf32>
    %239 = arith.addf %237, %238 : vector<8x32xf32>
    %c0_89 = arith.constant 0 : index
    %c0_90 = arith.constant 0 : index
    %240 = vector.load %arg17[%c0_89, %c0_90] : memref<32x64xf32, #tpu.memory_space<vmem>>, vector<32x64xf32>
    %cst_91 = arith.constant dense<0.000000e+00> : vector<8x64xf32>
    %241 = tpu.matmul %239, %240, %cst_91 {dimension_numbers = #tpu.dot_dimension_numbers<[1], [0], [0], [1], [0, 0, 1, 1], [], []>} : vector<8x32xf32>, vector<32x64xf32>, vector<8x64xf32> -> vector<8x64xf32>
    %c0_92 = arith.constant 0 : index
    %c0_93 = arith.constant 0 : index
    %242 = vector.load %arg18[%c0_92, %c0_93] : memref<1x64xf32, #tpu.memory_space<vmem>>, vector<1x64xf32>
    %243 = vector.broadcast %242 : vector<1x64xf32> to vector<8x64xf32>
    %244 = arith.addf %241, %243 : vector<8x64xf32>
    %245 = arith.mulf %244, %244 : vector<8x64xf32>
    %246 = arith.mulf %244, %245 : vector<8x64xf32>
    %cst_94 = arith.constant 4.471500e-02 : f32
    %247 = vector.broadcast %cst_94 : f32 to vector<8x64xf32>
    %248 = arith.mulf %247, %246 : vector<8x64xf32>
    %249 = arith.addf %244, %248 : vector<8x64xf32>
    %cst_95 = arith.constant 0.797884583 : f32
    %250 = vector.broadcast %cst_95 : f32 to vector<8x64xf32>
    %251 = arith.mulf %250, %249 : vector<8x64xf32>
    %252 = math.tanh %251 : vector<8x64xf32>
    %cst_96 = arith.constant 1.000000e+00 : f32
    %253 = vector.broadcast %cst_96 : f32 to vector<8x64xf32>
    %254 = arith.addf %253, %252 : vector<8x64xf32>
    %cst_97 = arith.constant 5.000000e-01 : f32
    %255 = vector.broadcast %cst_97 : f32 to vector<8x64xf32>
    %256 = arith.mulf %255, %254 : vector<8x64xf32>
    %257 = arith.mulf %244, %256 : vector<8x64xf32>
    %c0_98 = arith.constant 0 : index
    %c0_99 = arith.constant 0 : index
    %258 = vector.load %arg19[%c0_98, %c0_99] : memref<64x32xf32, #tpu.memory_space<vmem>>, vector<64x32xf32>
    %cst_100 = arith.constant dense<0.000000e+00> : vector<8x32xf32>
    %259 = tpu.matmul %257, %258, %cst_100 {dimension_numbers = #tpu.dot_dimension_numbers<[1], [0], [0], [1], [0, 0, 1, 1], [], []>} : vector<8x64xf32>, vector<64x32xf32>, vector<8x32xf32> -> vector<8x32xf32>
    %c0_101 = arith.constant 0 : index
    %c0_102 = arith.constant 0 : index
    %260 = vector.load %arg20[%c0_101, %c0_102] : memref<1x32xf32, #tpu.memory_space<vmem>>, vector<1x32xf32>
    %261 = vector.broadcast %260 : vector<1x32xf32> to vector<8x32xf32>
    %262 = arith.addf %259, %261 : vector<8x32xf32>
    %263 = arith.addf %262, %239 : vector<8x32xf32>
    %c0_103 = arith.constant 0 : index
    %c0_104 = arith.constant 0 : index
    %264 = vector.load %arg21[%c0_103, %c0_104] : memref<1x32xf32, #tpu.memory_space<vmem>>, vector<1x32xf32>
    %c0_105 = arith.constant 0 : index
    %c0_106 = arith.constant 0 : index
    %265 = vector.load %arg22[%c0_105, %c0_106] : memref<1x32xf32, #tpu.memory_space<vmem>>, vector<1x32xf32>
    %cst_107 = arith.constant dense<0.000000e+00> : vector<8xf32>
    %266 = vector.multi_reduction <add>, %263, %cst_107 [1] : vector<8x32xf32> to vector<8xf32>
    %267 = vector.shape_cast %266 : vector<8xf32> to vector<8x1xf32>
    %cst_108 = arith.constant 3.200000e+01 : f32
    %268 = vector.broadcast %cst_108 : f32 to vector<8x1xf32>
    %269 = arith.divf %267, %268 : vector<8x1xf32>
    %270 = vector.broadcast %269 : vector<8x1xf32> to vector<8x32xf32>
    %271 = arith.subf %263, %270 : vector<8x32xf32>
    %272 = arith.mulf %271, %271 : vector<8x32xf32>
    %cst_109 = arith.constant dense<0.000000e+00> : vector<8xf32>
    %273 = vector.multi_reduction <add>, %272, %cst_109 [1] : vector<8x32xf32> to vector<8xf32>
    %274 = vector.shape_cast %273 : vector<8xf32> to vector<8x1xf32>
    %cst_110 = arith.constant 3.200000e+01 : f32
    %275 = vector.broadcast %cst_110 : f32 to vector<8x1xf32>
    %276 = arith.divf %274, %275 : vector<8x1xf32>
    %277 = vector.broadcast %269 : vector<8x1xf32> to vector<8x32xf32>
    %278 = arith.subf %263, %277 : vector<8x32xf32>
    %cst_111 = arith.constant 9.99999996E-13 : f32
    %279 = vector.broadcast %cst_111 : f32 to vector<8x1xf32>
    %280 = arith.addf %276, %279 : vector<8x1xf32>
    %281 = math.rsqrt %280 : vector<8x1xf32>
    %282 = vector.broadcast %281 : vector<8x1xf32> to vector<8x32xf32>
    %283 = arith.mulf %278, %282 : vector<8x32xf32>
    %284 = vector.broadcast %264 : vector<1x32xf32> to vector<8x32xf32>
    %285 = arith.mulf %283, %284 : vector<8x32xf32>
    %286 = vector.broadcast %265 : vector<1x32xf32> to vector<8x32xf32>
    %287 = arith.addf %285, %286 : vector<8x32xf32>
    %c0_112 = arith.constant 0 : index
    %c0_113 = arith.constant 0 : index
    %c0_114 = arith.constant 0 : index
    %288 = vector.load %arg23[%c0_112, %c0_113, %c0_114] : memref<1x8x32xf32, #tpu.memory_space<vmem>>, vector<1x8x32xf32>
    %289 = vector.shape_cast %288 : vector<1x8x32xf32> to vector<8x32xf32>
    %290 = vector.shape_cast %287 : vector<8x32xf32> to vector<1x8x32xf32>
    tpu.vector_store %arg23[%c0_112, %c0_113, %c0_114], %290 {strides = array<i32>} : memref<1x8x32xf32, #tpu.memory_space<vmem>>, vector<1x8x32xf32>,
    return
  }
  func.func @transform_0(%arg0: i32) -> (i32, i32, i32) {
    %c0_i32 = arith.constant 0 : i32
    %c0_i32_0 = arith.constant 0 : i32
    %c0_i32_1 = arith.constant 0 : i32
    return %arg0, %c0_i32, %c0_i32_0 : i32, i32, i32
  }
  func.func @transform_1(%arg0: i32) -> (i32, i32, i32) {
    %c0_i32 = arith.constant 0 : i32
    %c0_i32_0 = arith.constant 0 : i32
    %c0_i32_1 = arith.constant 0 : i32
    return %arg0, %c0_i32, %c0_i32_0 : i32, i32, i32
  }
  func.func @transform_2(%arg0: i32) -> (i32, i32) {
    %c0_i32 = arith.constant 0 : i32
    %c0_i32_0 = arith.constant 0 : i32
    %c0_i32_1 = arith.constant 0 : i32
    return %c0_i32, %c0_i32_0 : i32, i32
  }
  func.func @transform_3(%arg0: i32) -> (i32, i32) {
    %c0_i32 = arith.constant 0 : i32
    %c0_i32_0 = arith.constant 0 : i32
    %c0_i32_1 = arith.constant 0 : i32
    return %c0_i32, %c0_i32_0 : i32, i32
  }
  func.func @transform_4(%arg0: i32) -> (i32, i32) {
    %c0_i32 = arith.constant 0 : i32
    %c0_i32_0 = arith.constant 0 : i32
    %c0_i32_1 = arith.constant 0 : i32
    return %c0_i32, %c0_i32_0 : i32, i32
  }
  func.func @transform_5(%arg0: i32) -> (i32, i32) {
    %c0_i32 = arith.constant 0 : i32
    %c0_i32_0 = arith.constant 0 : i32
    %c0_i32_1 = arith.constant 0 : i32
    return %c0_i32, %c0_i32_0 : i32, i32
  }
  func.func @transform_6(%arg0: i32) -> (i32, i32) {
    %c0_i32 = arith.constant 0 : i32
    %c0_i32_0 = arith.constant 0 : i32
    %c0_i32_1 = arith.constant 0 : i32
    return %c0_i32, %c0_i32_0 : i32, i32
  }
  func.func @transform_7(%arg0: i32) -> (i32, i32) {
    %c0_i32 = arith.constant 0 : i32
    %c0_i32_0 = arith.constant 0 : i32
    %c0_i32_1 = arith.constant 0 : i32
    return %c0_i32, %c0_i32_0 : i32, i32
  }
  func.func @transform_8(%arg0: i32) -> (i32, i32) {
    %c0_i32 = arith.constant 0 : i32
    %c0_i32_0 = arith.constant 0 : i32
    %c0_i32_1 = arith.constant 0 : i32
    return %c0_i32, %c0_i32_0 : i32, i32
  }
  func.func @transform_9(%arg0: i32) -> (i32, i32) {
    %c0_i32 = arith.constant 0 : i32
    %c0_i32_0 = arith.constant 0 : i32
    %c0_i32_1 = arith.constant 0 : i32
    return %c0_i32, %c0_i32_0 : i32, i32
  }
  func.func @transform_10(%arg0: i32) -> (i32, i32) {
    %c0_i32 = arith.constant 0 : i32
    %c0_i32_0 = arith.constant 0 : i32
    %c0_i32_1 = arith.constant 0 : i32
    return %c0_i32, %c0_i32_0 : i32, i32
  }
  func.func @transform_11(%arg0: i32) -> (i32, i32) {
    %c0_i32 = arith.constant 0 : i32
    %c0_i32_0 = arith.constant 0 : i32
    %c0_i32_1 = arith.constant 0 : i32
    return %c0_i32, %c0_i32_0 : i32, i32
  }
  func.func @transform_12(%arg0: i32) -> (i32, i32) {
    %c0_i32 = arith.constant 0 : i32
    %c0_i32_0 = arith.constant 0 : i32
    %c0_i32_1 = arith.constant 0 : i32
    return %c0_i32, %c0_i32_0 : i32, i32
  }
  func.func @transform_13(%arg0: i32) -> (i32, i32) {
    %c0_i32 = arith.constant 0 : i32
    %c0_i32_0 = arith.constant 0 : i32
    %c0_i32_1 = arith.constant 0 : i32
    return %c0_i32, %c0_i32_0 : i32, i32
  }
  func.func @transform_14(%arg0: i32) -> (i32, i32) {
    %c0_i32 = arith.constant 0 : i32
    %c0_i32_0 = arith.constant 0 : i32
    %c0_i32_1 = arith.constant 0 : i32
    return %c0_i32, %c0_i32_0 : i32, i32
  }
  func.func @transform_15(%arg0: i32) -> (i32, i32) {
    %c0_i32 = arith.constant 0 : i32
    %c0_i32_0 = arith.constant 0 : i32
    %c0_i32_1 = arith.constant 0 : i32
    return %c0_i32, %c0_i32_0 : i32, i32
  }
  func.func @transform_16(%arg0: i32) -> (i32, i32) {
    %c0_i32 = arith.constant 0 : i32
    %c0_i32_0 = arith.constant 0 : i32
    %c0_i32_1 = arith.constant 0 : i32
    return %c0_i32, %c0_i32_0 : i32, i32
  }
  func.func @transform_17(%arg0: i32) -> (i32, i32) {
    %c0_i32 = arith.constant 0 : i32
    %c0_i32_0 = arith.constant 0 : i32
    %c0_i32_1 = arith.constant 0 : i32
    return %c0_i32, %c0_i32_0 : i32, i32
  }
  func.func @transform_18(%arg0: i32) -> (i32, i32) {
    %c0_i32 = arith.constant 0 : i32
    %c0_i32_0 = arith.constant 0 : i32
    %c0_i32_1 = arith.constant 0 : i32
    return %c0_i32, %c0_i32_0 : i32, i32
  }
  func.func @transform_19(%arg0: i32) -> (i32, i32) {
    %c0_i32 = arith.constant 0 : i32
    %c0_i32_0 = arith.constant 0 : i32
    %c0_i32_1 = arith.constant 0 : i32
    return %c0_i32, %c0_i32_0 : i32, i32
  }
  func.func @transform_20(%arg0: i32) -> (i32, i32) {
    %c0_i32 = arith.constant 0 : i32
    %c0_i32_0 = arith.constant 0 : i32
    %c0_i32_1 = arith.constant 0 : i32
    return %c0_i32, %c0_i32_0 : i32, i32
  }
  func.func @transform_21(%arg0: i32) -> (i32, i32) {
    %c0_i32 = arith.constant 0 : i32
    %c0_i32_0 = arith.constant 0 : i32
    %c0_i32_1 = arith.constant 0 : i32
    return %c0_i32, %c0_i32_0 : i32, i32
  }
  func.func @transform_22(%arg0: i32) -> (i32, i32, i32) {
    %c0_i32 = arith.constant 0 : i32
    %c0_i32_0 = arith.constant 0 : i32
    %c0_i32_1 = arith.constant 0 : i32
    return %arg0, %c0_i32, %c0_i32_0 : i32, i32, i32
  }
}

</mosaic_0001>

<bundles_post_ra>
// kernel: transformer_decoder.7
= control target key start
LH: loop header
LB: loop body
LE: loop exit
PB: predicated region body
PF: predicated region fallthrough
CT: control target
= control target key end

     0   :  { %8 = vsyncpa [#allocation3], 0  ;;  %s605_s0 = inlined_call_operand.vmem [shape: f32[2,8,32], index: 0, kind: input, shape index: {}]   ;;  %s606_s1 = inlined_call_operand.vmem [shape: f32[32,128], index: 1, kind: input, shape index: {}]   ;;  %s607_s2 = inlined_call_operand.vmem [shape: f32[1,128], index: 2, kind: input, shape index: {}]   ;;  %s608_s3 = inlined_call_operand.hbm [shape: f32[2,8,128], index: 3, kind: output, shape index: {}]  }
   0x1   :  { %10 = vsyncpa [#allocation3 + $0x1], 0  ;;  %s490_s12 = smov 0   ;;  %s492_s13 = smov 0  }
   0x2   :  { %s494_s14 = smov 0   ;;  %s496_s15 = smov 0  }
   0x3 LB: > { %s511_s16 = sadd.s32 4294967295, %s464_s15   ;;  %s326_s17 = sadd.s32 4294967294, %s464_s15   ;;  %s464_s15 = sphi %s496_s15, %s614_s15   ;;  %s460_s14 = sphi %s494_s14, %s613_s14   ;;  %s456_s13 = sphi %s492_s13, %s612_s13   ;;  %s452_s12 = sphi %s490_s12, %s611_s12  }
   0x4   : > { %s515_s18 = sadd.s32 1, %s464_s15   ;;  %s91_s19 = sadd.s32 1, %s460_s14 }
   0x5   : > { %s88_s20 = ssub.s32 %s464_s15, %s515_s18  ;;  %p101_p0 = scmp.ne.s32.totalorder %s460_s14, %s456_s13 }
   0x6   : > { %p89_p1 = scmp.eq.s32.totalorder %s88_s20, 0  ;;  %p102_p2 = scmp.eq.s32.totalorder %s511_s16, 1 }
   0x7   : > { %p107_p3 = scmp.ne.s32.totalorder %s456_s13, %s452_s12  ;;  %p108_p4 = scmp.eq.s32.totalorder %s326_s17, 1 }
   0x8   : > { %s526_s21 = scalar_select %p89_p1, %s460_s14, %s91_s19  }
   0x9   : > { %p528_p5 = por %p102_p2, %p101_p0  ;;  %p532_p6 = por %p108_p4, %p107_p3 }
   0xa   : > { %p329_p7 = scmp.ge.s32.totalorder %s464_s15, 1  ;;  %p139_p8 = scmp.lt.s32.totalorder %s464_s15, 3 }
   0xc   : > { %p140_p9 = pnand %p329_p7, %p139_p8 }
   0xd   : > { %v167_v0 = vld [vmem:[%s606_s1] sm:$0xff] (!%p140_p9)  ;;  %v168_v1 = vld [vmem:[%s606_s1 + $0x8] sm:$0xff] (!%p140_p9)  ;;  %v169_v2 = vld [vmem:[%s606_s1 + $0x10] sm:$0xff] (!%p140_p9)  ;;  %v466_v3 = vmov (!%p140_p9), 0.0|0.0   ;;  %vm467_vm0 = vmmov (!%p140_p9), 0   ;;  %v468_v6 = vmov (!%p140_p9), 0.0  }
   0xe   : > { %143 = sbr.rel (%p140_p9) target bundleno = 254 (0xfe), region = 32  ;;  %354 = vmatprep.subr.bf16.mxu0 (!%p140_p9), %v466_v3  ;;  %v355_v4 = vpack.c.bf16 (!%p140_p9), %v168_v1, %v167_v0  ;;  %v170_v5 = vld [vmem:[%s606_s1 + $0x18] sm:$0xff] (!%p140_p9)  ;;  %351 = vmatprep.mubr.msk.f32.mxu0 (!%p140_p9), %vm467_vm0, %v468_v6  ;;  %p162_p10 = scmp.lt.s32.totalorder (!%p140_p9), %s511_s16, 1  ;;  %vm178_vm1 = vcmask (!%p140_p9), 261120   ;;  %v332_v9 = vld [vmem:[%s607_s2] ss:$0 sm:$0xff] (!%p140_p9) }
   0xf   : > { %v358_v7 = vpack.c.bf16 (!%p140_p9), %v170_v5, %v169_v2  ;;  %s159_s10 = sand.u32 (!%p140_p9), 1, %s456_s13   ;;  %s335_s20 = sshll.u32 (!%p140_p9), %s511_s16, 7 }
  0x10   : > { %356 = vmatpush3.bf16.msra.mxu0 (!%p140_p9), %v355_v4  ;;  %s330_s11 = sshll.u32 (!%p140_p9), %s159_s10, 3  ;;  %s563_s28 = scalar_lea.hbm (!%p140_p9), %s608_s3, %s335_s20 }
  0x11   : > { %357 = vmatprep.subr.bf16.mxu0 (!%p140_p9), %v466_v3  ;;  %s161_s24 = scalar_lea.vmem (!%p140_p9), [#allocation2], %s330_s11  ;;  %s254_s29 = scalar_lea.sflag (!%p140_p9), [#allocation3], %s159_s10 }
  0x12   : > { %s267_s25 = sshll.u32 (!%p140_p9), %s161_s24, 4  ;;  %s565_s25 = int_to_ptr.vmem [resolvable:$true] %s267_s25 }
  0x13   : > { %s402_s30 = scalar_lea.vmem (!%p140_p9), %s565_s25, 128 }
  0x14   : > { %359 = vmatpush3.bf16.msra.mxu0 (!%p140_p9), %v358_v7  ;;  %p403_p11 = scmp.ne.s32.totalorder (!%p140_p9), %s565_s25, %s402_s30 }
  0x15   : > { %s163_s5 = scalar_select %p162_p10, %s511_s16, 1 }
  0x16   : > { %p404_p12 = pnand %p403_p11, %p528_p5  ;;  %s469_s16 = smov [#allocation2]  }
  0x17   : > { %s331_s6 = sshll.u32 %s163_s5, 3  ;;  %s406_s4 = sshll.u32 %s469_s16, 4  ;;  %s407_s4 = int_to_ptr.vmem [resolvable:$false] %s406_s4 }
  0x18   : > { %s165_s9 = scalar_lea.vmem %s605_s0, %s331_s6  ;;  %p405_p13 = pneg %p404_p12 }
  0x19   : > { %v166_v8 = vld [vmem:[%s165_s9] sm:$0xff]  ;;  %s408_s5 = scalar_lea.vmem %s407_s4, 256  ;;  %p409_p0 = scmp.lt.s32.totalorder %s565_s25, %s407_s4 }
  0x1a   : > { %352 = vmatmul.mubr.msk.f32.vlgmr.msra.gmra.mrb[0].mxu0 %vm178_vm1, %v166_v8  ;;  %p410_p1 = scmp.lt.s32.totalorder %s408_s5, %s402_s30 }
  0x1c   : > { %p411_p2 = por %p410_p1, %p409_p0 }
  0x1e   : > { %p412_p3 = pnand %p411_p2, %p405_p13 }
  0xed   : > { %v248_v10 = vpop.f32.mrb[0].mxu0 }
  0xee   : > { %v249_v11 = vadd.f32 %v332_v9, %v248_v10  ;;  %v353_v12 = vpop.f32.mrb[1].mxu0 }
  0xf0   : > { %252 = vst [vmem:[%s161_s24] sm:$0xff] %v249_v11 }
  0xf1   : > { %415 = shalt.err (!%p412_p3)
}
  0xf2   : > { %s416_s6 = scalar_lea.hbm %s563_s28, 128  ;;  %s420_s9 = scalar_lea.hbm %s608_s3, 256 }
  0xf3   : > { %p417_p4 = scmp.ne.s32.totalorder %s563_s28, %s416_s6  ;;  %p421_p9 = scmp.lt.u32.totalorder %s563_s28, %s608_s3 }
  0xf4   : > { %p422_p10 = scmp.lt.u32.totalorder %s420_s9, %s416_s6  ;;  %p424_p12 = scmp.lt.u32.totalorder %s416_s6, %s563_s28 }
  0xf5   : > { %p418_p7 = pnand %p417_p4, %p528_p5 }
  0xf6   : > { %p423_p11 = por %p422_p10, %p421_p9 }
  0xf7   : > { %p419_p8 = pneg %p418_p7 }
  0xf8   : > { %p425_p13 = por %p424_p12, %p423_p11 }
  0xfa   : > { %p426_p0 = pnand %p425_p13, %p419_p8 }
  0xfc   : > { %429 = shalt.err (!%p426_p0)
}
  0xfd   : > { %360 = dma.vmem_to_hbm [thread:$0]  (%p528_p5), %s565_s25, 128, %s563_s28, %s254_s29  }
  0xfe PF: > { %p366_p1 = scmp.ge.s32.totalorder %s464_s15, 2  ;;  %s279_s17 = sand.u32 1, %s452_s12  }
  0xff   : > { %s280_s19 = scalar_lea.sflag [#allocation3], %s279_s17 }
 0x100   : > { %p363_p2 = pnand %p366_p1, %p532_p6 }
 0x102   : > { %447 = dma.done.wait (!%p363_p2), %s280_s19, 128  }
 0x103   : > { %449 = vsyncadd (!%p363_p2), %s280_s19, 4294967168  ;;  %p13_p3 = scmp.ge.s32.totalorder %s515_s18, 4   ;;  %s611_s12 = smov %s456_s13 }
 0x104   : > { %s612_s13 = smov %s460_s14  ;;  %s613_s14 = smov %s526_s21 }
 0x105   : > { %s614_s15 = smov %s515_s18  ;;  %15 = sbr.rel (!%p13_p3) target bundleno = 3 (0x3), region = 67 }
 0x10c   :  { %285 = vsyncpa [#allocation3], 1 }
 0x10d   :  { %287 = vsyncpa [#allocation3 + $0x1], 1 }

// kernel: transformer_decoder.4
= control target key start
LH: loop header
LB: loop body
LE: loop exit
PB: predicated region body
PF: predicated region fallthrough
CT: control target
= control target key end

     0   :  { %s301_s12 = smov 0   ;;  %s327_s0 = inlined_call_operand.vmem [shape: f32[2,8,32], index: 0, kind: input, shape index: {}]   ;;  %s328_s1 = inlined_call_operand.vmem [shape: f32[1,32], index: 1, kind: input, shape index: {}]   ;;  %s329_s2 = inlined_call_operand.vmem [shape: f32[1,32], index: 2, kind: input, shape index: {}]   ;;  %s330_s3 = inlined_call_operand.vmem [shape: f32[2,8,32], index: 3, kind: output, shape index: {}]  }
   0x1 LB: > { %s252_s13 = sadd.s32 4294967295, %s279_s12   ;;  %p256_p0 = scmp.ge.s32.totalorder %s279_s12, 1  ;;  %s279_s12 = sphi %s301_s12, %s13_s12  }
   0x2   : > { %p136_p1 = scmp.lt.s32.totalorder %s279_s12, 3 }
   0x4   : > { %p137_p2 = pnand %p256_p0, %p136_p1 }
   0x5   : > { %p158_p3 = scmp.lt.s32.totalorder (!%p137_p2), %s252_s13, 1  ;;  %vm169_vm0 = vcmask (!%p137_p2), 261120   ;;  %v259_v11 = vld [vmem:[%s328_s1] ss:$0 sm:$0xff] (!%p137_p2) }
   0x6   : > { %140 = sbr.rel (%p137_p2) target bundleno = 331 (0x14b), region = 32  ;;  %v260_v13 = vld [vmem:[%s329_s2] ss:$0 sm:$0xff] (!%p137_p2) }
   0xd   : > { %s332_s13 = smov (!%p158_p3, %s252_s13), 1 }
   0xe   : > { %s257_s14 = sshll.u32 %s332_s13, 3 }
   0xf   : > { %s161_s17 = scalar_lea.vmem %s327_s0, %s257_s14  ;;  %s165_s24 = scalar_lea.vmem %s330_s3, %s257_s14 }
  0x10   : > { %v166_v0 = vld [vmem:[%s161_s17] sm:$0xff] }
  0x11   : > { %v170_v1 = vsel %vm169_vm0, %v166_v0, 0.0 }
  0x12   : > { %171 = vadd.xlane.f32.xlu0 %v170_v1 }
  0x9f   : > { %v172_v2 = vpop.xlane.xlu0 %171 }
  0xa0   : > { %v174_v3 = vmul.f32 0.03125, %v172_v2 }
  0xa2   : > { %v175_v4 = vsub.f32 %v166_v0, %v174_v3 }
  0xa4   : > { %v176_v5 = vmul.f32 %v175_v4, %v175_v4 }
  0xa6   : > { %v177_v6 = vsel %vm169_vm0, %v176_v5, 0.0 }
  0xa7   : > { %178 = vadd.xlane.f32.xlu0 %v177_v6 }
 0x134   : > { %v179_v7 = vpop.xlane.xlu0 %178 }
 0x135   : > { %v180_v8 = vmul.f32 0.03125, %v179_v7 }
 0x137   : > { %v181_v9 = vadd.f32 1e-12, %v180_v8 }
 0x139   : > { %271 = vrsqrt.f32 %v181_v9 }
 0x143   : > { %v272_v10 = vpop.eup %271 }
 0x144   : > { %v183_v12 = vmul.f32 %v272_v10, %v175_v4 }
 0x146   : > { %v190_v14 = vmul.f32 %v259_v11, %v183_v12 }
 0x148   : > { %v197_v15 = vadd.f32 %v260_v13, %v190_v14 }
 0x14a   : > { %198 = vst.msk [vmem:[%s165_s24] sm:$0xff] %vm169_vm0, %v197_v15 }
 0x14b PF: > { %s13_s12 = sadd.s32 1, %s279_s12  }
 0x14c   : > { %p10_p4 = scmp.ge.s32.totalorder %s13_s12, 4  }
 0x14e   :  { %12 = sbr.rel (!%p10_p4) target bundleno = 1 (0x1), region = 62 }

// kernel: transformer_decoder.5
= control target key start
LH: loop header
LB: loop body
LE: loop exit
PB: predicated region body
PF: predicated region fallthrough
CT: control target
= control target key end

     0   :  { %s3723_s0 = inlined_call_operand.vmem [shape: f32[2,8,32], index: 0, kind: input, shape index: {}]   ;;  %s3724_s1 = inlined_call_operand.vmem [shape: f32[2,8,32], index: 1, kind: input, shape index: {}]   ;;  %s3725_s2 = inlined_call_operand.vmem [shape: f32[32,96], index: 2, kind: input, shape index: {}]   ;;  %s3726_s3 = inlined_call_operand.vmem [shape: f32[1,96], index: 3, kind: input, shape index: {}]   ;;  %s3727_s4 = inlined_call_operand.vmem [shape: f32[32,32], index: 4, kind: input, shape index: {}]   ;;  %s3728_s5 = inlined_call_operand.vmem [shape: f32[1,32], index: 5, kind: input, shape index: {}]   ;;  %s3729_s6 = inlined_call_operand.vmem [shape: f32[1,32], index: 6, kind: input, shape index: {}]   ;;  %s3730_s7 = inlined_call_operand.vmem [shape: f32[1,32], index: 7, kind: input, shape index: {}]   ;;  %s3731_s8 = inlined_call_operand.vmem [shape: f32[32,32], index: 8, kind: input, shape index: {}]   ;;  %s3732_s9 = inlined_call_operand.vmem [shape: f32[1,32], index: 9, kind: input, shape index: {}]   ;;  %s3733_s10 = inlined_call_operand.vmem [shape: f32[32,64], index: 10, kind: input, shape index: {}]   ;;  %s3734_s11 = inlined_call_operand.vmem [shape: f32[1,64], index: 11, kind: input, shape index: {}]   ;;  %s3735_s12 = inlined_call_operand.vmem [shape: f32[32,32], index: 12, kind: input, shape index: {}]   ;;  %s3736_s13 = inlined_call_operand.vmem [shape: f32[1,32], index: 13, kind: input, shape index: {}]   ;;  %s3737_s14 = inlined_call_operand.vmem [shape: f32[1,32], index: 14, kind: input, shape index: {}]   ;;  %s3738_s15 = inlined_call_operand.vmem [shape: f32[1,32], index: 15, kind: input, shape index: {}]   ;;  %s3739_s16 = inlined_call_operand.vmem [shape: f32[32,64], index: 16, kind: input, shape index: {}]   ;;  %s3740_s17 = inlined_call_operand.vmem [shape: f32[1,64], index: 17, kind: input, shape index: {}]   ;;  %s3741_s18 = inlined_call_operand.vmem [shape: f32[64,32], index: 18, kind: input, shape index: {}]   ;;  %s3742_s19 = inlined_call_operand.vmem [shape: f32[1,32], index: 19, kind: input, shape index: {}]   ;;  %s3743_s20 = inlined_call_operand.vmem [shape: f32[1,32], index: 20, kind: input, shape index: {}]   ;;  %s3744_s21 = inlined_call_operand.vmem [shape: f32[1,32], index: 21, kind: input, shape index: {}]   ;;  %s3745_s22 = inlined_call_operand.vmem [shape: f32[2,8,32], index: 22, kind: output, shape index: {}]  }
   0x1   :  { %3759 = sst [smem:[#allocation2_spill]] %s3723_s0 }
   0x2   :  { %3760 = sst [smem:[#allocation3_spill]] %s3724_s1 }
   0x3   :  { %3761 = sst [smem:[#allocation4_spill]] %s3725_s2 }
   0x4   :  { %3762 = sst [smem:[#allocation5_spill]] %s3726_s3  ;;  %s3371_s3 = smov 0  }
   0x5   :  { %3763 = sst [smem:[#allocation6_spill]] %s3727_s4 }
   0x6   :  { %3764 = sst [smem:[#allocation7_spill]] %s3728_s5 }
   0x7   :  { %3765 = sst [smem:[#allocation8_spill]] %s3729_s6 }
   0x8 LB: > { %s2826_s28 = sadd.s32 4294967295, %s3236_s3   ;;  %p2830_p0 = scmp.ge.s32.totalorder %s3236_s3, 1  ;;  %s3236_s3 = sphi %s3371_s3, %s32_s3  }
   0x9   : > { %p620_p1 = scmp.lt.s32.totalorder %s3236_s3, 3 }
   0xb   : > { %p621_p2 = pnand %p2830_p0, %p620_p1 }
   0xc   : > { %s3766_s4 = sld [smem:[#allocation4_spill]] (!%p621_p2)  ;;  %v3238_v3 = vmov (!%p621_p2), 0.0|0.0   ;;  %vm3239_vm0 = vmmov (!%p621_p2), 0   ;;  %v3240_v6 = vmov (!%p621_p2), 0.0   ;;  %p684_p3 = scmp.lt.s32.totalorder (!%p621_p2), %s2826_s28, 1  ;;  %vm708_vm1 = vcmask (!%p621_p2), 261120  }
   0xd   : > { %624 = sbr.rel (%p621_p2) target bundleno = 4297 (0x10c9), region = 108  ;;  %3116 = vmatprep.subr.bf16.mxu1 (!%p621_p2), %v3238_v3  ;;  %2959 = vmatprep.mubr.msk.f32.mxu1 (!%p621_p2), %vm3239_vm0, %v3240_v6  ;;  %s3767_s27 = sld [smem:[#allocation2_spill]] (!%p621_p2)  ;;  %vm791_vm2 = vcmask (!%p621_p2), 64512   ;;  %v782_v20 = vlaneseq (!%p621_p2)  ;;  %v3248_v24 = vmov (!%p621_p2), -1e+09   ;;  %vm1469_vm4 = vcmask (!%p621_p2), 130048  }
   0xe   : > { %2972 = vmatprep.subr.mxu0 (!%p621_p2), %v3240_v6  ;;  %2974 = vmatprep.mubr.msk.f32.mxu0 (!%p621_p2), %vm3239_vm0, %v3240_v6  ;;  %s3768_s0 = sld [smem:[#allocation5_spill]] (!%p621_p2)  ;;  %s3241_s23 = smov (!%p621_p2), 120   ;;  %vm1471_vm5 = vcmask (!%p621_p2), 195584   ;;  %vm2656_vm6 = vcmask (!%p621_p2), 523264  }
   0xf   : > { %s3754_s1 = smov (!%p621_p2), 96   ;;  %s3750_s5 = smov (!%p621_p2), 80   ;;  %v783_v21 = vshrl.u32 (!%p621_p2), %v782_v20, 7  ;;  %v785_v22 = vand.u32 (!%p621_p2), 127, %v782_v20 }
  0x10   : > { %s3748_s24 = smov (!%p621_p2), 88   ;;  %s3749_s6 = smov (!%p621_p2), 72  }
  0x11   : > { %s3757_s26 = smov (!%p621_p2), 112   ;;  %s3755_s2 = smov (!%p621_p2), 104   ;;  %vm786_vm3 = vcmp.ge.s32.totalorder (!%p621_p2), %v783_v21, %v785_v22 }
  0x12   : > { %v697_v0 = vld [vmem:[%s3766_s4] sm:$0xff] (!%p621_p2)  ;;  %v698_v1 = vld [vmem:[%s3766_s4 + $0x8] sm:$0xff] (!%p621_p2)  ;;  %v699_v2 = vld [vmem:[%s3766_s4 + $0x10] sm:$0xff] (!%p621_p2)  ;;  %v787_v25 = vsel (!%p621_p2), %vm786_vm3, 0.0, %v3248_v24  ;;  %s3251_s30 = smov (!%p621_p2), 48  }
  0x13   : > { %v3117_v4 = vpack.c.bf16 (!%p621_p2), %v698_v1, %v697_v0  ;;  %v700_v5 = vld [vmem:[%s3766_s4 + $0x18] sm:$0xff] (!%p621_p2) }
  0x14   : > { %v3120_v7 = vpack.c.bf16 %v700_v5, %v699_v2  ;;  %s3783_s28 = smov (!%p684_p3, %s2826_s28), 1  ;;  %v2834_v9 = vld [vmem:[%s3768_s0] ss:$0 sm:$0xff]  ;;  %s3770_s0 = sld [smem:[#allocation7_spill]] }
  0x15   : > { %3118 = vmatpush3.bf16.msra.mxu1 %v3117_v4  ;;  %s3398_s25 = sshll.u32 %s3783_s28, 3  ;;  %s3252_s28 = smov 40  }
  0x16   : > { %3119 = vmatprep.subr.bf16.mxu1 %v3238_v3  ;;  %s687_s29 = scalar_lea.vmem %s3767_s27, %s3398_s25  ;;  %s3249_s27 = smov 56  }
  0x17   : > { %v3404_v8 = vld [vmem:[%s687_s29] sm:$0xff]  ;;  %s3250_s29 = smov 64  }
  0x19   : > { %3121 = vmatpush3.bf16.msra.mxu1 %v3120_v7 }
  0x1a   : > { %2962 = vmatprep.subr.mxu1 %v3240_v6 }
  0x1c   : > { %2960 = vmatmul.mubr.msk.f32.vlgmr.msra.gmra.mrb[0].mxu1 %vm708_vm1, %v3404_v8 }
  0x1d   : > { %2964 = vmatprep.mubr.msk.f32.mxu1 %vm3239_vm0, %v3240_v6 }
  0xef   : > { %v778_v10 = vpop.f32.mrb[0].mxu1 }
  0xf0   : > { %v3414_v11 = vadd.f32 %v2834_v9, %v778_v10  ;;  %v2961_v12 = vpop.f32.mrb[1].mxu1 }
  0xf2   : > { %955 = vrot.lane.b32.xlu1 %v3414_v11, %s3241_s23  ;;  %789 = vrot.lane.b32.xlu0 %v3414_v11, %s3754_s1 }
  0xf6   : > { %1124 = vrot.lane.b32.xlu1 %v3414_v11, %s3750_s5  ;;  %957 = vrot.lane.b32.xlu0 %v3414_v11, %s3748_s24  ;;  %s3753_s24 = smov 8   ;;  %s3772_s5 = sld [smem:[#allocation8_spill]] }
  0xfa   : > { %1291 = vrot.lane.b32.xlu1 %v3414_v11, %s3749_s6  ;;  %1122 = vrot.lane.b32.xlu0 %v3414_v11, %s3757_s26  ;;  %s3778_s6 = smov 88  }
  0xfe   : > { %1289 = vrot.lane.b32.xlu0 %v3414_v11, %s3755_s2  ;;  %s3771_s2 = sld [smem:[#allocation3_spill]] }
 0x104   : > { %s691_s26 = scalar_lea.vmem %s3771_s2, %s3398_s25 }
 0x164   : > { %v956_v13 = vpop.permute.xlu1 %955  ;;  %v790_v14 = vpop.permute.xlu0 %789 }
 0x165   : > { %2963 = vmatpush3.xpose.msk.msra.mxu1 %vm791_vm2, %v790_v14 }
 0x166   : > { %2967 = vmatprep.subr.mxu1 %v3240_v6 }
 0x168   : > { %2965 = vmatmul.mubr.msk.f32.vlgmr.msra.gmra.mrb[2].mxu1 %vm791_vm2, %v3414_v11  ;;  %v958_v15 = vpop.permute.xlu0 %957  ;;  %v1125_v16 = vpop.permute.xlu1 %1124 }
 0x169   : > { %2973 = vmatpush3.xpose.msk.msra.mxu0 %vm791_vm2, %v958_v15  ;;  %2969 = vmatprep.mubr.msk.f32.mxu1 %vm3239_vm0, %v3240_v6 }
 0x16a   : > { %2982 = vmatprep.subr.mxu0 %v3240_v6 }
 0x16c   : > { %2975 = vmatmul.mubr.msk.f32.vlgmr.msra.gmra.mrb[0].mxu0 %vm791_vm2, %v956_v13  ;;  %v1123_v17 = vpop.permute.xlu0 %1122  ;;  %v1292_v18 = vpop.permute.xlu1 %1291 }
 0x16d   : > { %2983 = vmatpush3.xpose.msk.msra.mxu0 %vm791_vm2, %v1125_v16  ;;  %2984 = vmatprep.mubr.msk.f32.mxu0 %vm3239_vm0, %v3240_v6 }
 0x16e   : > { %2992 = vmatprep.subr.mxu0 %v3240_v6 }
 0x170   : > { %2985 = vmatmul.mubr.msk.f32.vlgmr.msra.gmra.mrb[2].mxu0 %vm791_vm2, %v1123_v17  ;;  %v1290_v19 = vpop.permute.xlu0 %1289 }
 0x171   : > { %2993 = vmatpush3.xpose.msk.msra.mxu0 %vm791_vm2, %v1292_v18  ;;  %2994 = vmatprep.mubr.msk.f32.mxu0 %vm3239_vm0, %v3240_v6 }
 0x172   : > { %3122 = vmatprep.subr.bf16.mxu0 %v3238_v3 }
 0x174   : > { %2995 = vmatmul.mubr.msk.f32.vlgmr.msra.gmra.mrb[4].mxu0 %vm791_vm2, %v1290_v19 }
 0x175   : > { %3010 = vmatprep.mubr.msk.f32.mxu0 %vm3239_vm0, %v3240_v6 }
 0x23b   : > { %v862_v23 = vpop.f32.mrb[2].mxu1 }
 0x23c   : > { %v866_v26 = vmul.f32 0.35355338, %v862_v23  ;;  %v2966_v27 = vpop.f32.mrb[3].mxu1 }
 0x23e   : > { %v867_v28 = vadd.f32 %v866_v26, %v787_v25 }
 0x23f   : > { %v1029_v29 = vpop.f32.mrb[0].mxu0 }
 0x240   : > { %v1033_v30 = vmul.f32 0.35355338, %v1029_v29  ;;  %v2976_v31 = vpop.f32.mrb[1].mxu0  ;;  %v868_v32 = vsel %vm791_vm2, %v867_v28, -inf }
 0x241   : > { %869 = vmax.xlane.f32.xlu1 %v868_v32 }
 0x242   : > { %v1034_v33 = vadd.f32 %v1033_v30, %v787_v25 }
 0x243   : > { %v1196_v34 = vpop.f32.mrb[2].mxu0 }
 0x244   : > { %v1200_v35 = vmul.f32 0.35355338, %v1196_v34  ;;  %v2986_v36 = vpop.f32.mrb[3].mxu0  ;;  %v1035_v37 = vsel %vm791_vm2, %v1034_v33, -inf }
 0x245   : > { %1036 = vmax.xlane.f32.xlu0 %v1035_v37 }
 0x246   : > { %v1201_v38 = vadd.f32 %v1200_v35, %v787_v25 }
 0x247   : > { %v1363_v39 = vpop.f32.mrb[4].mxu0 }
 0x248   : > { %v1367_v40 = vmul.f32 0.35355338, %v1363_v39  ;;  %v2996_v41 = vpop.f32.mrb[5].mxu0  ;;  %v1202_v42 = vsel %vm791_vm2, %v1201_v38, -inf }
 0x249   : > { %1203 = vmax.xlane.f32.xlu0 %v1202_v42 }
 0x24a   : > { %v1368_v43 = vadd.f32 %v1367_v40, %v787_v25  ;;  %v2848_v40 = vld [vmem:[%s3770_s0] ss:$0 sm:$0xff] }
 0x24c   : > { %v1369_v44 = vsel %vm791_vm2, %v1368_v43, -inf }
 0x24d   : > { %1370 = vmax.xlane.f32.xlu1 %v1369_v44 }
 0x25e   : > { %1046 = vrot.lane.b32.xlu1 %v3414_v11, %s3249_s27  ;;  %s3776_s27 = smov 80  }
 0x2ce   : > { %v870_v45 = vpop.xlane.xlu1 %869 }
 0x2cf   : > { %v871_v46 = vsub.f32 %v867_v28, %v870_v45 }
 0x2d1   : > { %v872_v47 = vmul.f32 1.442695, %v871_v46 }
 0x2d2   : > { %v1037_v48 = vpop.xlane.xlu0 %1036 }
 0x2d3   : > { %3190 = vpow2.f32 %v872_v47  ;;  %v1038_v49 = vsub.f32 %v1034_v33, %v1037_v48 }
 0x2d5   : > { %v1039_v50 = vmul.f32 1.442695, %v1038_v49 }
 0x2d6   : > { %v1204_v60 = vpop.xlane.xlu0 %1203 }
 0x2d7   : > { %3192 = vpow2.f32 %v1039_v50  ;;  %v1205_v61 = vsub.f32 %v1201_v38, %v1204_v60  ;;  %v1591_v60 = vld [vmem:[%s3731_s8 + $0x10] sm:$0xff] }
 0x2d9   : > { %v1206_v62 = vmul.f32 1.442695, %v1205_v61  ;;  %v1592_v61 = vld [vmem:[%s3731_s8 + $0x18] sm:$0xff] }
 0x2da   : > { %v1371_v51 = vpop.xlane.xlu1 %1370 }
 0x2db   : > { %v1372_v52 = vsub.f32 %v1368_v43, %v1371_v51  ;;  %v1673_v51 = vld [vmem:[%s3733_s10] sm:$0xff] }
 0x2dd   : > { %v3191_v53 = vpop.eup %3190  ;;  %v1373_v54 = vmul.f32 1.442695, %v1372_v52  ;;  %v1674_v52 = vld [vmem:[%s3733_s10 + $0x8] sm:$0xff] }
 0x2de   : > { %v874_v55 = vsel %vm791_vm2, %v3191_v53, 0.0  ;;  %v1047_v1 = vpop.permute.xlu1 %1046 }
 0x2df   : > { %3194 = vpow2.f32 %v1373_v54  ;;  %875 = vadd.xlane.f32.xlu0 %v874_v55  ;;  %v1676_v54 = vld [vmem:[%s3733_s10 + $0x18] sm:$0xff] }
 0x2e0   : > { %3196 = vpow2.f32 %v1206_v62  ;;  %v3132_v62 = vpack.c.bf16 %v1592_v61, %v1591_v60 }
 0x2e1   : > { %v3193_v56 = vpop.eup %3192 }
 0x2e2   : > { %v1041_v57 = vsel %vm791_vm2, %v3193_v56, 0.0 }
 0x2e3   : > { %1042 = vadd.xlane.f32.xlu1 %v1041_v57  ;;  %v1589_v57 = vld [vmem:[%s3731_s8] sm:$0xff] }
 0x2e9   : > { %v3195_v58 = vpop.eup %3194 }
 0x2ea   : > { %v1375_v59 = vsel %vm791_vm2, %v3195_v58, 0.0  ;;  %v3197_v63 = vpop.eup %3196 }
 0x2eb   : > { %1376 = vadd.xlane.f32.xlu1 %v1375_v59  ;;  %v1208_v0 = vsel %vm791_vm2, %v3197_v63, 0.0 }
 0x2f5   : > { %879 = vrot.lane.b32.xlu0 %v3414_v11, %s3250_s29  ;;  %s3769_s29 = sld [smem:[#allocation6_spill]] }
 0x2fb   : > { %v1473_v20 = vld [vmem:[%s3769_s29] sm:$0xff]  ;;  %v1474_v21 = vld [vmem:[%s3769_s29 + $0x8] sm:$0xff]  ;;  %v1475_v27 = vld [vmem:[%s3769_s29 + $0x10] sm:$0xff] }
 0x2fc   : > { %1213 = vrot.lane.b32.xlu1 %v3414_v11, %s3251_s30  ;;  %v3123_v22 = vpack.c.bf16 %v1474_v21, %v1473_v20  ;;  %v1476_v28 = vld [vmem:[%s3769_s29 + $0x18] sm:$0xff]  ;;  %s3752_s30 = smov 16  }
 0x2fd   : > { %v3126_v29 = vpack.c.bf16 %v1476_v28, %v1475_v27 }
 0x2fe   : > { %3124 = vmatpush3.bf16.msra.mxu0 %v3123_v22 }
 0x2ff   : > { %3125 = vmatprep.subr.bf16.mxu0 %v3238_v3 }
 0x302   : > { %3127 = vmatpush3.bf16.msra.mxu0 %v3126_v29 }
 0x303   : > { %3134 = vmatprep.subr.bf16.mxu0 %v3238_v3 }
 0x314   : > { %1209 = vadd.xlane.f32.xlu0 %v1208_v0 }
 0x32a   : > { %1380 = vrot.lane.b32.xlu0 %v3414_v11, %s3252_s28  ;;  %s3751_s28 = smov 24  }
 0x36c   : > { %v876_v2 = vpop.xlane.xlu0 %875 }
 0x36d   : > { %3198 = vrcp.f32 %v876_v2 }
 0x370   : > { %v880_v4 = vpop.permute.xlu0 %879  ;;  %v1043_v5 = vpop.xlane.xlu1 %1042 }
 0x371   : > { %3200 = vrcp.f32 %v1043_v5  ;;  %2968 = vmatpush3.msra.mxu1 %v880_v4  ;;  %v2850_v4 = vld [vmem:[%s3772_s5] ss:$0 sm:$0xff]  ;;  %s3777_s5 = smov 72  }
 0x372   : > { %2977 = vmatprep.subr.mxu1 %v3240_v6 }
 0x377   : > { %v3199_v7 = vpop.eup %3198 }
 0x378   : > { %v878_v9 = vmul.f32 %v3199_v7, %v3191_v53  ;;  %v1377_v10 = vpop.xlane.xlu1 %1376  ;;  %v1675_v53 = vld [vmem:[%s3733_s10 + $0x10] sm:$0xff]  ;;  %v2851_v7 = vld [vmem:[%s3730_s7] ss:$0 sm:$0xff] }
 0x379   : > { %v3138_v55 = vpack.c.bf16 %v1676_v54, %v1675_v53 }
 0x37a   : > { %2970 = vmatmul.mubr.msk.f32.vlgmr.msra.gmra.mrb[4].mxu1 %vm791_vm2, %v878_v9 }
 0x37b   : > { %v3201_v12 = vpop.eup %3200  ;;  %2978 = vmatpush3.msra.mxu1 %v1047_v1  ;;  %2979 = vmatprep.mubr.msk.f32.mxu1 %vm3239_vm0, %v3240_v6 }
 0x37c   : > { %v1045_v11 = vmul.f32 %v3201_v12, %v3193_v56  ;;  %v1214_v13 = vpop.permute.xlu1 %1213  ;;  %2987 = vmatprep.subr.mxu1 %v3240_v6  ;;  %v1588_v56 = vld [vmem:[%s691_s26] sm:$0xff]  ;;  %s3774_s26 = smov 104  }
 0x37d   : > { %v2854_v12 = vld [vmem:[%s3734_s11] ss:$0 sm:$0xff] }
 0x37e   : > { %2980 = vmatmul.mubr.msk.f32.vlgmr.msra.gmra.mrb[6].mxu1 %vm791_vm2, %v1045_v11 }
 0x37f   : > { %2988 = vmatpush3.msra.mxu1 %v1214_v13  ;;  %2989 = vmatprep.mubr.msk.f32.mxu1 %vm3239_vm0, %v3240_v6 }
 0x380   : > { %2997 = vmatprep.subr.mxu1 %v3240_v6 }
 0x3a1   : > { %v1210_v14 = vpop.xlane.xlu0 %1209 }
 0x3a2   : > { %3202 = vrcp.f32 %v1210_v14 }
 0x3a3   : > { %3204 = vrcp.f32 %v1377_v10 }
 0x3a5   : > { %v1381_v18 = vpop.permute.xlu0 %1380 }
 0x3ac   : > { %v3203_v15 = vpop.eup %3202 }
 0x3ad   : > { %v1212_v16 = vmul.f32 %v3203_v15, %v3197_v63  ;;  %v3205_v17 = vpop.eup %3204 }
 0x3ae   : > { %v1379_v19 = vmul.f32 %v3205_v17, %v3195_v58  ;;  %v1590_v58 = vld [vmem:[%s3731_s8 + $0x8] sm:$0xff] }
 0x3af   : > { %2990 = vmatmul.mubr.msk.f32.vlgmr.msra.gmra.mrb[8].mxu1 %vm791_vm2, %v1212_v16  ;;  %v3129_v59 = vpack.c.bf16 %v1590_v58, %v1589_v57  ;;  %v2852_v16 = vld [vmem:[%s3732_s9] ss:$0 sm:$0xff] }
 0x3b0   : > { %2998 = vmatpush3.msra.mxu1 %v1381_v18  ;;  %2999 = vmatprep.mubr.msk.f32.mxu1 %vm3239_vm0, %v3240_v6 }
 0x3b1   : > { %3128 = vmatprep.subr.bf16.mxu1 %v3238_v3 }
 0x3b3   : > { %3000 = vmatmul.mubr.msk.f32.vlgmr.msra.gmra.mrb[10].mxu1 %vm791_vm2, %v1379_v19 }
 0x3b4   : > { %3021 = vmatprep.mubr.msk.f32.mxu1 %vm3239_vm0, %v3240_v6  ;;  %3130 = vmatpush3.bf16.msra.mxu1 %v3129_v59 }
 0x3b5   : > { %3131 = vmatprep.subr.bf16.mxu1 %v3238_v3 }
 0x3b8   : > { %3133 = vmatpush3.bf16.msra.mxu1 %v3132_v62 }
 0x3b9   : > { %3035 = vmatprep.subr.mxu1 %v3240_v6 }
 0x44d   : > { %v951_v23 = vpop.f32.mrb[4].mxu1 }
 0x44e   : > { %v2971_v24 = vpop.f32.mrb[5].mxu1 }
 0x451   : > { %v1118_v25 = vpop.f32.mrb[6].mxu1 }
 0x452   : > { %1457 = vrot.lane.b32.xlu1 %v1118_v25, %s3753_s24  ;;  %v2981_v26 = vpop.f32.mrb[7].mxu1  ;;  %s3773_s24 = smov 112  }
 0x482   : > { %v1285_v30 = vpop.f32.mrb[8].mxu1 }
 0x483   : > { %1461 = vrot.lane.b32.xlu0 %v1285_v30, %s3752_s30  ;;  %v2991_v31 = vpop.f32.mrb[9].mxu1 }
 0x486   : > { %v1452_v32 = vpop.f32.mrb[10].mxu1 }
 0x487   : > { %1465 = vrot.lane.b32.xlu1 %v1452_v32, %s3751_s28  ;;  %v3001_v33 = vpop.f32.mrb[11].mxu1 }
 0x4c4   : > { %v1458_v34 = vpop.permute.xlu1 %1457 }
 0x4c5   : > { %v1468_v36 = vsel %vm791_vm2, %v951_v23, %v1458_v34 }
 0x4f5   : > { %v1462_v35 = vpop.permute.xlu0 %1461 }
 0x4f6   : > { %v1470_v37 = vsel %vm1469_vm4, %v1468_v36, %v1462_v35 }
 0x4f9   : > { %v1466_v38 = vpop.permute.xlu1 %1465 }
 0x4fa   : > { %v1472_v39 = vsel %vm1471_vm5, %v1470_v37, %v1466_v38 }
 0x4fb   : > { %3011 = vmatmul.mubr.msk.f32.vlgmr.msra.gmra.mrb[6].mxu0 %vm708_vm1, %v1472_v39 }
 0x4fc   : > { %3032 = vmatprep.mubr.msk.f32.mxu0 %vm3239_vm0, %v3240_v6 }
 0x5ce   : > { %v1553_v41 = vpop.f32.mrb[6].mxu0 }
 0x5cf   : > { %v1554_v42 = vadd.f32 %v2848_v40, %v1553_v41  ;;  %v3012_v43 = vpop.f32.mrb[7].mxu0 }
 0x5d1   : > { %v1557_v44 = vadd.f32 %v1554_v42, %v3404_v8  ;;  %v3135_v8 = vpack.c.bf16 %v1674_v52, %v1673_v51 }
 0x5d3   : > { %v1560_v45 = vsel %vm708_vm1, %v1557_v44, 0.0  ;;  %3136 = vmatpush3.bf16.msra.mxu0 %v3135_v8 }
 0x5d4   : > { %1561 = vadd.xlane.f32.xlu0 %v1560_v45  ;;  %3137 = vmatprep.subr.bf16.mxu0 %v3238_v3 }
 0x5d7   : > { %3139 = vmatpush3.bf16.msra.mxu0 %v3138_v55 }
 0x5d8   : > { %3045 = vmatprep.subr.mxu0 %v3240_v6 }
 0x5da   : > { %3033 = vmatmul.mubr.msk.f32.vlgmr.msra.gmra.mrb[8].mxu0 %vm708_vm1, %v1588_v56 }
 0x5db   : > { %3047 = vmatprep.mubr.msk.f32.mxu0 %vm3239_vm0, %v3240_v6 }
 0x661   : > { %v1562_v46 = vpop.xlane.xlu0 %1561 }
 0x662   : > { %v1564_v47 = vmul.f32 0.03125, %v1562_v46 }
 0x664   : > { %v1565_v48 = vsub.f32 %v1557_v44, %v1564_v47 }
 0x666   : > { %v1566_v49 = vmul.f32 %v1565_v48, %v1565_v48 }
 0x668   : > { %v1567_v50 = vsel %vm708_vm1, %v1566_v49, 0.0 }
 0x669   : > { %1568 = vadd.xlane.f32.xlu1 %v1567_v50 }
 0x6ad   : > { %v1753_v11 = vpop.f32.mrb[8].mxu0 }
 0x6ae   : > { %v3558_v13 = vadd.f32 %v2854_v12, %v1753_v11  ;;  %v3034_v14 = vpop.f32.mrb[9].mxu0 }
 0x6b0   : > { %1923 = vrot.lane.b32.xlu0 %v3558_v13, %s3241_s23 }
 0x6b4   : > { %2089 = vrot.lane.b32.xlu0 %v3558_v13, %s3773_s24 }
 0x6b8   : > { %2255 = vrot.lane.b32.xlu0 %v3558_v13, %s3774_s26 }
 0x6f6   : > { %v1569_v63 = vpop.xlane.xlu1 %1568 }
 0x6f7   : > { %v1570_v0 = vmul.f32 0.03125, %v1569_v63 }
 0x6f9   : > { %v1571_v1 = vadd.f32 1e-12, %v1570_v0 }
 0x6fb   : > { %3206 = vrsqrt.f32 %v1571_v1 }
 0x705   : > { %v3207_v2 = vpop.eup %3206 }
 0x706   : > { %v1573_v5 = vmul.f32 %v3207_v2, %v1565_v48 }
 0x708   : > { %v1580_v9 = vmul.f32 %v2850_v4, %v1573_v5 }
 0x70a   : > { %v3549_v10 = vadd.f32 %v2851_v7, %v1580_v9 }
 0x70c   : > { %3022 = vmatmul.mubr.msk.f32.vlgmr.msra.gmra.mrb[12].mxu1 %vm708_vm1, %v3549_v10 }
 0x70d   : > { %3037 = vmatprep.mubr.msk.f32.mxu1 %vm3239_vm0, %v3240_v6  ;;  %3036 = vmatpush3.xpose.msk.msra.mxu1 %vm791_vm2, %v3558_v13 }
 0x70e   : > { %3040 = vmatprep.subr.mxu1 %v3240_v6 }
 0x722   : > { %v1924_v15 = vpop.permute.xlu0 %1923 }
 0x723   : > { %3046 = vmatpush3.xpose.msk.msra.mxu0 %vm791_vm2, %v1924_v15 }
 0x724   : > { %3055 = vmatprep.subr.mxu0 %v3240_v6 }
 0x726   : > { %v2090_v20 = vpop.permute.xlu0 %2089 }
 0x72a   : > { %v2256_v23 = vpop.permute.xlu0 %2255 }
 0x7df   : > { %v1669_v17 = vpop.f32.mrb[12].mxu1 }
 0x7e0   : > { %v1670_v18 = vadd.f32 %v2852_v16, %v1669_v17  ;;  %v3023_v19 = vpop.f32.mrb[13].mxu1 }
 0x7e1   : > { %v2435_v19 = vld [vmem:[%s3735_s12 + $0x8] sm:$0xff] }
 0x7e2   : > { %1921 = vrot.lane.b32.xlu1 %v1670_v18, %s3241_s23  ;;  %3038 = vmatmul.mubr.msk.f32.vlgmr.msra.gmra.mrb[14].mxu1 %vm791_vm2, %v1670_v18  ;;  %s3775_s23 = smov 96  }
 0x7e3   : > { %3042 = vmatprep.mubr.msk.f32.mxu1 %vm3239_vm0, %v3240_v6 }
 0x7e6   : > { %2087 = vrot.lane.b32.xlu1 %v1670_v18, %s3773_s24 }
 0x7ea   : > { %2253 = vrot.lane.b32.xlu1 %v1670_v18, %s3774_s26  ;;  %v2434_v18 = vld [vmem:[%s3735_s12] sm:$0xff] }
 0x854   : > { %v1922_v21 = vpop.permute.xlu1 %1921 }
 0x855   : > { %3048 = vmatmul.mubr.msk.f32.vlgmr.msra.gmra.mrb[10].mxu0 %vm791_vm2, %v1922_v21  ;;  %v2436_v21 = vld [vmem:[%s3735_s12 + $0x10] sm:$0xff] }
 0x856   : > { %3056 = vmatpush3.xpose.msk.msra.mxu0 %vm791_vm2, %v2090_v20  ;;  %3057 = vmatprep.mubr.msk.f32.mxu0 %vm3239_vm0, %v3240_v6  ;;  %v3141_v20 = vpack.c.bf16 %v2435_v19, %v2434_v18 }
 0x857   : > { %3065 = vmatprep.subr.mxu0 %v3240_v6 }
 0x858   : > { %v2088_v22 = vpop.permute.xlu1 %2087 }
 0x859   : > { %3058 = vmatmul.mubr.msk.f32.vlgmr.msra.gmra.mrb[12].mxu0 %vm791_vm2, %v2088_v22  ;;  %v2437_v22 = vld [vmem:[%s3735_s12 + $0x18] sm:$0xff] }
 0x85a   : > { %3066 = vmatpush3.xpose.msk.msra.mxu0 %vm791_vm2, %v2256_v23  ;;  %3067 = vmatprep.mubr.msk.f32.mxu0 %vm3239_vm0, %v3240_v6  ;;  %v3144_v23 = vpack.c.bf16 %v2437_v22, %v2436_v21 }
 0x85b   : > { %3140 = vmatprep.subr.bf16.mxu0 %v3238_v3 }
 0x85c   : > { %v2254_v24 = vpop.permute.xlu1 %2253 }
 0x85d   : > { %3068 = vmatmul.mubr.msk.f32.vlgmr.msra.gmra.mrb[14].mxu0 %vm791_vm2, %v2254_v24 }
 0x85e   : > { %3083 = vmatprep.mubr.msk.f32.mxu0 %vm3239_vm0, %v3240_v6  ;;  %3142 = vmatpush3.bf16.msra.mxu0 %v3141_v20 }
 0x85f   : > { %3143 = vmatprep.subr.bf16.mxu0 %v3238_v3 }
 0x862   : > { %3145 = vmatpush3.bf16.msra.mxu0 %v3144_v23  ;;  %v2874_v23 = vld [vmem:[%s3742_s19] ss:$0 sm:$0xff] }
 0x863   : > { %3152 = vmatprep.subr.bf16.mxu0 %v3238_v3 }
 0x8b5   : > { %v1829_v25 = vpop.f32.mrb[14].mxu1 }
 0x8b6   : > { %v1833_v26 = vmul.f32 0.35355338, %v1829_v25  ;;  %v3039_v27 = vpop.f32.mrb[15].mxu1 }
 0x8b8   : > { %v1834_v28 = vsel %vm791_vm2, %v1833_v26, -inf }
 0x8b9   : > { %1835 = vmax.xlane.f32.xlu0 %v1834_v28 }
 0x928   : > { %v1995_v29 = vpop.f32.mrb[10].mxu0 }
 0x929   : > { %v1999_v30 = vmul.f32 0.35355338, %v1995_v29  ;;  %v3049_v31 = vpop.f32.mrb[11].mxu0 }
 0x92b   : > { %v2000_v32 = vsel %vm791_vm2, %v1999_v30, -inf }
 0x92c   : > { %2001 = vmax.xlane.f32.xlu1 %v2000_v32  ;;  %v2161_v33 = vpop.f32.mrb[12].mxu0 }
 0x92d   : > { %v2165_v34 = vmul.f32 0.35355338, %v2161_v33  ;;  %v3059_v35 = vpop.f32.mrb[13].mxu0 }
 0x92f   : > { %v2166_v36 = vsel %vm791_vm2, %v2165_v34, -inf }
 0x930   : > { %v2327_v37 = vpop.f32.mrb[14].mxu0  ;;  %2167 = vmax.xlane.f32.xlu0 %v2166_v36  ;;  %v2868_v36 = vld [vmem:[%s3736_s13] ss:$0 sm:$0xff] }
 0x931   : > { %v2331_v38 = vmul.f32 0.35355338, %v2327_v37  ;;  %v3069_v39 = vpop.f32.mrb[15].mxu0 }
 0x933   : > { %v2332_v40 = vsel %vm791_vm2, %v2331_v38, -inf }
 0x934   : > { %2333 = vmax.xlane.f32.xlu0 %v2332_v40 }
 0x93d   : > { %1845 = vrot.lane.b32.xlu1 %v3558_v13, %s3775_s23  ;;  %s695_s23 = scalar_lea.vmem %s3745_s22, %s3398_s25 }
 0x946   : > { %v1836_v41 = vpop.xlane.xlu0 %1835 }
 0x947   : > { %v1837_v42 = vsub.f32 %v1833_v26, %v1836_v41 }
 0x949   : > { %v1838_v43 = vmul.f32 1.442695, %v1837_v42 }
 0x94b   : > { %3208 = vpow2.f32 %v1838_v43 }
 0x955   : > { %v3209_v44 = vpop.eup %3208 }
 0x956   : > { %v1840_v45 = vsel %vm791_vm2, %v3209_v44, 0.0 }
 0x961   : > { %1841 = vadd.xlane.f32.xlu1 %v1840_v45 }
 0x9b9   : > { %v2002_v46 = vpop.xlane.xlu1 %2001 }
 0x9ba   : > { %v2003_v47 = vsub.f32 %v1999_v30, %v2002_v46 }
 0x9bc   : > { %v2004_v48 = vmul.f32 1.442695, %v2003_v47  ;;  %v2549_v47 = vld [vmem:[%s3739_s16 + $0x8] sm:$0xff] }
 0x9bd   : > { %v1846_v49 = vpop.permute.xlu1 %1845  ;;  %v2168_v50 = vpop.xlane.xlu0 %2167 }
 0x9be   : > { %3210 = vpow2.f32 %v2004_v48  ;;  %v2169_v51 = vsub.f32 %v2165_v34, %v2168_v50  ;;  %3041 = vmatpush3.msra.mxu1 %v1846_v49  ;;  %v2551_v49 = vld [vmem:[%s3739_s16 + $0x18] sm:$0xff] }
 0x9bf   : > { %3050 = vmatprep.subr.mxu1 %v3240_v6 }
 0x9c0   : > { %v2170_v52 = vmul.f32 1.442695, %v2169_v51 }
 0x9c1   : > { %v2334_v8 = vpop.xlane.xlu0 %2333 }
 0x9c2   : > { %3212 = vpow2.f32 %v2170_v52  ;;  %v2335_v53 = vsub.f32 %v2331_v38, %v2334_v8 }
 0x9c4   : > { %v2336_v54 = vmul.f32 1.442695, %v2335_v53 }
 0x9c6   : > { %3214 = vpow2.f32 %v2336_v54  ;;  %v2870_v54 = vld [vmem:[%s3737_s14] ss:$0 sm:$0xff] }
 0x9c8   : > { %v3211_v55 = vpop.eup %3210 }
 0x9c9   : > { %v2006_v56 = vsel %vm791_vm2, %v3211_v55, 0.0 }
 0x9ca   : > { %2007 = vadd.xlane.f32.xlu0 %v2006_v56  ;;  %v2871_v56 = vld [vmem:[%s3738_s15] ss:$0 sm:$0xff] }
 0x9cc   : > { %v3213_v57 = vpop.eup %3212 }
 0x9cd   : > { %v2172_v58 = vsel %vm791_vm2, %v3213_v57, 0.0 }
 0x9ce   : > { %2173 = vadd.xlane.f32.xlu1 %v2172_v58 }
 0x9d0   : > { %v3215_v59 = vpop.eup %3214 }
 0x9d1   : > { %v2338_v60 = vsel %vm791_vm2, %v3215_v59, 0.0 }
 0x9d2   : > { %2339 = vadd.xlane.f32.xlu0 %v2338_v60  ;;  %v2642_v60 = vld [vmem:[%s3741_s18 + $0x8] sm:$0xff] }
 0x9df   : > { %2177 = vrot.lane.b32.xlu1 %v3558_v13, %s3776_s27  ;;  %s3779_s27 = smov 8  }
 0x9e3   : > { %2343 = vrot.lane.b32.xlu1 %v3558_v13, %s3777_s5  ;;  %s3780_s5 = smov 16  }
 0x9e8   : > { %2011 = vrot.lane.b32.xlu0 %v3558_v13, %s3778_s6  ;;  %s3781_s6 = smov 24  }
 0x9ee   : > { %v1842_v61 = vpop.xlane.xlu1 %1841 }
 0x9ef   : > { %3216 = vrcp.f32 %v1842_v61 }
 0x9f9   : > { %v3217_v62 = vpop.eup %3216 }
 0x9fa   : > { %v1844_v63 = vmul.f32 %v3217_v62, %v3209_v44  ;;  %v2643_v62 = vld [vmem:[%s3741_s18 + $0x10] sm:$0xff] }
 0x9fc   : > { %3043 = vmatmul.mubr.msk.f32.vlgmr.msra.gmra.mrb[16].mxu1 %vm791_vm2, %v1844_v63  ;;  %v2644_v63 = vld [vmem:[%s3741_s18 + $0x18] sm:$0xff] }
 0x9fd   : > { %3052 = vmatprep.mubr.msk.f32.mxu1 %vm3239_vm0, %v3240_v6 }
 0xa57   : > { %v2008_v0 = vpop.xlane.xlu0 %2007 }
 0xa58   : > { %3218 = vrcp.f32 %v2008_v0  ;;  %v3156_v0 = vpack.c.bf16 %v2644_v63, %v2643_v62 }
 0xa5b   : > { %v2174_v1 = vpop.xlane.xlu1 %2173 }
 0xa5c   : > { %3220 = vrcp.f32 %v2174_v1  ;;  %v2645_v1 = vld [vmem:[%s3741_s18 + $0x20] sm:$0xff] }
 0xa5f   : > { %v2340_v2 = vpop.xlane.xlu0 %2339  ;;  %v2178_v7 = vpop.permute.xlu1 %2177 }
 0xa60   : > { %3222 = vrcp.f32 %v2340_v2  ;;  %v2646_v2 = vld [vmem:[%s3741_s18 + $0x28] sm:$0xff] }
 0xa62   : > { %v3219_v4 = vpop.eup %3218 }
 0xa63   : > { %v2010_v5 = vmul.f32 %v3219_v4, %v3211_v55  ;;  %v2012_v9 = vpop.permute.xlu0 %2011  ;;  %v2344_v13 = vpop.permute.xlu1 %2343  ;;  %v3159_v4 = vpack.c.bf16 %v2646_v2, %v2645_v1 }
 0xa64   : > { %3051 = vmatpush3.msra.mxu1 %v2012_v9 }
 0xa65   : > { %3053 = vmatmul.mubr.msk.f32.vlgmr.msra.gmra.mrb[18].mxu1 %vm791_vm2, %v2010_v5  ;;  %3060 = vmatprep.subr.mxu1 %v3240_v6  ;;  %v2647_v5 = vld [vmem:[%s3741_s18 + $0x30] sm:$0xff] }
 0xa66   : > { %v3221_v12 = vpop.eup %3220  ;;  %3061 = vmatpush3.msra.mxu1 %v2178_v7  ;;  %3062 = vmatprep.mubr.msk.f32.mxu1 %vm3239_vm0, %v3240_v6  ;;  %v2648_v7 = vld [vmem:[%s3741_s18 + $0x38] sm:$0xff] }
 0xa67   : > { %v2176_v11 = vmul.f32 %v3221_v12, %v3213_v57  ;;  %3070 = vmatprep.subr.mxu1 %v3240_v6  ;;  %v3162_v9 = vpack.c.bf16 %v2648_v7, %v2647_v5  ;;  %v2872_v12 = vld [vmem:[%s3740_s17] ss:$0 sm:$0xff] }
 0xa69   : > { %3063 = vmatmul.mubr.msk.f32.vlgmr.msra.gmra.mrb[20].mxu1 %vm791_vm2, %v2176_v11 }
 0xa6a   : > { %v3223_v14 = vpop.eup %3222  ;;  %3071 = vmatpush3.msra.mxu1 %v2344_v13  ;;  %3072 = vmatprep.mubr.msk.f32.mxu1 %vm3239_vm0, %v3240_v6 }
 0xa6b   : > { %v2342_v15 = vmul.f32 %v3223_v14, %v3215_v59  ;;  %3146 = vmatprep.subr.bf16.mxu1 %v3238_v3  ;;  %v2641_v59 = vld [vmem:[%s3741_s18] sm:$0xff] }
 0xa6c   : > { %v3153_v61 = vpack.c.bf16 %v2642_v60, %v2641_v59 }
 0xa6d   : > { %3073 = vmatmul.mubr.msk.f32.vlgmr.msra.gmra.mrb[22].mxu1 %vm791_vm2, %v2342_v15 }
 0xa6e   : > { %3094 = vmatprep.mubr.msk.f32.mxu1 %vm3239_vm0, %v3240_v6 }
 0xacf   : > { %v1917_v16 = vpop.f32.mrb[16].mxu1 }
 0xad0   : > { %v3044_v17 = vpop.f32.mrb[17].mxu1 }
 0xb38   : > { %v2083_v24 = vpop.f32.mrb[18].mxu1 }
 0xb39   : > { %2420 = vrot.lane.b32.xlu0 %v2083_v24, %s3779_s27  ;;  %v3054_v25 = vpop.f32.mrb[19].mxu1 }
 0xb3c   : > { %v2249_v26 = vpop.f32.mrb[20].mxu1 }
 0xb3d   : > { %2424 = vrot.lane.b32.xlu1 %v2249_v26, %s3780_s5  ;;  %v3064_v27 = vpop.f32.mrb[21].mxu1 }
 0xb40   : > { %v2415_v28 = vpop.f32.mrb[22].mxu1 }
 0xb41   : > { %2428 = vrot.lane.b32.xlu0 %v2415_v28, %s3781_s6  ;;  %v3074_v29 = vpop.f32.mrb[23].mxu1 }
 0xbab   : > { %v2421_v30 = vpop.permute.xlu0 %2420 }
 0xbac   : > { %v2431_v32 = vsel %vm791_vm2, %v1917_v16, %v2421_v30 }
 0xbaf   : > { %v2425_v31 = vpop.permute.xlu1 %2424 }
 0xbb0   : > { %v2432_v33 = vsel %vm1469_vm4, %v2431_v32, %v2425_v31 }
 0xbb3   : > { %v2429_v34 = vpop.permute.xlu0 %2428 }
 0xbb4   : > { %v2433_v35 = vsel %vm1471_vm5, %v2432_v33, %v2429_v34 }
 0xbb5   : > { %3084 = vmatmul.mubr.msk.f32.vlgmr.msra.gmra.mrb[16].mxu0 %vm708_vm1, %v2433_v35 }
 0xbb6   : > { %3113 = vmatprep.mubr.msk.f32.mxu0 %vm3239_vm0, %v3240_v6  ;;  %v2548_v6 = vld [vmem:[%s3739_s16] sm:$0xff]  ;;  %3154 = vmatpush3.bf16.msra.mxu0 %v3153_v61 }
 0xbb7   : > { %v3147_v48 = vpack.c.bf16 %v2549_v47, %v2548_v6  ;;  %3155 = vmatprep.subr.bf16.mxu0 %v3238_v3 }
 0xbb9   : > { %3148 = vmatpush3.bf16.msra.mxu1 %v3147_v48 }
 0xbba   : > { %3149 = vmatprep.subr.bf16.mxu1 %v3238_v3  ;;  %3157 = vmatpush3.bf16.msra.mxu0 %v3156_v0 }
 0xbbb   : > { %3158 = vmatprep.subr.bf16.mxu0 %v3238_v3 }
 0xbbe   : > { %3160 = vmatpush3.bf16.msra.mxu0 %v3159_v4 }
 0xbbf   : > { %3161 = vmatprep.subr.bf16.mxu0 %v3238_v3 }
 0xbc2   : > { %3163 = vmatpush3.bf16.msra.mxu0 %v3162_v9 }
 0xc88   : > { %v2514_v37 = vpop.f32.mrb[16].mxu0 }
 0xc89   : > { %v2515_v38 = vadd.f32 %v2868_v36, %v2514_v37  ;;  %v3085_v39 = vpop.f32.mrb[17].mxu0 }
 0xc8b   : > { %v2518_v40 = vadd.f32 %v2515_v38, %v3549_v10  ;;  %v2550_v10 = vld [vmem:[%s3739_s16 + $0x10] sm:$0xff]  ;;  %v2876_v38 = vld [vmem:[%s3743_s20] ss:$0 sm:$0xff] }
 0xc8c   : > { %v3150_v50 = vpack.c.bf16 %v2551_v49, %v2550_v10 }
 0xc8d   : > { %v2521_v41 = vsel %vm708_vm1, %v2518_v40, 0.0 }
 0xc8e   : > { %2522 = vadd.xlane.f32.xlu1 %v2521_v41  ;;  %3151 = vmatpush3.bf16.msra.mxu1 %v3150_v50 }
 0xd1b   : > { %v2523_v42 = vpop.xlane.xlu1 %2522 }
 0xd1c   : > { %v2524_v43 = vmul.f32 0.03125, %v2523_v42 }
 0xd1e   : > { %v2525_v44 = vsub.f32 %v2518_v40, %v2524_v43  ;;  %v2877_v40 = vld [vmem:[%s3744_s21] ss:$0 sm:$0xff] }
 0xd20   : > { %v2526_v45 = vmul.f32 %v2525_v44, %v2525_v44 }
 0xd22   : > { %v2527_v46 = vsel %vm708_vm1, %v2526_v45, 0.0 }
 0xd23   : > { %2528 = vadd.xlane.f32.xlu0 %v2527_v46 }
 0xdb0   : > { %v2529_v51 = vpop.xlane.xlu0 %2528 }
 0xdb1   : > { %v2530_v52 = vmul.f32 0.03125, %v2529_v51 }
 0xdb3   : > { %v2531_v8 = vadd.f32 1e-12, %v2530_v52 }
 0xdb5   : > { %3224 = vrsqrt.f32 %v2531_v8 }
 0xdbf   : > { %v3225_v53 = vpop.eup %3224 }
 0xdc0   : > { %v2533_v55 = vmul.f32 %v3225_v53, %v2525_v44 }
 0xdc2   : > { %v2540_v57 = vmul.f32 %v2870_v54, %v2533_v55 }
 0xdc4   : > { %v2547_v58 = vadd.f32 %v2871_v56, %v2540_v57 }
 0xdc6   : > { %3095 = vmatmul.mubr.msk.f32.vlgmr.msra.gmra.mrb[24].mxu1 %vm708_vm1, %v2547_v58 }
 0xe99   : > { %v2628_v11 = vpop.f32.mrb[24].mxu1 }
 0xe9a   : > { %v2629_v13 = vadd.f32 %v2872_v12, %v2628_v11  ;;  %v3096_v14 = vpop.f32.mrb[25].mxu1 }
 0xe9c   : > { %v2632_v15 = vmul.f32 %v2629_v13, %v2629_v13 }
 0xe9e   : > { %v2633_v16 = vmul.f32 %v2632_v15, %v2629_v13 }
 0xea0   : > { %v2634_v3 = vmul.f32 0.044715, %v2633_v16 }
 0xea2   : > { %v2635_v17 = vadd.f32 %v2634_v3, %v2629_v13 }
 0xea4   : > { %v2636_v18 = vmul.f32 0.7978846, %v2635_v17 }
 0xea6   : > { %3226 = vtanh.f32 %v2636_v18 }
 0xeb0   : > { %v3227_v19 = vpop.eup %3226 }
 0xeb1   : > { %v2638_v20 = vadd.f32 1.0, %v3227_v19 }
 0xeb3   : > { %v2639_v21 = vmul.f32 0.5, %v2638_v20 }
 0xeb5   : > { %v2640_v22 = vmul.f32 %v2639_v21, %v2629_v13 }
 0xeb7   : > { %3114 = vmatmul.mubr.msk.f32.vlgmr.msra.gmra.mrb[18].mxu0 %vm2656_vm6, %v2640_v22 }
 0xf8a   : > { %v2726_v24 = vpop.f32.mrb[18].mxu0 }
 0xf8b   : > { %v2727_v25 = vadd.f32 %v2874_v23, %v2726_v24  ;;  %v3115_v26 = vpop.f32.mrb[19].mxu0 }
 0xf8d   : > { %v2730_v27 = vadd.f32 %v2727_v25, %v2547_v58 }
 0xf8f   : > { %v2733_v28 = vsel %vm708_vm1, %v2730_v27, 0.0 }
 0xf90   : > { %2734 = vadd.xlane.f32.xlu0 %v2733_v28 }
0x101d   : > { %v2735_v29 = vpop.xlane.xlu0 %2734 }
0x101e   : > { %v2736_v30 = vmul.f32 0.03125, %v2735_v29 }
0x1020   : > { %v2737_v31 = vsub.f32 %v2730_v27, %v2736_v30 }
0x1022   : > { %v2738_v32 = vmul.f32 %v2737_v31, %v2737_v31 }
0x1024   : > { %v2739_v33 = vsel %vm708_vm1, %v2738_v32, 0.0 }
0x1025   : > { %2740 = vadd.xlane.f32.xlu1 %v2739_v33 }
0x10b2   : > { %v2741_v34 = vpop.xlane.xlu1 %2740 }
0x10b3   : > { %v2742_v35 = vmul.f32 0.03125, %v2741_v34 }
0x10b5   : > { %v2743_v36 = vadd.f32 1e-12, %v2742_v35 }
0x10b7   : > { %3228 = vrsqrt.f32 %v2743_v36 }
0x10c1   : > { %v3229_v37 = vpop.eup %3228 }
0x10c2   : > { %v2745_v39 = vmul.f32 %v3229_v37, %v2737_v31 }
0x10c4   : > { %v2752_v41 = vmul.f32 %v2876_v38, %v2745_v39 }
0x10c6   : > { %v2759_v42 = vadd.f32 %v2877_v40, %v2752_v41 }
0x10c8   : > { %2760 = vst.msk [vmem:[%s695_s23] sm:$0xff] %vm708_vm1, %v2759_v42 }
0x10c9 PF: > { %s32_s3 = sadd.s32 1, %s3236_s3  }
0x10ca   : > { %p29_p4 = scmp.ge.s32.totalorder %s32_s3, 4  }
0x10cc   :  { %31 = sbr.rel (!%p29_p4) target bundleno = 8 (0x8), region = 141 }

// kernel: transformer_decoder.6
= control target key start
LH: loop header
LB: loop body
LE: loop exit
PB: predicated region body
PF: predicated region fallthrough
CT: control target
= control target key end

     0   :  { %s3933_s0 = inlined_call_operand.vmem [shape: f32[2,8,32], index: 0, kind: input, shape index: {}]   ;;  %s3934_s1 = inlined_call_operand.vmem [shape: f32[2,8,32], index: 1, kind: input, shape index: {}]   ;;  %s3935_s2 = inlined_call_operand.vmem [shape: f32[32,96], index: 2, kind: input, shape index: {}]   ;;  %s3936_s3 = inlined_call_operand.vmem [shape: f32[1,96], index: 3, kind: input, shape index: {}]   ;;  %s3937_s4 = inlined_call_operand.vmem [shape: f32[32,32], index: 4, kind: input, shape index: {}]   ;;  %s3938_s5 = inlined_call_operand.vmem [shape: f32[1,32], index: 5, kind: input, shape index: {}]   ;;  %s3939_s6 = inlined_call_operand.vmem [shape: f32[1,32], index: 6, kind: input, shape index: {}]   ;;  %s3940_s7 = inlined_call_operand.vmem [shape: f32[1,32], index: 7, kind: input, shape index: {}]   ;;  %s3941_s8 = inlined_call_operand.vmem [shape: f32[32,32], index: 8, kind: input, shape index: {}]   ;;  %s3942_s9 = inlined_call_operand.vmem [shape: f32[1,32], index: 9, kind: input, shape index: {}]   ;;  %s3943_s10 = inlined_call_operand.vmem [shape: f32[32,64], index: 10, kind: input, shape index: {}]   ;;  %s3944_s11 = inlined_call_operand.vmem [shape: f32[1,64], index: 11, kind: input, shape index: {}]   ;;  %s3945_s12 = inlined_call_operand.vmem [shape: f32[32,32], index: 12, kind: input, shape index: {}]   ;;  %s3946_s13 = inlined_call_operand.vmem [shape: f32[1,32], index: 13, kind: input, shape index: {}]   ;;  %s3947_s14 = inlined_call_operand.vmem [shape: f32[1,32], index: 14, kind: input, shape index: {}]   ;;  %s3948_s15 = inlined_call_operand.vmem [shape: f32[1,32], index: 15, kind: input, shape index: {}]   ;;  %s3949_s16 = inlined_call_operand.vmem [shape: f32[32,64], index: 16, kind: input, shape index: {}]   ;;  %s3950_s17 = inlined_call_operand.vmem [shape: f32[1,64], index: 17, kind: input, shape index: {}]   ;;  %s3951_s18 = inlined_call_operand.vmem [shape: f32[64,32], index: 18, kind: input, shape index: {}]   ;;  %s3952_s19 = inlined_call_operand.vmem [shape: f32[1,32], index: 19, kind: input, shape index: {}]   ;;  %s3953_s20 = inlined_call_operand.hbm [shape: f32[1,32], index: 20, kind: input, shape index: {}]   ;;  %s3954_s21 = inlined_call_operand.hbm [shape: f32[1,32], index: 21, kind: input, shape index: {}]   ;;  %s3955_s22 = inlined_call_operand.vmem [shape: f32[2,8,32], index: 22, kind: output, shape index: {}]  }
   0x1   :  { %3971 = sst [smem:[#allocation8_spill]] %s3933_s0 }
   0x2   :  { %3972 = sst [smem:[#allocation9_spill]] %s3934_s1 }
   0x3   :  { %3973 = sst [smem:[#allocation10_spill]] %s3935_s2 }
   0x4   :  { %3974 = sst [smem:[#allocation11_spill]] %s3936_s3 }
   0x5   :  { %3975 = sst [smem:[#allocation12_spill]] %s3937_s4 }
   0x6   :  { %3976 = sst [smem:[#allocation13_spill]] %s3938_s5 }
   0x7   :  { %3977 = sst [smem:[#allocation14_spill]] %s3939_s6 }
   0x8   :  { %27 = vsyncpa [#allocation3], 0 }
   0x9   :  { %28 = vsyncpa [#allocation5], 0  ;;  %s3510_s3 = smov 0  }
   0xa LB: > { %s3516_s28 = sadd.s32 4294967295, %s3373_s3   ;;  %p2876_p0 = scmp.ge.s32.totalorder %s3373_s3, 1  ;;  %s3373_s3 = sphi %s3510_s3, %s34_s3  }
   0xb   : > { %p537_p1 = scmp.lt.s32.totalorder %s3373_s3, 3  ;;  %p3958_p2 = scmp.eq.s32.totalorder %s3516_s28, 0 }
   0xc   : > { %s3375_s30 = smov [#allocation2]   ;;  %s3376_s0 = smov [#allocation4]  }
   0xd   : > { %p3521_p3 = pnand %p2876_p0, %p537_p1  ;;  %s604_s4 = sshll.u32 %s3375_s30, 4  ;;  %s605_s4 = int_to_ptr.vmem [resolvable:$true] %s604_s4 }
   0xe   : > { %s615_s23 = sshll.u32 %s3376_s0, 4  ;;  %s3303_s6 = scalar_lea.hbm %s3953_s20, 16  ;;  %s3533_s23 = int_to_ptr.vmem [resolvable:$true] %s615_s23 }
   0xf   : > { %s3978_s29 = scalar_select %p3521_p3, 1, 0 }
  0x10   : > { %p3224_p4 = pneg %p3521_p3  ;;  %p3304_p6 = scmp.ne.s32.totalorder %s3953_s20, %s3303_s6 }
  0x11   : > { %p3310_p10 = scmp.lt.u32.totalorder %s3303_s6, %s3953_s20 }
  0x12   : > { %p3529_p5 = pnand %p3958_p2, %p3224_p4 }
  0x14   : > { %p3305_p7 = pneg %p3529_p5 }
  0x16   : > { %p3306_p8 = pnand %p3305_p7, %p3304_p6 }
  0x18   : > { %p3307_p9 = pneg %p3306_p8 }
  0x1a   : > { %p3312_p11 = pnand %p3310_p10, %p3307_p9 }
  0x1c   : > { %3315 = shalt.err (!%p3312_p11)
}
  0x1d   : > { %s3316_s30 = scalar_lea.vmem %s605_s4, 16  ;;  %s3323_s0 = scalar_lea.vmem %s605_s4, 32 }
  0x1e   : > { %p3317_p12 = scmp.ne.s32.totalorder %s605_s4, %s3316_s30  ;;  %p3324_p1 = scmp.lt.s32.totalorder %s605_s4, %s605_s4 }
  0x1f   : > { %p3325_p4 = scmp.lt.s32.totalorder %s3323_s0, %s3316_s30 }
  0x20   : > { %p3319_p13 = pnand %p3317_p12, %p3305_p7 }
  0x21   : > { %p3326_p2 = por %p3325_p4, %p3324_p1 }
  0x22   : > { %p3320_p0 = pneg %p3319_p13 }
  0x24   : > { %p3327_p3 = pnand %p3326_p2, %p3320_p0 }
  0x26   : > { %3330 = shalt.err (!%p3327_p3)
}
  0x27   : > { %3227 = dma.hbm_to_vmem [thread:$0]  (!%p3529_p5), %s3953_s20, 16, %s605_s4, [#allocation3]  }
  0x28   : > { %s3331_s26 = scalar_lea.hbm %s3954_s21, 16 }
  0x29   : > { %p3332_p6 = scmp.ne.s32.totalorder %s3954_s21, %s3331_s26  ;;  %p3338_p3 = scmp.lt.u32.totalorder %s3331_s26, %s3954_s21 }
  0x2b   : > { %p3334_p8 = pnand %p3332_p6, %p3305_p7 }
  0x2d   : > { %p3335_p2 = pneg %p3334_p8 }
  0x2f   : > { %p3340_p9 = pnand %p3338_p3, %p3335_p2 }
  0x31   : > { %3343 = shalt.err (!%p3340_p9)
}
  0x32   : > { %s3344_s4 = scalar_lea.vmem %s3533_s23, 16  ;;  %s3351_s5 = scalar_lea.vmem %s3533_s23, 32 }
  0x33   : > { %p3345_p10 = scmp.ne.s32.totalorder %s3533_s23, %s3344_s4  ;;  %p3352_p13 = scmp.lt.s32.totalorder %s3533_s23, %s3533_s23 }
  0x34   : > { %p3353_p0 = scmp.lt.s32.totalorder %s3351_s5, %s3344_s4 }
  0x35   : > { %p3347_p11 = pnand %p3345_p10, %p3305_p7 }
  0x36   : > { %p3354_p1 = por %p3353_p0, %p3352_p13 }
  0x37   : > { %p3348_p12 = pneg %p3347_p11 }
  0x39   : > { %p3355_p4 = pnand %p3354_p1, %p3348_p12 }
  0x3b   : > { %3358 = shalt.err (!%p3355_p4)
}
  0x3c   : > { %3230 = dma.hbm_to_vmem [thread:$0]  (!%p3529_p5), %s3954_s21, 16, %s3533_s23, [#allocation5]  }
  0x3d   : > { %p3980_p6 = scmp.ne.s32.totalorder %s3978_s29, 0 }
  0x3e   : > { %p3981_p7 = scmp.eq.s32.totalorder (!%p3980_p6), %s3516_s28, 0 }
  0x3f   : > { %642 = sbr.rel (%p3980_p6) target bundleno = 4359 (0x1107), region = 108 }
  0x46   : > { %3364 = dma.done.wait (%p3981_p7), [#allocation3], 16   ;;  %p3982_p8 = pmov %p3981_p7 }
  0x47   : > { %p3983_p2 = pmov %p3981_p7 }
  0x48   : > { %3366 = vsyncadd (%p3982_p8), [#allocation3], 4294967280 }
  0x49   : > { %3368 = dma.done.wait (%p3983_p2), [#allocation5], 16   ;;  %p3984_p3 = pmov %p3983_p2 }
  0x4a   : > { %p710_p9 = scmp.lt.s32.totalorder %s3516_s28, 1  ;;  %v3377_v0 = vmov 0.0|0.0   ;;  %vm3378_vm0 = vmmov 0   ;;  %v3379_v1 = vmov 0.0   ;;  %s3985_s1 = sld [smem:[#allocation10_spill]]  ;;  %vm734_vm1 = vcmask 261120  }
  0x4b   : > { %3370 = vsyncadd (%p3984_p3), [#allocation5], 4294967280  ;;  %3168 = vmatprep.subr.bf16.mxu1 %v3377_v0  ;;  %3011 = vmatprep.mubr.msk.f32.mxu1 %vm3378_vm0, %v3379_v1  ;;  %s3986_s6 = sld [smem:[#allocation8_spill]]  ;;  %s3987_s25 = sld [smem:[#allocation11_spill]]  ;;  %vm817_vm2 = vcmask 64512   ;;  %v808_v20 = vlaneseq  ;;  %vm1495_vm4 = vcmask 130048  }
  0x4c   : > { %3024 = vmatprep.subr.mxu0 %v3379_v1  ;;  %3026 = vmatprep.mubr.msk.f32.mxu0 %vm3378_vm0, %v3379_v1  ;;  %s4002_s28 = smov (!%p710_p9, %s3516_s28), 1  ;;  %s3380_s26 = smov 120   ;;  %v3387_v24 = vmov -1e+09   ;;  %vm1497_vm5 = vcmask 195584   ;;  %vm2682_vm6 = vcmask 523264  }
  0x4d   : > { %s3613_s4 = sshll.u32 %s4002_s28, 3  ;;  %s3966_s2 = smov 96   ;;  %v809_v21 = vshrl.u32 %v808_v20, 7  ;;  %v811_v22 = vand.u32 127, %v808_v20 }
  0x4e   : > { %s3962_s27 = smov 80   ;;  %s3960_s30 = smov 88  }
  0x4f   : > { %s3961_s0 = smov 72   ;;  %s3969_s5 = smov 112   ;;  %vm812_vm3 = vcmp.ge.s32.totalorder %v809_v21, %v811_v22 }
  0x50   : > { %v723_v2 = vld [vmem:[%s3985_s1] sm:$0xff]  ;;  %v724_v3 = vld [vmem:[%s3985_s1 + $0x8] sm:$0xff]  ;;  %v725_v4 = vld [vmem:[%s3985_s1 + $0x10] sm:$0xff]  ;;  %s3967_s24 = smov 104   ;;  %v813_v25 = vsel %vm812_vm3, 0.0, %v3387_v24  ;;  %s3390_s28 = smov 48  }
  0x51   : > { %v3169_v5 = vpack.c.bf16 %v724_v3, %v723_v2  ;;  %v726_v6 = vld [vmem:[%s3985_s1 + $0x18] sm:$0xff]  ;;  %s713_s29 = scalar_lea.vmem %s3986_s6, %s3613_s4  ;;  %v2886_v9 = vld [vmem:[%s3987_s25] ss:$0 sm:$0xff]  ;;  %s3388_s6 = smov 56  }
  0x52   : > { %v3172_v7 = vpack.c.bf16 %v726_v6, %v725_v4  ;;  %v3620_v8 = vld [vmem:[%s713_s29] sm:$0xff]  ;;  %s3389_s29 = smov 64   ;;  %s3391_s23 = smov 40  }
  0x53   : > { %3170 = vmatpush3.bf16.msra.mxu1 %v3169_v5  ;;  %s3989_s25 = sld [smem:[#allocation13_spill]] }
  0x54   : > { %3171 = vmatprep.subr.bf16.mxu1 %v3377_v0 }
  0x57   : > { %3173 = vmatpush3.bf16.msra.mxu1 %v3172_v7 }
  0x58   : > { %3014 = vmatprep.subr.mxu1 %v3379_v1 }
  0x5a   : > { %3012 = vmatmul.mubr.msk.f32.vlgmr.msra.gmra.mrb[0].mxu1 %vm734_vm1, %v3620_v8 }
  0x5b   : > { %3016 = vmatprep.mubr.msk.f32.mxu1 %vm3378_vm0, %v3379_v1 }
 0x12d   : > { %v804_v10 = vpop.f32.mrb[0].mxu1 }
 0x12e   : > { %v3630_v11 = vadd.f32 %v2886_v9, %v804_v10  ;;  %v3013_v12 = vpop.f32.mrb[1].mxu1 }
 0x130   : > { %981 = vrot.lane.b32.xlu1 %v3630_v11, %s3380_s26  ;;  %815 = vrot.lane.b32.xlu0 %v3630_v11, %s3966_s2 }
 0x134   : > { %1150 = vrot.lane.b32.xlu1 %v3630_v11, %s3962_s27  ;;  %983 = vrot.lane.b32.xlu0 %v3630_v11, %s3960_s30  ;;  %s3965_s30 = smov 8   ;;  %s3991_s27 = sld [smem:[#allocation14_spill]] }
 0x138   : > { %1317 = vrot.lane.b32.xlu1 %v3630_v11, %s3961_s0  ;;  %1148 = vrot.lane.b32.xlu0 %v3630_v11, %s3969_s5  ;;  %s3997_s0 = smov 88  }
 0x13c   : > { %1315 = vrot.lane.b32.xlu0 %v3630_v11, %s3967_s24  ;;  %s3990_s24 = sld [smem:[#allocation9_spill]] }
 0x142   : > { %s717_s5 = scalar_lea.vmem %s3990_s24, %s3613_s4 }
 0x1a2   : > { %v982_v13 = vpop.permute.xlu1 %981  ;;  %v816_v14 = vpop.permute.xlu0 %815 }
 0x1a3   : > { %3015 = vmatpush3.xpose.msk.msra.mxu1 %vm817_vm2, %v816_v14 }
 0x1a4   : > { %3019 = vmatprep.subr.mxu1 %v3379_v1 }
 0x1a6   : > { %3017 = vmatmul.mubr.msk.f32.vlgmr.msra.gmra.mrb[2].mxu1 %vm817_vm2, %v3630_v11  ;;  %v984_v15 = vpop.permute.xlu0 %983  ;;  %v1151_v16 = vpop.permute.xlu1 %1150 }
 0x1a7   : > { %3025 = vmatpush3.xpose.msk.msra.mxu0 %vm817_vm2, %v984_v15  ;;  %3021 = vmatprep.mubr.msk.f32.mxu1 %vm3378_vm0, %v3379_v1 }
 0x1a8   : > { %3034 = vmatprep.subr.mxu0 %v3379_v1 }
 0x1aa   : > { %3027 = vmatmul.mubr.msk.f32.vlgmr.msra.gmra.mrb[0].mxu0 %vm817_vm2, %v982_v13  ;;  %v1149_v17 = vpop.permute.xlu0 %1148  ;;  %v1318_v18 = vpop.permute.xlu1 %1317 }
 0x1ab   : > { %3035 = vmatpush3.xpose.msk.msra.mxu0 %vm817_vm2, %v1151_v16  ;;  %3036 = vmatprep.mubr.msk.f32.mxu0 %vm3378_vm0, %v3379_v1 }
 0x1ac   : > { %3044 = vmatprep.subr.mxu0 %v3379_v1 }
 0x1ae   : > { %3037 = vmatmul.mubr.msk.f32.vlgmr.msra.gmra.mrb[2].mxu0 %vm817_vm2, %v1149_v17  ;;  %v1316_v19 = vpop.permute.xlu0 %1315 }
 0x1af   : > { %3045 = vmatpush3.xpose.msk.msra.mxu0 %vm817_vm2, %v1318_v18  ;;  %3046 = vmatprep.mubr.msk.f32.mxu0 %vm3378_vm0, %v3379_v1 }
 0x1b0   : > { %3174 = vmatprep.subr.bf16.mxu0 %v3377_v0 }
 0x1b2   : > { %3047 = vmatmul.mubr.msk.f32.vlgmr.msra.gmra.mrb[4].mxu0 %vm817_vm2, %v1316_v19 }
 0x1b3   : > { %3062 = vmatprep.mubr.msk.f32.mxu0 %vm3378_vm0, %v3379_v1 }
 0x279   : > { %v888_v23 = vpop.f32.mrb[2].mxu1 }
 0x27a   : > { %v892_v26 = vmul.f32 0.35355338, %v888_v23  ;;  %v3018_v27 = vpop.f32.mrb[3].mxu1 }
 0x27c   : > { %v893_v28 = vadd.f32 %v892_v26, %v813_v25 }
 0x27d   : > { %v1055_v29 = vpop.f32.mrb[0].mxu0 }
 0x27e   : > { %v1059_v30 = vmul.f32 0.35355338, %v1055_v29  ;;  %v3028_v31 = vpop.f32.mrb[1].mxu0  ;;  %v894_v32 = vsel %vm817_vm2, %v893_v28, -inf }
 0x27f   : > { %895 = vmax.xlane.f32.xlu1 %v894_v32 }
 0x280   : > { %v1060_v33 = vadd.f32 %v1059_v30, %v813_v25 }
 0x281   : > { %v1222_v34 = vpop.f32.mrb[2].mxu0 }
 0x282   : > { %v1226_v35 = vmul.f32 0.35355338, %v1222_v34  ;;  %v3038_v36 = vpop.f32.mrb[3].mxu0  ;;  %v1061_v37 = vsel %vm817_vm2, %v1060_v33, -inf }
 0x283   : > { %1062 = vmax.xlane.f32.xlu0 %v1061_v37 }
 0x284   : > { %v1227_v38 = vadd.f32 %v1226_v35, %v813_v25 }
 0x285   : > { %v1389_v39 = vpop.f32.mrb[4].mxu0 }
 0x286   : > { %v1393_v40 = vmul.f32 0.35355338, %v1389_v39  ;;  %v3048_v41 = vpop.f32.mrb[5].mxu0  ;;  %v1228_v42 = vsel %vm817_vm2, %v1227_v38, -inf }
 0x287   : > { %1229 = vmax.xlane.f32.xlu0 %v1228_v42 }
 0x288   : > { %v1394_v43 = vadd.f32 %v1393_v40, %v813_v25  ;;  %v2900_v40 = vld [vmem:[%s3989_s25] ss:$0 sm:$0xff] }
 0x28a   : > { %v1395_v44 = vsel %vm817_vm2, %v1394_v43, -inf }
 0x28b   : > { %1396 = vmax.xlane.f32.xlu1 %v1395_v44 }
 0x29c   : > { %1072 = vrot.lane.b32.xlu1 %v3630_v11, %s3388_s6  ;;  %s3995_s6 = smov 80  }
 0x30c   : > { %v896_v45 = vpop.xlane.xlu1 %895 }
 0x30d   : > { %v897_v46 = vsub.f32 %v893_v28, %v896_v45 }
 0x30f   : > { %v898_v47 = vmul.f32 1.442695, %v897_v46 }
 0x310   : > { %v1063_v48 = vpop.xlane.xlu0 %1062 }
 0x311   : > { %3263 = vpow2.f32 %v898_v47  ;;  %v1064_v49 = vsub.f32 %v1060_v33, %v1063_v48 }
 0x313   : > { %v1065_v50 = vmul.f32 1.442695, %v1064_v49 }
 0x314   : > { %v1230_v60 = vpop.xlane.xlu0 %1229 }
 0x315   : > { %3265 = vpow2.f32 %v1065_v50  ;;  %v1231_v61 = vsub.f32 %v1227_v38, %v1230_v60  ;;  %v1617_v60 = vld [vmem:[%s3941_s8 + $0x10] sm:$0xff] }
 0x317   : > { %v1232_v62 = vmul.f32 1.442695, %v1231_v61  ;;  %v1618_v61 = vld [vmem:[%s3941_s8 + $0x18] sm:$0xff] }
 0x318   : > { %v1397_v51 = vpop.xlane.xlu1 %1396 }
 0x319   : > { %v1398_v52 = vsub.f32 %v1394_v43, %v1397_v51  ;;  %v1699_v51 = vld [vmem:[%s3943_s10] sm:$0xff] }
 0x31b   : > { %v3264_v53 = vpop.eup %3263  ;;  %v1399_v54 = vmul.f32 1.442695, %v1398_v52  ;;  %v1700_v52 = vld [vmem:[%s3943_s10 + $0x8] sm:$0xff] }
 0x31c   : > { %v900_v55 = vsel %vm817_vm2, %v3264_v53, 0.0  ;;  %v1073_v3 = vpop.permute.xlu1 %1072 }
 0x31d   : > { %3267 = vpow2.f32 %v1399_v54  ;;  %901 = vadd.xlane.f32.xlu0 %v900_v55  ;;  %v1702_v54 = vld [vmem:[%s3943_s10 + $0x18] sm:$0xff] }
 0x31e   : > { %3269 = vpow2.f32 %v1232_v62  ;;  %v3184_v62 = vpack.c.bf16 %v1618_v61, %v1617_v60 }
 0x31f   : > { %v3266_v56 = vpop.eup %3265 }
 0x320   : > { %v1067_v57 = vsel %vm817_vm2, %v3266_v56, 0.0 }
 0x321   : > { %1068 = vadd.xlane.f32.xlu1 %v1067_v57  ;;  %v1615_v57 = vld [vmem:[%s3941_s8] sm:$0xff] }
 0x327   : > { %v3268_v58 = vpop.eup %3267 }
 0x328   : > { %v1401_v59 = vsel %vm817_vm2, %v3268_v58, 0.0  ;;  %v3270_v63 = vpop.eup %3269 }
 0x329   : > { %1402 = vadd.xlane.f32.xlu1 %v1401_v59  ;;  %v1234_v2 = vsel %vm817_vm2, %v3270_v63, 0.0 }
 0x333   : > { %905 = vrot.lane.b32.xlu0 %v3630_v11, %s3389_s29  ;;  %s3988_s29 = sld [smem:[#allocation12_spill]] }
 0x339   : > { %v1499_v20 = vld [vmem:[%s3988_s29] sm:$0xff]  ;;  %v1500_v21 = vld [vmem:[%s3988_s29 + $0x8] sm:$0xff]  ;;  %v1501_v27 = vld [vmem:[%s3988_s29 + $0x10] sm:$0xff] }
 0x33a   : > { %1239 = vrot.lane.b32.xlu1 %v3630_v11, %s3390_s28  ;;  %v3175_v22 = vpack.c.bf16 %v1500_v21, %v1499_v20  ;;  %v1502_v28 = vld [vmem:[%s3988_s29 + $0x18] sm:$0xff]  ;;  %s3964_s28 = smov 16  }
 0x33b   : > { %v3178_v29 = vpack.c.bf16 %v1502_v28, %v1501_v27 }
 0x33c   : > { %3176 = vmatpush3.bf16.msra.mxu0 %v3175_v22 }
 0x33d   : > { %3177 = vmatprep.subr.bf16.mxu0 %v3377_v0 }
 0x340   : > { %3179 = vmatpush3.bf16.msra.mxu0 %v3178_v29 }
 0x341   : > { %3186 = vmatprep.subr.bf16.mxu0 %v3377_v0 }
 0x352   : > { %1235 = vadd.xlane.f32.xlu0 %v1234_v2 }
 0x368   : > { %1406 = vrot.lane.b32.xlu0 %v3630_v11, %s3391_s23  ;;  %s3963_s23 = smov 24  }
 0x3aa   : > { %v902_v4 = vpop.xlane.xlu0 %901 }
 0x3ab   : > { %3271 = vrcp.f32 %v902_v4 }
 0x3ae   : > { %v906_v5 = vpop.permute.xlu0 %905  ;;  %v1069_v6 = vpop.xlane.xlu1 %1068 }
 0x3af   : > { %3273 = vrcp.f32 %v1069_v6  ;;  %3020 = vmatpush3.msra.mxu1 %v906_v5  ;;  %v2902_v5 = vld [vmem:[%s3991_s27] ss:$0 sm:$0xff]  ;;  %s3996_s27 = smov 72  }
 0x3b0   : > { %3029 = vmatprep.subr.mxu1 %v3379_v1 }
 0x3b5   : > { %v3272_v7 = vpop.eup %3271 }
 0x3b6   : > { %v904_v9 = vmul.f32 %v3272_v7, %v3264_v53  ;;  %v1403_v10 = vpop.xlane.xlu1 %1402  ;;  %v1701_v53 = vld [vmem:[%s3943_s10 + $0x10] sm:$0xff]  ;;  %v2903_v7 = vld [vmem:[%s3940_s7] ss:$0 sm:$0xff] }
 0x3b7   : > { %v3190_v55 = vpack.c.bf16 %v1702_v54, %v1701_v53 }
 0x3b8   : > { %3022 = vmatmul.mubr.msk.f32.vlgmr.msra.gmra.mrb[4].mxu1 %vm817_vm2, %v904_v9 }
 0x3b9   : > { %v3274_v12 = vpop.eup %3273  ;;  %3030 = vmatpush3.msra.mxu1 %v1073_v3  ;;  %3031 = vmatprep.mubr.msk.f32.mxu1 %vm3378_vm0, %v3379_v1 }
 0x3ba   : > { %v1071_v11 = vmul.f32 %v3274_v12, %v3266_v56  ;;  %v1240_v13 = vpop.permute.xlu1 %1239  ;;  %3039 = vmatprep.subr.mxu1 %v3379_v1  ;;  %v1614_v56 = vld [vmem:[%s717_s5] sm:$0xff]  ;;  %s3993_s5 = smov 104  }
 0x3bb   : > { %v2906_v12 = vld [vmem:[%s3944_s11] ss:$0 sm:$0xff] }
 0x3bc   : > { %3032 = vmatmul.mubr.msk.f32.vlgmr.msra.gmra.mrb[6].mxu1 %vm817_vm2, %v1071_v11 }
 0x3bd   : > { %3040 = vmatpush3.msra.mxu1 %v1240_v13  ;;  %3041 = vmatprep.mubr.msk.f32.mxu1 %vm3378_vm0, %v3379_v1 }
 0x3be   : > { %3049 = vmatprep.subr.mxu1 %v3379_v1 }
 0x3df   : > { %v1236_v14 = vpop.xlane.xlu0 %1235 }
 0x3e0   : > { %3275 = vrcp.f32 %v1236_v14 }
 0x3e1   : > { %3277 = vrcp.f32 %v1403_v10 }
 0x3e3   : > { %v1407_v18 = vpop.permute.xlu0 %1406 }
 0x3ea   : > { %v3276_v15 = vpop.eup %3275 }
 0x3eb   : > { %v1238_v16 = vmul.f32 %v3276_v15, %v3270_v63  ;;  %v3278_v17 = vpop.eup %3277 }
 0x3ec   : > { %v1405_v19 = vmul.f32 %v3278_v17, %v3268_v58  ;;  %v1616_v58 = vld [vmem:[%s3941_s8 + $0x8] sm:$0xff] }
 0x3ed   : > { %3042 = vmatmul.mubr.msk.f32.vlgmr.msra.gmra.mrb[8].mxu1 %vm817_vm2, %v1238_v16  ;;  %v3181_v59 = vpack.c.bf16 %v1616_v58, %v1615_v57  ;;  %v2904_v16 = vld [vmem:[%s3942_s9] ss:$0 sm:$0xff] }
 0x3ee   : > { %3050 = vmatpush3.msra.mxu1 %v1407_v18  ;;  %3051 = vmatprep.mubr.msk.f32.mxu1 %vm3378_vm0, %v3379_v1 }
 0x3ef   : > { %3180 = vmatprep.subr.bf16.mxu1 %v3377_v0 }
 0x3f1   : > { %3052 = vmatmul.mubr.msk.f32.vlgmr.msra.gmra.mrb[10].mxu1 %vm817_vm2, %v1405_v19 }
 0x3f2   : > { %3073 = vmatprep.mubr.msk.f32.mxu1 %vm3378_vm0, %v3379_v1  ;;  %3182 = vmatpush3.bf16.msra.mxu1 %v3181_v59 }
 0x3f3   : > { %3183 = vmatprep.subr.bf16.mxu1 %v3377_v0 }
 0x3f6   : > { %3185 = vmatpush3.bf16.msra.mxu1 %v3184_v62 }
 0x3f7   : > { %3087 = vmatprep.subr.mxu1 %v3379_v1 }
 0x48b   : > { %v977_v23 = vpop.f32.mrb[4].mxu1 }
 0x48c   : > { %v3023_v24 = vpop.f32.mrb[5].mxu1 }
 0x48f   : > { %v1144_v25 = vpop.f32.mrb[6].mxu1 }
 0x490   : > { %1483 = vrot.lane.b32.xlu1 %v1144_v25, %s3965_s30  ;;  %v3033_v26 = vpop.f32.mrb[7].mxu1  ;;  %s3992_s30 = smov 112  }
 0x4c0   : > { %v1311_v30 = vpop.f32.mrb[8].mxu1 }
 0x4c1   : > { %1487 = vrot.lane.b32.xlu0 %v1311_v30, %s3964_s28  ;;  %v3043_v31 = vpop.f32.mrb[9].mxu1 }
 0x4c4   : > { %v1478_v32 = vpop.f32.mrb[10].mxu1 }
 0x4c5   : > { %1491 = vrot.lane.b32.xlu1 %v1478_v32, %s3963_s23  ;;  %v3053_v33 = vpop.f32.mrb[11].mxu1 }
 0x502   : > { %v1484_v34 = vpop.permute.xlu1 %1483 }
 0x503   : > { %v1494_v36 = vsel %vm817_vm2, %v977_v23, %v1484_v34 }
 0x533   : > { %v1488_v35 = vpop.permute.xlu0 %1487 }
 0x534   : > { %v1496_v37 = vsel %vm1495_vm4, %v1494_v36, %v1488_v35 }
 0x537   : > { %v1492_v38 = vpop.permute.xlu1 %1491 }
 0x538   : > { %v1498_v39 = vsel %vm1497_vm5, %v1496_v37, %v1492_v38 }
 0x539   : > { %3063 = vmatmul.mubr.msk.f32.vlgmr.msra.gmra.mrb[6].mxu0 %vm734_vm1, %v1498_v39 }
 0x53a   : > { %3084 = vmatprep.mubr.msk.f32.mxu0 %vm3378_vm0, %v3379_v1 }
 0x60c   : > { %v1579_v41 = vpop.f32.mrb[6].mxu0 }
 0x60d   : > { %v1580_v42 = vadd.f32 %v2900_v40, %v1579_v41  ;;  %v3064_v43 = vpop.f32.mrb[7].mxu0 }
 0x60f   : > { %v1583_v44 = vadd.f32 %v1580_v42, %v3620_v8  ;;  %v3187_v8 = vpack.c.bf16 %v1700_v52, %v1699_v51 }
 0x611   : > { %v1586_v45 = vsel %vm734_vm1, %v1583_v44, 0.0  ;;  %3188 = vmatpush3.bf16.msra.mxu0 %v3187_v8 }
 0x612   : > { %1587 = vadd.xlane.f32.xlu0 %v1586_v45  ;;  %3189 = vmatprep.subr.bf16.mxu0 %v3377_v0 }
 0x615   : > { %3191 = vmatpush3.bf16.msra.mxu0 %v3190_v55 }
 0x616   : > { %3097 = vmatprep.subr.mxu0 %v3379_v1 }
 0x618   : > { %3085 = vmatmul.mubr.msk.f32.vlgmr.msra.gmra.mrb[8].mxu0 %vm734_vm1, %v1614_v56 }
 0x619   : > { %3099 = vmatprep.mubr.msk.f32.mxu0 %vm3378_vm0, %v3379_v1 }
 0x69f   : > { %v1588_v46 = vpop.xlane.xlu0 %1587 }
 0x6a0   : > { %v1590_v47 = vmul.f32 0.03125, %v1588_v46 }
 0x6a2   : > { %v1591_v48 = vsub.f32 %v1583_v44, %v1590_v47 }
 0x6a4   : > { %v1592_v49 = vmul.f32 %v1591_v48, %v1591_v48 }
 0x6a6   : > { %v1593_v50 = vsel %vm734_vm1, %v1592_v49, 0.0 }
 0x6a7   : > { %1594 = vadd.xlane.f32.xlu1 %v1593_v50 }
 0x6eb   : > { %v1779_v11 = vpop.f32.mrb[8].mxu0 }
 0x6ec   : > { %v3774_v13 = vadd.f32 %v2906_v12, %v1779_v11  ;;  %v3086_v14 = vpop.f32.mrb[9].mxu0 }
 0x6ee   : > { %1949 = vrot.lane.b32.xlu0 %v3774_v13, %s3380_s26 }
 0x6f2   : > { %2115 = vrot.lane.b32.xlu0 %v3774_v13, %s3992_s30 }
 0x6f6   : > { %2281 = vrot.lane.b32.xlu0 %v3774_v13, %s3993_s5 }
 0x734   : > { %v1595_v63 = vpop.xlane.xlu1 %1594 }
 0x735   : > { %v1596_v2 = vmul.f32 0.03125, %v1595_v63 }
 0x737   : > { %v1597_v3 = vadd.f32 1e-12, %v1596_v2 }
 0x739   : > { %3279 = vrsqrt.f32 %v1597_v3 }
 0x743   : > { %v3280_v4 = vpop.eup %3279 }
 0x744   : > { %v1599_v6 = vmul.f32 %v3280_v4, %v1591_v48 }
 0x746   : > { %v1606_v9 = vmul.f32 %v2902_v5, %v1599_v6 }
 0x748   : > { %v3765_v10 = vadd.f32 %v2903_v7, %v1606_v9 }
 0x74a   : > { %3074 = vmatmul.mubr.msk.f32.vlgmr.msra.gmra.mrb[12].mxu1 %vm734_vm1, %v3765_v10 }
 0x74b   : > { %3089 = vmatprep.mubr.msk.f32.mxu1 %vm3378_vm0, %v3379_v1  ;;  %3088 = vmatpush3.xpose.msk.msra.mxu1 %vm817_vm2, %v3774_v13 }
 0x74c   : > { %3092 = vmatprep.subr.mxu1 %v3379_v1 }
 0x760   : > { %v1950_v15 = vpop.permute.xlu0 %1949 }
 0x761   : > { %3098 = vmatpush3.xpose.msk.msra.mxu0 %vm817_vm2, %v1950_v15 }
 0x762   : > { %3107 = vmatprep.subr.mxu0 %v3379_v1 }
 0x764   : > { %v2116_v20 = vpop.permute.xlu0 %2115 }
 0x768   : > { %v2282_v23 = vpop.permute.xlu0 %2281 }
 0x81d   : > { %v1695_v17 = vpop.f32.mrb[12].mxu1 }
 0x81e   : > { %v1696_v18 = vadd.f32 %v2904_v16, %v1695_v17  ;;  %v3075_v19 = vpop.f32.mrb[13].mxu1 }
 0x81f   : > { %v2461_v19 = vld [vmem:[%s3945_s12 + $0x8] sm:$0xff] }
 0x820   : > { %1947 = vrot.lane.b32.xlu1 %v1696_v18, %s3380_s26  ;;  %3090 = vmatmul.mubr.msk.f32.vlgmr.msra.gmra.mrb[14].mxu1 %vm817_vm2, %v1696_v18  ;;  %s3994_s26 = smov 96  }
 0x821   : > { %3094 = vmatprep.mubr.msk.f32.mxu1 %vm3378_vm0, %v3379_v1 }
 0x824   : > { %2113 = vrot.lane.b32.xlu1 %v1696_v18, %s3992_s30  ;;  %s721_s30 = scalar_lea.vmem %s3955_s22, %s3613_s4 }
 0x828   : > { %2279 = vrot.lane.b32.xlu1 %v1696_v18, %s3993_s5  ;;  %v2460_v18 = vld [vmem:[%s3945_s12] sm:$0xff] }
 0x892   : > { %v1948_v21 = vpop.permute.xlu1 %1947 }
 0x893   : > { %3100 = vmatmul.mubr.msk.f32.vlgmr.msra.gmra.mrb[10].mxu0 %vm817_vm2, %v1948_v21  ;;  %v2462_v21 = vld [vmem:[%s3945_s12 + $0x10] sm:$0xff] }
 0x894   : > { %3108 = vmatpush3.xpose.msk.msra.mxu0 %vm817_vm2, %v2116_v20  ;;  %3109 = vmatprep.mubr.msk.f32.mxu0 %vm3378_vm0, %v3379_v1  ;;  %v3193_v20 = vpack.c.bf16 %v2461_v19, %v2460_v18 }
 0x895   : > { %3117 = vmatprep.subr.mxu0 %v3379_v1 }
 0x896   : > { %v2114_v22 = vpop.permute.xlu1 %2113 }
 0x897   : > { %3110 = vmatmul.mubr.msk.f32.vlgmr.msra.gmra.mrb[12].mxu0 %vm817_vm2, %v2114_v22  ;;  %v2463_v22 = vld [vmem:[%s3945_s12 + $0x18] sm:$0xff] }
 0x898   : > { %3118 = vmatpush3.xpose.msk.msra.mxu0 %vm817_vm2, %v2282_v23  ;;  %3119 = vmatprep.mubr.msk.f32.mxu0 %vm3378_vm0, %v3379_v1  ;;  %v3196_v23 = vpack.c.bf16 %v2463_v22, %v2462_v21 }
 0x899   : > { %3192 = vmatprep.subr.bf16.mxu0 %v3377_v0 }
 0x89a   : > { %v2280_v24 = vpop.permute.xlu1 %2279 }
 0x89b   : > { %3120 = vmatmul.mubr.msk.f32.vlgmr.msra.gmra.mrb[14].mxu0 %vm817_vm2, %v2280_v24 }
 0x89c   : > { %3135 = vmatprep.mubr.msk.f32.mxu0 %vm3378_vm0, %v3379_v1  ;;  %3194 = vmatpush3.bf16.msra.mxu0 %v3193_v20 }
 0x89d   : > { %3195 = vmatprep.subr.bf16.mxu0 %v3377_v0 }
 0x8a0   : > { %3197 = vmatpush3.bf16.msra.mxu0 %v3196_v23  ;;  %v2926_v23 = vld [vmem:[%s3952_s19] ss:$0 sm:$0xff] }
 0x8a1   : > { %3204 = vmatprep.subr.bf16.mxu0 %v3377_v0 }
 0x8f3   : > { %v1855_v25 = vpop.f32.mrb[14].mxu1 }
 0x8f4   : > { %v1859_v26 = vmul.f32 0.35355338, %v1855_v25  ;;  %v3091_v27 = vpop.f32.mrb[15].mxu1 }
 0x8f6   : > { %v1860_v28 = vsel %vm817_vm2, %v1859_v26, -inf }
 0x8f7   : > { %1861 = vmax.xlane.f32.xlu0 %v1860_v28 }
 0x966   : > { %v2021_v29 = vpop.f32.mrb[10].mxu0 }
 0x967   : > { %v2025_v30 = vmul.f32 0.35355338, %v2021_v29  ;;  %v3101_v31 = vpop.f32.mrb[11].mxu0 }
 0x969   : > { %v2026_v32 = vsel %vm817_vm2, %v2025_v30, -inf }
 0x96a   : > { %2027 = vmax.xlane.f32.xlu1 %v2026_v32  ;;  %v2187_v33 = vpop.f32.mrb[12].mxu0 }
 0x96b   : > { %v2191_v34 = vmul.f32 0.35355338, %v2187_v33  ;;  %v3111_v35 = vpop.f32.mrb[13].mxu0 }
 0x96d   : > { %v2192_v36 = vsel %vm817_vm2, %v2191_v34, -inf }
 0x96e   : > { %v2353_v37 = vpop.f32.mrb[14].mxu0  ;;  %2193 = vmax.xlane.f32.xlu0 %v2192_v36  ;;  %v2920_v36 = vld [vmem:[%s3946_s13] ss:$0 sm:$0xff] }
 0x96f   : > { %v2357_v38 = vmul.f32 0.35355338, %v2353_v37  ;;  %v3121_v39 = vpop.f32.mrb[15].mxu0 }
 0x971   : > { %v2358_v40 = vsel %vm817_vm2, %v2357_v38, -inf }
 0x972   : > { %2359 = vmax.xlane.f32.xlu0 %v2358_v40 }
 0x97b   : > { %1871 = vrot.lane.b32.xlu1 %v3774_v13, %s3994_s26 }
 0x984   : > { %v1862_v41 = vpop.xlane.xlu0 %1861 }
 0x985   : > { %v1863_v42 = vsub.f32 %v1859_v26, %v1862_v41 }
 0x987   : > { %v1864_v43 = vmul.f32 1.442695, %v1863_v42 }
 0x989   : > { %3281 = vpow2.f32 %v1864_v43 }
 0x993   : > { %v3282_v44 = vpop.eup %3281 }
 0x994   : > { %v1866_v45 = vsel %vm817_vm2, %v3282_v44, 0.0 }
 0x99f   : > { %1867 = vadd.xlane.f32.xlu1 %v1866_v45 }
 0x9f7   : > { %v2028_v46 = vpop.xlane.xlu1 %2027 }
 0x9f8   : > { %v2029_v47 = vsub.f32 %v2025_v30, %v2028_v46 }
 0x9fa   : > { %v2030_v48 = vmul.f32 1.442695, %v2029_v47  ;;  %v2575_v47 = vld [vmem:[%s3949_s16 + $0x8] sm:$0xff] }
 0x9fb   : > { %v1872_v49 = vpop.permute.xlu1 %1871  ;;  %v2194_v50 = vpop.xlane.xlu0 %2193 }
 0x9fc   : > { %3283 = vpow2.f32 %v2030_v48  ;;  %v2195_v51 = vsub.f32 %v2191_v34, %v2194_v50  ;;  %3093 = vmatpush3.msra.mxu1 %v1872_v49  ;;  %v2577_v49 = vld [vmem:[%s3949_s16 + $0x18] sm:$0xff] }
 0x9fd   : > { %3102 = vmatprep.subr.mxu1 %v3379_v1 }
 0x9fe   : > { %v2196_v52 = vmul.f32 1.442695, %v2195_v51 }
 0x9ff   : > { %v2360_v8 = vpop.xlane.xlu0 %2359 }
 0xa00   : > { %3285 = vpow2.f32 %v2196_v52  ;;  %v2361_v53 = vsub.f32 %v2357_v38, %v2360_v8 }
 0xa02   : > { %v2362_v54 = vmul.f32 1.442695, %v2361_v53 }
 0xa04   : > { %3287 = vpow2.f32 %v2362_v54  ;;  %v2922_v54 = vld [vmem:[%s3947_s14] ss:$0 sm:$0xff] }
 0xa06   : > { %v3284_v55 = vpop.eup %3283 }
 0xa07   : > { %v2032_v56 = vsel %vm817_vm2, %v3284_v55, 0.0 }
 0xa08   : > { %2033 = vadd.xlane.f32.xlu0 %v2032_v56  ;;  %v2923_v56 = vld [vmem:[%s3948_s15] ss:$0 sm:$0xff] }
 0xa0a   : > { %v3286_v57 = vpop.eup %3285 }
 0xa0b   : > { %v2198_v58 = vsel %vm817_vm2, %v3286_v57, 0.0 }
 0xa0c   : > { %2199 = vadd.xlane.f32.xlu1 %v2198_v58 }
 0xa0e   : > { %v3288_v59 = vpop.eup %3287 }
 0xa0f   : > { %v2364_v60 = vsel %vm817_vm2, %v3288_v59, 0.0 }
 0xa10   : > { %2365 = vadd.xlane.f32.xlu0 %v2364_v60  ;;  %v2668_v60 = vld [vmem:[%s3951_s18 + $0x8] sm:$0xff] }
 0xa1d   : > { %2203 = vrot.lane.b32.xlu1 %v3774_v13, %s3995_s6  ;;  %s3998_s6 = smov 8  }
 0xa21   : > { %2369 = vrot.lane.b32.xlu1 %v3774_v13, %s3996_s27  ;;  %s3999_s27 = smov 16  }
 0xa26   : > { %2037 = vrot.lane.b32.xlu0 %v3774_v13, %s3997_s0  ;;  %s4000_s0 = smov 24  }
 0xa2c   : > { %v1868_v61 = vpop.xlane.xlu1 %1867 }
 0xa2d   : > { %3289 = vrcp.f32 %v1868_v61 }
 0xa37   : > { %v3290_v62 = vpop.eup %3289 }
 0xa38   : > { %v1870_v63 = vmul.f32 %v3290_v62, %v3282_v44  ;;  %v2669_v62 = vld [vmem:[%s3951_s18 + $0x10] sm:$0xff] }
 0xa3a   : > { %3095 = vmatmul.mubr.msk.f32.vlgmr.msra.gmra.mrb[16].mxu1 %vm817_vm2, %v1870_v63  ;;  %v2670_v63 = vld [vmem:[%s3951_s18 + $0x18] sm:$0xff] }
 0xa3b   : > { %3104 = vmatprep.mubr.msk.f32.mxu1 %vm3378_vm0, %v3379_v1 }
 0xa95   : > { %v2034_v2 = vpop.xlane.xlu0 %2033 }
 0xa96   : > { %3291 = vrcp.f32 %v2034_v2  ;;  %v3208_v2 = vpack.c.bf16 %v2670_v63, %v2669_v62 }
 0xa99   : > { %v2200_v3 = vpop.xlane.xlu1 %2199 }
 0xa9a   : > { %3293 = vrcp.f32 %v2200_v3  ;;  %v2671_v3 = vld [vmem:[%s3951_s18 + $0x20] sm:$0xff] }
 0xa9d   : > { %v2366_v4 = vpop.xlane.xlu0 %2365  ;;  %v2204_v7 = vpop.permute.xlu1 %2203 }
 0xa9e   : > { %3295 = vrcp.f32 %v2366_v4  ;;  %v2672_v4 = vld [vmem:[%s3951_s18 + $0x28] sm:$0xff] }
 0xaa0   : > { %v3292_v5 = vpop.eup %3291 }
 0xaa1   : > { %v2036_v6 = vmul.f32 %v3292_v5, %v3284_v55  ;;  %v2038_v9 = vpop.permute.xlu0 %2037  ;;  %v2370_v13 = vpop.permute.xlu1 %2369  ;;  %v3211_v5 = vpack.c.bf16 %v2672_v4, %v2671_v3 }
 0xaa2   : > { %3103 = vmatpush3.msra.mxu1 %v2038_v9 }
 0xaa3   : > { %3105 = vmatmul.mubr.msk.f32.vlgmr.msra.gmra.mrb[18].mxu1 %vm817_vm2, %v2036_v6  ;;  %3112 = vmatprep.subr.mxu1 %v3379_v1  ;;  %v2673_v6 = vld [vmem:[%s3951_s18 + $0x30] sm:$0xff] }
 0xaa4   : > { %v3294_v12 = vpop.eup %3293  ;;  %3113 = vmatpush3.msra.mxu1 %v2204_v7  ;;  %3114 = vmatprep.mubr.msk.f32.mxu1 %vm3378_vm0, %v3379_v1  ;;  %v2674_v7 = vld [vmem:[%s3951_s18 + $0x38] sm:$0xff] }
 0xaa5   : > { %v2202_v11 = vmul.f32 %v3294_v12, %v3286_v57  ;;  %3122 = vmatprep.subr.mxu1 %v3379_v1  ;;  %v3214_v9 = vpack.c.bf16 %v2674_v7, %v2673_v6  ;;  %v2924_v12 = vld [vmem:[%s3950_s17] ss:$0 sm:$0xff] }
 0xaa7   : > { %3115 = vmatmul.mubr.msk.f32.vlgmr.msra.gmra.mrb[20].mxu1 %vm817_vm2, %v2202_v11 }
 0xaa8   : > { %v3296_v14 = vpop.eup %3295  ;;  %3123 = vmatpush3.msra.mxu1 %v2370_v13  ;;  %3124 = vmatprep.mubr.msk.f32.mxu1 %vm3378_vm0, %v3379_v1 }
 0xaa9   : > { %v2368_v15 = vmul.f32 %v3296_v14, %v3288_v59  ;;  %3198 = vmatprep.subr.bf16.mxu1 %v3377_v0  ;;  %v2667_v59 = vld [vmem:[%s3951_s18] sm:$0xff] }
 0xaaa   : > { %v3205_v61 = vpack.c.bf16 %v2668_v60, %v2667_v59 }
 0xaab   : > { %3125 = vmatmul.mubr.msk.f32.vlgmr.msra.gmra.mrb[22].mxu1 %vm817_vm2, %v2368_v15 }
 0xaac   : > { %3146 = vmatprep.mubr.msk.f32.mxu1 %vm3378_vm0, %v3379_v1 }
 0xb0d   : > { %v1943_v16 = vpop.f32.mrb[16].mxu1 }
 0xb0e   : > { %v3096_v17 = vpop.f32.mrb[17].mxu1 }
 0xb76   : > { %v2109_v24 = vpop.f32.mrb[18].mxu1 }
 0xb77   : > { %2446 = vrot.lane.b32.xlu0 %v2109_v24, %s3998_s6  ;;  %v3106_v25 = vpop.f32.mrb[19].mxu1 }
 0xb7a   : > { %v2275_v26 = vpop.f32.mrb[20].mxu1 }
 0xb7b   : > { %2450 = vrot.lane.b32.xlu1 %v2275_v26, %s3999_s27  ;;  %v3116_v27 = vpop.f32.mrb[21].mxu1 }
 0xb7e   : > { %v2441_v28 = vpop.f32.mrb[22].mxu1 }
 0xb7f   : > { %2454 = vrot.lane.b32.xlu0 %v2441_v28, %s4000_s0  ;;  %v3126_v29 = vpop.f32.mrb[23].mxu1 }
 0xbe9   : > { %v2447_v30 = vpop.permute.xlu0 %2446 }
 0xbea   : > { %v2457_v32 = vsel %vm817_vm2, %v1943_v16, %v2447_v30 }
 0xbed   : > { %v2451_v31 = vpop.permute.xlu1 %2450 }
 0xbee   : > { %v2458_v33 = vsel %vm1495_vm4, %v2457_v32, %v2451_v31 }
 0xbf1   : > { %v2455_v34 = vpop.permute.xlu0 %2454 }
 0xbf2   : > { %v2459_v35 = vsel %vm1497_vm5, %v2458_v33, %v2455_v34 }
 0xbf3   : > { %3136 = vmatmul.mubr.msk.f32.vlgmr.msra.gmra.mrb[16].mxu0 %vm734_vm1, %v2459_v35 }
 0xbf4   : > { %3165 = vmatprep.mubr.msk.f32.mxu0 %vm3378_vm0, %v3379_v1  ;;  %v2574_v1 = vld [vmem:[%s3949_s16] sm:$0xff]  ;;  %3206 = vmatpush3.bf16.msra.mxu0 %v3205_v61 }
 0xbf5   : > { %v3199_v48 = vpack.c.bf16 %v2575_v47, %v2574_v1  ;;  %3207 = vmatprep.subr.bf16.mxu0 %v3377_v0 }
 0xbf7   : > { %3200 = vmatpush3.bf16.msra.mxu1 %v3199_v48 }
 0xbf8   : > { %3201 = vmatprep.subr.bf16.mxu1 %v3377_v0  ;;  %3209 = vmatpush3.bf16.msra.mxu0 %v3208_v2 }
 0xbf9   : > { %3210 = vmatprep.subr.bf16.mxu0 %v3377_v0 }
 0xbfc   : > { %3212 = vmatpush3.bf16.msra.mxu0 %v3211_v5 }
 0xbfd   : > { %3213 = vmatprep.subr.bf16.mxu0 %v3377_v0 }
 0xc00   : > { %3215 = vmatpush3.bf16.msra.mxu0 %v3214_v9 }
 0xcc6   : > { %v2540_v37 = vpop.f32.mrb[16].mxu0 }
 0xcc7   : > { %v2541_v38 = vadd.f32 %v2920_v36, %v2540_v37  ;;  %v3137_v39 = vpop.f32.mrb[17].mxu0 }
 0xcc9   : > { %v2544_v40 = vadd.f32 %v2541_v38, %v3765_v10  ;;  %v2576_v10 = vld [vmem:[%s3949_s16 + $0x10] sm:$0xff]  ;;  %v2928_v38 = vld [vmem:[#allocation2] ss:$0 sm:$0xff] }
 0xcca   : > { %v3202_v50 = vpack.c.bf16 %v2577_v49, %v2576_v10 }
 0xccb   : > { %v2547_v41 = vsel %vm734_vm1, %v2544_v40, 0.0 }
 0xccc   : > { %2548 = vadd.xlane.f32.xlu1 %v2547_v41  ;;  %3203 = vmatpush3.bf16.msra.mxu1 %v3202_v50 }
 0xd59   : > { %v2549_v42 = vpop.xlane.xlu1 %2548 }
 0xd5a   : > { %v2550_v43 = vmul.f32 0.03125, %v2549_v42 }
 0xd5c   : > { %v2551_v44 = vsub.f32 %v2544_v40, %v2550_v43  ;;  %v2929_v40 = vld [vmem:[#allocation4] ss:$0 sm:$0xff] }
 0xd5e   : > { %v2552_v45 = vmul.f32 %v2551_v44, %v2551_v44 }
 0xd60   : > { %v2553_v46 = vsel %vm734_vm1, %v2552_v45, 0.0 }
 0xd61   : > { %2554 = vadd.xlane.f32.xlu0 %v2553_v46 }
 0xdee   : > { %v2555_v51 = vpop.xlane.xlu0 %2554 }
 0xdef   : > { %v2556_v52 = vmul.f32 0.03125, %v2555_v51 }
 0xdf1   : > { %v2557_v8 = vadd.f32 1e-12, %v2556_v52 }
 0xdf3   : > { %3297 = vrsqrt.f32 %v2557_v8 }
 0xdfd   : > { %v3298_v53 = vpop.eup %3297 }
 0xdfe   : > { %v2559_v55 = vmul.f32 %v3298_v53, %v2551_v44 }
 0xe00   : > { %v2566_v57 = vmul.f32 %v2922_v54, %v2559_v55 }
 0xe02   : > { %v2573_v58 = vadd.f32 %v2923_v56, %v2566_v57 }
 0xe04   : > { %3147 = vmatmul.mubr.msk.f32.vlgmr.msra.gmra.mrb[24].mxu1 %vm734_vm1, %v2573_v58 }
 0xed7   : > { %v2654_v11 = vpop.f32.mrb[24].mxu1 }
 0xed8   : > { %v2655_v13 = vadd.f32 %v2924_v12, %v2654_v11  ;;  %v3148_v14 = vpop.f32.mrb[25].mxu1 }
 0xeda   : > { %v2658_v15 = vmul.f32 %v2655_v13, %v2655_v13 }
 0xedc   : > { %v2659_v16 = vmul.f32 %v2658_v15, %v2655_v13 }
 0xede   : > { %v2660_v0 = vmul.f32 0.044715, %v2659_v16 }
 0xee0   : > { %v2661_v17 = vadd.f32 %v2660_v0, %v2655_v13 }
 0xee2   : > { %v2662_v18 = vmul.f32 0.7978846, %v2661_v17 }
 0xee4   : > { %3299 = vtanh.f32 %v2662_v18 }
 0xeee   : > { %v3300_v19 = vpop.eup %3299 }
 0xeef   : > { %v2664_v20 = vadd.f32 1.0, %v3300_v19 }
 0xef1   : > { %v2665_v21 = vmul.f32 0.5, %v2664_v20 }
 0xef3   : > { %v2666_v22 = vmul.f32 %v2665_v21, %v2655_v13 }
 0xef5   : > { %3166 = vmatmul.mubr.msk.f32.vlgmr.msra.gmra.mrb[18].mxu0 %vm2682_vm6, %v2666_v22 }
 0xfc8   : > { %v2752_v24 = vpop.f32.mrb[18].mxu0 }
 0xfc9   : > { %v2753_v25 = vadd.f32 %v2926_v23, %v2752_v24  ;;  %v3167_v26 = vpop.f32.mrb[19].mxu0 }
 0xfcb   : > { %v2756_v27 = vadd.f32 %v2753_v25, %v2573_v58 }
 0xfcd   : > { %v2759_v28 = vsel %vm734_vm1, %v2756_v27, 0.0 }
 0xfce   : > { %2760 = vadd.xlane.f32.xlu0 %v2759_v28 }
0x105b   : > { %v2761_v29 = vpop.xlane.xlu0 %2760 }
0x105c   : > { %v2762_v30 = vmul.f32 0.03125, %v2761_v29 }
0x105e   : > { %v2763_v31 = vsub.f32 %v2756_v27, %v2762_v30 }
0x1060   : > { %v2764_v32 = vmul.f32 %v2763_v31, %v2763_v31 }
0x1062   : > { %v2765_v33 = vsel %vm734_vm1, %v2764_v32, 0.0 }
0x1063   : > { %2766 = vadd.xlane.f32.xlu1 %v2765_v33 }
0x10f0   : > { %v2767_v34 = vpop.xlane.xlu1 %2766 }
0x10f1   : > { %v2768_v35 = vmul.f32 0.03125, %v2767_v34 }
0x10f3   : > { %v2769_v36 = vadd.f32 1e-12, %v2768_v35 }
0x10f5   : > { %3301 = vrsqrt.f32 %v2769_v36 }
0x10ff   : > { %v3302_v37 = vpop.eup %3301 }
0x1100   : > { %v2771_v39 = vmul.f32 %v3302_v37, %v2763_v31 }
0x1102   : > { %v2778_v41 = vmul.f32 %v2928_v38, %v2771_v39 }
0x1104   : > { %v2785_v42 = vadd.f32 %v2929_v40, %v2778_v41 }
0x1106   : > { %2786 = vst.msk [vmem:[%s721_s30] sm:$0xff] %vm734_vm1, %v2785_v42 }
0x1107 PF: > { %s34_s3 = sadd.s32 1, %s3373_s3  }
0x1108   : > { %p31_p5 = scmp.ge.s32.totalorder %s34_s3, 4  }
0x110a   :  { %33 = sbr.rel (!%p31_p5) target bundleno = 10 (0xa), region = 150 }
0x1111   :  { %2806 = vsyncpa [#allocation3], 1 }
0x1112   :  { %2808 = vsyncpa [#allocation3 + $0x1], 1 }
0x1113   :  { %2809 = vsyncpa [#allocation5], 1 }

</bundles_post_ra>
